<compile_context>
chip_gen: v5e
topology: v5e:2x2
jax: 0.10.0
libtpu: 0.0.40
codegen_flags: <defaults>
</compile_context>

<pallas_src>
import functools
import math

import jax
import jax.numpy as jnp
from jax.experimental import pallas as pl
from jax.experimental.pallas import tpu as pltpu

EMBED = 256
NEG_BIG = -1e30  # finite "minus infinity" for masked max (matches previous behavior)


# ---------------------------------------------------------------------------
# Pallas kernels
# ---------------------------------------------------------------------------

def conv_relu_readout_kernel(a_ref, xk_ref, xi_ref, w_ref, b_ref, m_ref, mt_ref,
                             cnt_ref, h_ref, pooled_ref,
                             acc_ref, cat_ref, sum_ref, max_ref):
    """Fused GraphConv + ReLU + [global_max | global_mean] readout.

    grid = (row tiles i, contraction tiles k).  The A@x aggregation accumulates over
    k; at the last k the stacked weight matmul, bias, ReLU, h write-out and the
    readout partials run; at the very last grid step the [B, 2C] readout is emitted.
    """
    i = pl.program_id(0)
    k = pl.program_id(1)
    ni = pl.num_programs(0)
    nk = pl.num_programs(1)
    cin = xi_ref.shape[1]
    cout = h_ref.shape[1]
    nb = m_ref.shape[0]

    @pl.when(jnp.logical_and(i == 0, k == 0))
    def _init_readout():
        sum_ref[...] = jnp.zeros_like(sum_ref)
        max_ref[...] = jnp.full_like(max_ref, NEG_BIG)

    @pl.when(k == 0)
    def _init_acc():
        acc_ref[...] = jnp.zeros_like(acc_ref)

    # Neighbourhood aggregation (bf16 MXU inputs, f32 accumulation).
    acc_ref[...] += jnp.dot(a_ref[...], xk_ref[...], preferred_element_type=jnp.float32)

    @pl.when(k == nk - 1)
    def _finish_rows():
        # Stacked GraphConv matmul: concat([A@x, x], -1) @ [W_rel; W_root] + b_rel.
        cat_ref[:, :cin] = acc_ref[...]
        cat_ref[:, cin:] = xi_ref[...].astype(jnp.float32)
        h = jnp.dot(cat_ref[...].astype(jnp.bfloat16), w_ref[...],
                    preferred_element_type=jnp.float32) + b_ref[...]
        h = jnp.maximum(h, 0.0)
        h_ref[...] = h.astype(h_ref.dtype)

        # Readout partials on this row tile; x.long() == trunc (h >= 0 after ReLU).
        ht = jnp.trunc(h)
        sum_ref[...] += jnp.dot(m_ref[...], ht, preferred_element_type=jnp.float32)
        mt = mt_ref[...]
        # Per-graph masked max; B is small so an unrolled loop keeps the live set at
        # one [tile, C] slab (no [B, N, C] broadcast).
        for b in range(nb):
            col = mt[:, b:b + 1]                                       # [tm, 1]
            masked = jnp.where(col > 0.0, ht, jnp.float32(NEG_BIG))    # [tm, C]
            pm = jnp.max(masked, axis=0, keepdims=True)                # [1, C]
            max_ref[b:b + 1, :] = jnp.maximum(max_ref[b:b + 1, :], pm)

    @pl.when(jnp.logical_and(i == ni - 1, k == nk - 1))
    def _emit_pooled():
        # Integer mean of the long-cast features (trunc mirrors long arithmetic).
        # Empty-graph edge case keeps the previous (-1e30 / count-clamped) behavior.
        pooled_ref[:, :cout] = max_ref[...]
        pooled_ref[:, cout:] = jnp.trunc(sum_ref[...] / cnt_ref[...])


def conv_relu_score_kernel(a_ref, xk_ref, xi_ref, w_ref, b_ref, ws_ref,
                           h_ref, score_ref, acc_ref, cat_ref):
    """Fused GraphConv + ReLU + TopKPooling score tanh((x.long() . w)/||w||).

    The score weight is pre-normalized and zero-padded to 128 lanes so the score comes
    out of a single MXU matmul with lane-dense, unmasked stores (column 0 = score).
    """
    k = pl.program_id(1)
    nk = pl.num_programs(1)
    cin = xi_ref.shape[1]

    @pl.when(k == 0)
    def _init_acc():
        acc_ref[...] = jnp.zeros_like(acc_ref)

    acc_ref[...] += jnp.dot(a_ref[...], xk_ref[...], preferred_element_type=jnp.float32)

    @pl.when(k == nk - 1)
    def _finish_rows():
        cat_ref[:, :cin] = acc_ref[...]
        cat_ref[:, cin:] = xi_ref[...].astype(jnp.float32)
        h = jnp.dot(cat_ref[...].astype(jnp.bfloat16), w_ref[...],
                    preferred_element_type=jnp.float32) + b_ref[...]
        h = jnp.maximum(h, 0.0)
        h_ref[...] = h
        # pool3 receives x.long() -> score on the truncated features (f32 for fidelity).
        s = jnp.dot(jnp.trunc(h), ws_ref[...], preferred_element_type=jnp.float32)
        score_ref[...] = jnp.tanh(s)


def pooled_readout_head_kernel(h_ref, s_ref, m_ref, mt_ref, cnt_ref, x1_ref, x2_ref,
                               w1_ref, b1_ref, w2_ref, b2_ref, w3_ref, b3_ref,
                               o_ref, sum_ref, max_ref, x3_ref):
    """Fused TopK-pooled readout (x3) + xs = x1 + x2 + x3 + MLP head + sigmoid."""
    i = pl.program_id(0)
    ni = pl.num_programs(0)
    c = h_ref.shape[1]
    nb = m_ref.shape[0]

    @pl.when(i == 0)
    def _init():
        sum_ref[...] = jnp.zeros_like(sum_ref)
        max_ref[...] = jnp.full_like(max_ref, NEG_BIG)

    # TopKPooling receives x.long(): pooled features are trunc(h) * score, and gmp/gap
    # cast to long again -> trunc(trunc(h) * score) (matches the PyTorch call chain).
    xp = jnp.trunc(jnp.trunc(h_ref[...]) * s_ref[...])
    sum_ref[...] += jnp.dot(m_ref[...], xp, preferred_element_type=jnp.float32)
    mt = mt_ref[...]
    for b in range(nb):
        col = mt[:, b:b + 1]
        masked = jnp.where(col > 0.0, xp, jnp.float32(NEG_BIG))
        pm = jnp.max(masked, axis=0, keepdims=True)
        max_ref[b:b + 1, :] = jnp.maximum(max_ref[b:b + 1, :], pm)

    @pl.when(i == ni - 1)
    def _head():
        x3_ref[:, :c] = max_ref[...]
        x3_ref[:, c:] = jnp.trunc(sum_ref[...] / cnt_ref[...])
        xs = x1_ref[...] + x2_ref[...] + x3_ref[...]
        hh = jnp.dot(xs, w1_ref[...], preferred_element_type=jnp.float32) + b1_ref[...]
        hh = jnp.maximum(hh, 0.0)
        hh = jnp.dot(hh, w2_ref[...], preferred_element_type=jnp.float32) + b2_ref[...]
        hh = jnp.maximum(hh, 0.0)
        # TODO(synk): F.dropout(p=0.2) implemented in eval mode (identity); training-mode RNG dropout omitted.
        z = jnp.dot(hh, w3_ref[...], preferred_element_type=jnp.float32) + b3_ref[...]
        o_ref[...] = 1.0 / (1.0 + jnp.exp(-z))


# ---------------------------------------------------------------------------
# Tiling / VMEM helpers
# ---------------------------------------------------------------------------

def _nbytes(shape, dtype):
    n = 1
    for d in shape:
        n *= int(d)
    return n * jnp.dtype(dtype).itemsize


def _vmem_limit(tile_blocks, scratch_blocks):
    """Scoped-VMEM budget from the actual tile footprint (x2 double-buffer, x2 margin)."""
    tiles = sum(_nbytes(s, d) for s, d in tile_blocks)
    scratch = sum(_nbytes(s, d) for s, d in scratch_blocks)
    need = 2 * tiles + scratch
    return int(min(max(2 * need + (1 << 20), 8 << 20), 64 << 20))  # v7x physical = 64 MiB


def _pick_tile(n, cap):
    """Largest multiple of 128 that divides n and is <= cap; else the full dim.

    cap is kept modest so (inputs x 2 buffers x tile) + scratch stays well under the
    v7x 64 MiB VMEM as well as v5e's 16 MiB default scoped limit.
    """
    if n <= cap:
        return n
    t = (cap // 128) * 128
    while t >= 128:
        if n % t == 0:
            return t
        t -= 128
    return n


# ---------------------------------------------------------------------------
# pallas_call wrappers
# ---------------------------------------------------------------------------

def conv_relu_readout(a, x, w_stack, b, mask, mask_t, cnt, *, out_dtype=jnp.bfloat16):
    n = a.shape[0]
    cin = x.shape[1]
    cout = w_stack.shape[1]
    nb = mask.shape[0]
    tm = _pick_tile(n, 256)
    tk = _pick_tile(n, 512)

    in_blocks = [
        ((tm, tk), a.dtype, lambda i, k: (i, k)),              # A tile
        ((tk, cin), x.dtype, lambda i, k: (k, 0)),             # x rows in the aggregation
        ((tm, cin), x.dtype, lambda i, k: (i, 0)),             # x rows for the root term
        ((2 * cin, cout), w_stack.dtype, lambda i, k: (0, 0)),  # stacked [W_rel; W_root]
        ((1, cout), b.dtype, lambda i, k: (0, 0)),
        ((nb, tm), mask.dtype, lambda i, k: (0, i)),           # one-hot [B, N] tile
        ((tm, nb), mask_t.dtype, lambda i, k: (i, 0)),         # transposed mask [N, B] tile
        ((nb, 1), cnt.dtype, lambda i, k: (0, 0)),             # per-graph node counts
    ]
    out_blocks = [
        ((tm, cout), out_dtype, lambda i, k: (i, 0)),          # h (bf16: only feeds next MXU)
        ((nb, 2 * cout), jnp.float32, lambda i, k: (0, 0)),    # [gmax | gmean]
    ]
    scratch = [
        ((tm, cin), jnp.float32),       # A@x accumulator
        ((tm, 2 * cin), jnp.float32),   # concat([A@x, x]) staging
        ((nb, cout), jnp.float32),      # per-graph sum
        ((nb, cout), jnp.float32),      # per-graph max
    ]
    grid_spec = pltpu.PrefetchScalarGridSpec(
        num_scalar_prefetch=0,
        grid=(n // tm, n // tk),
        in_specs=[pl.BlockSpec(s, f) for s, _, f in in_blocks],
        out_specs=[pl.BlockSpec(s, f) for s, _, f in out_blocks],
        scratch_shapes=[pltpu.VMEM(s, d) for s, d in scratch],
    )
    h, pooled = pl.pallas_call(
        conv_relu_readout_kernel,
        out_shape=(jax.ShapeDtypeStruct((n, cout), out_dtype),
                   jax.ShapeDtypeStruct((nb, 2 * cout), jnp.float32)),
        grid_spec=grid_spec,
        compiler_params=pltpu.CompilerParams(
            # The fused readout accumulates across row tiles -> the row axis must stay
            # sequential; the saved HBM round-trip of h outweighs megacore sharding here.
            dimension_semantics=("arbitrary", "arbitrary"),
            vmem_limit_bytes=_vmem_limit(
                [(s, d) for s, d, _ in in_blocks + out_blocks], scratch)),
    )(a, x, x, w_stack, b, mask, mask_t, cnt)
    return h, pooled


def conv_relu_score(a, x, w_stack, b, w_score_pad):
    n = a.shape[0]
    cin = x.shape[1]
    cout = w_stack.shape[1]
    sw = w_score_pad.shape[1]
    tm = _pick_tile(n, 256)
    tk = _pick_tile(n, 512)

    in_blocks = [
        ((tm, tk), a.dtype, lambda i, k: (i, k)),
        ((tk, cin), x.dtype, lambda i, k: (k, 0)),
        ((tm, cin), x.dtype, lambda i, k: (i, 0)),
        ((2 * cin, cout), w_stack.dtype, lambda i, k: (0, 0)),
        ((1, cout), b.dtype, lambda i, k: (0, 0)),
        ((cout, sw), w_score_pad.dtype, lambda i, k: (0, 0)),
    ]
    out_blocks = [
        ((tm, cout), jnp.float32, lambda i, k: (i, 0)),        # h3 kept f32 (trunc fidelity)
        ((tm, sw), jnp.float32, lambda i, k: (i, 0)),          # lane-dense padded score
    ]
    scratch = [((tm, cin), jnp.float32), ((tm, 2 * cin), jnp.float32)]
    grid_spec = pltpu.PrefetchScalarGridSpec(
        num_scalar_prefetch=0,
        grid=(n // tm, n // tk),
        in_specs=[pl.BlockSpec(s, f) for s, _, f in in_blocks],
        out_specs=[pl.BlockSpec(s, f) for s, _, f in out_blocks],
        scratch_shapes=[pltpu.VMEM(s, d) for s, d in scratch],
    )
    h, score = pl.pallas_call(
        conv_relu_score_kernel,
        out_shape=(jax.ShapeDtypeStruct((n, cout), jnp.float32),
                   jax.ShapeDtypeStruct((n, sw), jnp.float32)),
        grid_spec=grid_spec,
        compiler_params=pltpu.CompilerParams(
            # Row tiles are independent here -> parallel axis shards across the two
            # v7x TensorCores (no-op on single-TC v5e/v6e).
            dimension_semantics=("parallel", "arbitrary"),
            vmem_limit_bytes=_vmem_limit(
                [(s, d) for s, d, _ in in_blocks + out_blocks], scratch)),
    )(a, x, x, w_stack, b, w_score_pad)
    return h, score


def pooled_readout_head(h, score_col, mask, mask_t, cnt, x1, x2,
                        w1, b1, w2, b2, w3, b3):
    n, c = h.shape
    nb = mask.shape[0]
    c1 = w1.shape[1]
    c2 = w2.shape[1]
    tm = _pick_tile(n, 512)

    in_blocks = [
        ((tm, c), h.dtype, lambda i: (i, 0)),
        ((tm, 1), score_col.dtype, lambda i: (i, 0)),
        ((nb, tm), mask.dtype, lambda i: (0, i)),
        ((tm, nb), mask_t.dtype, lambda i: (i, 0)),
        ((nb, 1), cnt.dtype, lambda i: (0, 0)),
        ((nb, 2 * c), x1.dtype, lambda i: (0, 0)),
        ((nb, 2 * c), x2.dtype, lambda i: (0, 0)),
        ((2 * c, c1), w1.dtype, lambda i: (0, 0)),
        ((1, c1), b1.dtype, lambda i: (0, 0)),
        ((c1, c2), w2.dtype, lambda i: (0, 0)),
        ((1, c2), b2.dtype, lambda i: (0, 0)),
        ((c2, 1), w3.dtype, lambda i: (0, 0)),
        ((1, 1), b3.dtype, lambda i: (0, 0)),
    ]
    out_block = ((nb, 1), jnp.float32, lambda i: (0, 0))
    scratch = [((nb, c), jnp.float32), ((nb, c), jnp.float32), ((nb, 2 * c), jnp.float32)]
    grid_spec = pltpu.PrefetchScalarGridSpec(
        num_scalar_prefetch=0,
        grid=(n // tm,),
        in_specs=[pl.BlockSpec(s, f) for s, _, f in in_blocks],
        out_specs=pl.BlockSpec(out_block[0], out_block[2]),
        scratch_shapes=[pltpu.VMEM(s, d) for s, d in scratch],
    )
    return pl.pallas_call(
        pooled_readout_head_kernel,
        out_shape=jax.ShapeDtypeStruct((nb, 1), jnp.float32),
        grid_spec=grid_spec,
        compiler_params=pltpu.CompilerParams(
            dimension_semantics=("arbitrary",),
            vmem_limit_bytes=_vmem_limit(
                [(s, d) for s, d, _ in in_blocks] + [out_block[:2]], scratch)),
    )(h, score_col, mask, mask_t, cnt, x1, x2, w1, b1, w2, b2, w3, b3)


# ---------------------------------------------------------------------------
# Glue: top-k node selection and forward pass
# ---------------------------------------------------------------------------

def topk_keep_mask(score, batch, ratio):
    # Keep node i iff its rank (descending score, index tie-break) within its graph is
    # < ceil(ratio * graph_size).
    # TODO(synk): O(N^2) ranking; for large N use per-graph lax.top_k / segment sort.
    n = score.shape[0]
    idx = jnp.arange(n)
    same = batch[None, :] == batch[:, None]
    better = (score[None, :] > score[:, None]) | (
        (score[None, :] == score[:, None]) & (idx[None, :] < idx[:, None]))
    rank = jnp.sum(jnp.logical_and(same, better), axis=1)
    n_per = jnp.sum(same, axis=1)
    k = jnp.ceil(ratio * n_per.astype(jnp.float32))
    return rank.astype(jnp.float32) < k


@functools.partial(jax.jit, static_argnames=("num_graphs",))
def net_forward(params, x, edge_index, batch, num_graphs):
    n = x.shape[0]
    src = edge_index[0].astype(jnp.int32)
    dst = edge_index[1].astype(jnp.int32)
    # Dense adjacency A[dst, src] = edge multiplicity (torch_geometric src->dst flow).
    # Small integer counts are exact in bf16 -> 2-4x MXU rate, half the VMEM/HBM.
    # TODO(synk): for large sparse graphs replace the dense O(N^2) A with a CSR/edge-list
    # gather-aggregation via PrefetchScalarGridSpec instead of an NxN matmul.
    a = jnp.zeros((n, n), jnp.float32).at[dst, src].add(1.0).astype(jnp.bfloat16)

    onehot = (batch[None, :] == jnp.arange(num_graphs)[:, None]).astype(jnp.float32)  # [B, N]
    onehot_t = onehot.T                                                                # [N, B]
    cnt = jnp.maximum(jnp.sum(onehot, axis=1, keepdims=True), 1.0)                     # [B, 1]

    x_bf = x.astype(jnp.bfloat16)

    # conv1 + ReLU + readout1  (h emitted in bf16: it is only consumed by conv2's MXU)
    h1, x1 = conv_relu_readout(a, x_bf, params["w_conv1_t"], params["b_conv1"],
                               onehot, onehot_t, cnt)
    # conv2 + ReLU + readout2
    h2, x2 = conv_relu_readout(a, h1, params["w_conv2_t"], params["b_conv2"],
                               onehot, onehot_t, cnt)
    # conv3 + ReLU + TopKPooling(ratio=0.8) score
    h3, score_pad = conv_relu_score(a, h2, params["w_conv3_t"], params["b_conv3"],
                                    params["w_score_pad"])

    score = score_pad[:, 0]                                         # [N]
    keep = topk_keep_mask(score, batch, 0.8)                        # [N] bool
    mask_pooled = onehot * keep[None, :].astype(jnp.float32)        # [B, N]
    mask_pooled_t = mask_pooled.T
    cnt_p = jnp.maximum(jnp.sum(mask_pooled, axis=1, keepdims=True), 1.0)

    # readout3 + (x1 + x2 + x3) + MLP head + sigmoid, fused.
    out = pooled_readout_head(h3, score_pad[:, :1], mask_pooled, mask_pooled_t, cnt_p,
                              x1, x2,
                              params["w_lin1_t"], params["b_lin1"],
                              params["w_lin2_t"], params["b_lin2"],
                              params["w_lin3_t"], params["b_lin3"])
    return out[:, 0]                                                # .squeeze(1)


# ---------------------------------------------------------------------------
# Deterministic parameter init (synthetic; shapes from the PyTorch __init__)
# ---------------------------------------------------------------------------

def init_params(key):
    def uni(k, shape, fan_in):
        bound = 1.0 / math.sqrt(fan_in)
        return jax.random.uniform(k, shape, jnp.float32, -bound, bound)

    ks = iter(jax.random.split(key, 24))
    p = {}

    def conv_params(cin, cout):
        w_rel_t = uni(next(ks), (cin, cout), cin)    # lin_rel weight (transposed)
        b_rel = uni(next(ks), (1, cout), cin)        # lin_rel bias
        w_root_t = uni(next(ks), (cin, cout), cin)   # lin_root (bias=False)
        # Stacked [W_rel; W_root] matching concat([A@x, x], -1); bf16 feeds the MXU.
        return (jnp.concatenate([w_rel_t, w_root_t], axis=0).astype(jnp.bfloat16), b_rel)

    p["w_conv1_t"], p["b_conv1"] = conv_params(4, EMBED)
    p["w_conv2_t"], p["b_conv2"] = conv_params(EMBED, EMBED)
    p["w_conv3_t"], p["b_conv3"] = conv_params(EMBED, EMBED)

    # TopKPooling(256) scoring vector, pre-normalized and zero-padded to 128 lanes so
    # the in-kernel score is a single lane-dense MXU matmul (column 0 holds the score).
    w_pool = uni(next(ks), (1, EMBED), EMBED)
    w_norm = w_pool / jnp.sqrt(jnp.sum(w_pool * w_pool))
    p["w_score_pad"] = jnp.zeros((EMBED, 128), jnp.float32).at[:, 0].set(w_norm[0])

    # MLP head: Linear(512,256), Linear(256,128), Linear(128,1) (kept f32: B is tiny).
    p["w_lin1_t"] = uni(next(ks), (2 * EMBED, EMBED), 2 * EMBED)
    p["b_lin1"] = uni(next(ks), (1, EMBED), 2 * EMBED)
    p["w_lin2_t"] = uni(next(ks), (EMBED, EMBED // 2), EMBED)
    p["b_lin2"] = uni(next(ks), (1, EMBED // 2), EMBED)
    p["w_lin3_t"] = uni(next(ks), (EMBED // 2, 1), EMBED // 2)
    p["b_lin3"] = uni(next(ks), (1, 1), EMBED // 2)
    return p


if __name__ == "__main__":
    key = jax.random.PRNGKey(0)
    k_param, k_x, k_e0, k_e1 = jax.random.split(key, 4)
    params = init_params(k_param)

    N, B, E_PER = 16, 2, 16
    x = jax.random.normal(k_x, (N, 4), jnp.float32) * 2.0
    batch = jnp.repeat(jnp.arange(B, dtype=jnp.int32), N // B)       # [16]
    # random edges, kept within each graph (source -> target)
    src0 = jax.random.randint(k_e0, (E_PER,), 0, N // B)
    dst0 = jax.random.randint(k_e1, (E_PER,), 0, N // B)
    src = jnp.concatenate([src0, src0 + N // B])
    dst = jnp.concatenate([dst0, dst0 + N // B])
    edge_index = jnp.stack([src, dst], axis=0).astype(jnp.int32)     # [2, 32]

    out = net_forward(params, x, edge_index, batch, num_graphs=B)
    jax.block_until_ready(out)
    assert out.shape == (B,)
    assert bool(jnp.all(jnp.isfinite(out)))
    print("KERNEL_OK")
</pallas_src>

<mosaic_0001>
module attributes {stable_mosaic.version = 11 : i64} {
  func.func @conv_relu_readout_kernel(%arg0: i32, %arg1: i32, %arg2: memref<16x16xbf16, #tpu.memory_space<vmem>>, %arg3: memref<16x4xbf16, #tpu.memory_space<vmem>>, %arg4: memref<16x4xbf16, #tpu.memory_space<vmem>>, %arg5: memref<8x256xbf16, #tpu.memory_space<vmem>>, %arg6: memref<1x256xf32, #tpu.memory_space<vmem>>, %arg7: memref<2x16xf32, #tpu.memory_space<vmem>>, %arg8: memref<16x2xf32, #tpu.memory_space<vmem>>, %arg9: memref<2x1xf32, #tpu.memory_space<vmem>>, %arg10: memref<16x256xbf16, #tpu.memory_space<vmem>>, %arg11: memref<2x512xf32, #tpu.memory_space<vmem>>, %arg12: memref<16x4xf32, #tpu.memory_space<vmem>>, %arg13: memref<16x8xf32, #tpu.memory_space<vmem>>, %arg14: memref<2x256xf32, #tpu.memory_space<vmem>>, %arg15: memref<2x256xf32, #tpu.memory_space<vmem>>) attributes {dimension_semantics = [#tpu.dimension_semantics<arbitrary>, #tpu.dimension_semantics<arbitrary>], iteration_bounds = array<i64: 1, 1>, scalar_prefetch = 0 : i64, scratch_operands = 4 : i64, tpu.core_type = #tpu.core_type<tc>, window_params = [{transform_indices = @transform_0, window_bounds = array<i64: 16, 16>}, {transform_indices = @transform_1, window_bounds = array<i64: 16, 4>}, {transform_indices = @transform_2, window_bounds = array<i64: 16, 4>}, {pipeline_mode = #tpu.pipeline_mode<synchronous>, transform_indices = @transform_3, window_bounds = array<i64: 8, 256>}, {pipeline_mode = #tpu.pipeline_mode<synchronous>, transform_indices = @transform_4, window_bounds = array<i64: 1, 256>}, {transform_indices = @transform_5, window_bounds = array<i64: 2, 16>}, {transform_indices = @transform_6, window_bounds = array<i64: 16, 2>}, {pipeline_mode = #tpu.pipeline_mode<synchronous>, transform_indices = @transform_7, window_bounds = array<i64: 2, 1>}, {transform_indices = @transform_8, window_bounds = array<i64: 16, 256>}, {pipeline_mode = #tpu.pipeline_mode<synchronous>, transform_indices = @transform_9, window_bounds = array<i64: 2, 512>}]} {
    %c0_i32 = arith.constant 0 : i32
    %0 = arith.cmpi eq, %arg0, %c0_i32 : i32
    %c0_i32_0 = arith.constant 0 : i32
    %1 = arith.cmpi eq, %arg1, %c0_i32_0 : i32
    %2 = arith.andi %0, %1 : i1
    %3 = arith.extui %2 : i1 to i32
    %c0_i32_1 = arith.constant 0 : i32
    %4 = arith.cmpi ne, %3, %c0_i32_1 : i32
    scf.if %4 {
      %cst_16 = arith.constant 0.000000e+00 : f32
      %22 = vector.broadcast %cst_16 : f32 to vector<2x256xf32>
      %c0_17 = arith.constant 0 : index
      %c0_18 = arith.constant 0 : index
      %23 = vector.load %arg14[%c0_17, %c0_18] : memref<2x256xf32, #tpu.memory_space<vmem>>, vector<2x256xf32>
      tpu.vector_store %arg14[%c0_17, %c0_18], %22 {strides = array<i32>} : memref<2x256xf32, #tpu.memory_space<vmem>>, vector<2x256xf32>,
      %cst_19 = arith.constant -1.000000e+30 : f32
      %24 = vector.broadcast %cst_19 : f32 to vector<2x256xf32>
      %c0_20 = arith.constant 0 : index
      %c0_21 = arith.constant 0 : index
      %25 = vector.load %arg15[%c0_20, %c0_21] : memref<2x256xf32, #tpu.memory_space<vmem>>, vector<2x256xf32>
      tpu.vector_store %arg15[%c0_20, %c0_21], %24 {strides = array<i32>} : memref<2x256xf32, #tpu.memory_space<vmem>>, vector<2x256xf32>,
    } else {
    }
    %c0_i32_2 = arith.constant 0 : i32
    %5 = arith.cmpi eq, %arg1, %c0_i32_2 : i32
    %6 = arith.extui %5 : i1 to i32
    %c0_i32_3 = arith.constant 0 : i32
    %7 = arith.cmpi ne, %6, %c0_i32_3 : i32
    scf.if %7 {
      %cst_16 = arith.constant 0.000000e+00 : f32
      %22 = vector.broadcast %cst_16 : f32 to vector<16x4xf32>
      %c0_17 = arith.constant 0 : index
      %c0_18 = arith.constant 0 : index
      %23 = vector.load %arg12[%c0_17, %c0_18] : memref<16x4xf32, #tpu.memory_space<vmem>>, vector<16x4xf32>
      tpu.vector_store %arg12[%c0_17, %c0_18], %22 {strides = array<i32>} : memref<16x4xf32, #tpu.memory_space<vmem>>, vector<16x4xf32>,
    } else {
    }
    %c0 = arith.constant 0 : index
    %c0_4 = arith.constant 0 : index
    %8 = vector.load %arg12[%c0, %c0_4] : memref<16x4xf32, #tpu.memory_space<vmem>>, vector<16x4xf32>
    %c0_5 = arith.constant 0 : index
    %c0_6 = arith.constant 0 : index
    %9 = vector.load %arg2[%c0_5, %c0_6] : memref<16x16xbf16, #tpu.memory_space<vmem>>, vector<16x16xbf16>
    %c0_7 = arith.constant 0 : index
    %c0_8 = arith.constant 0 : index
    %10 = vector.load %arg3[%c0_7, %c0_8] : memref<16x4xbf16, #tpu.memory_space<vmem>>, vector<16x4xbf16>
    %cst = arith.constant dense<0.000000e+00> : vector<16x4xf32>
    %11 = tpu.matmul %9, %10, %cst {dimension_numbers = #tpu.dot_dimension_numbers<[1], [0], [0], [1], [0, 0, 1, 1], [], []>} : vector<16x16xbf16>, vector<16x4xbf16>, vector<16x4xf32> -> vector<16x4xf32>
    %12 = arith.addf %8, %11 : vector<16x4xf32>
    %c0_9 = arith.constant 0 : index
    %c0_10 = arith.constant 0 : index
    %13 = vector.load %arg12[%c0_9, %c0_10] : memref<16x4xf32, #tpu.memory_space<vmem>>, vector<16x4xf32>
    tpu.vector_store %arg12[%c0_9, %c0_10], %12 {strides = array<i32>} : memref<16x4xf32, #tpu.memory_space<vmem>>, vector<16x4xf32>,
    %c0_i32_11 = arith.constant 0 : i32
    %14 = arith.cmpi eq, %arg1, %c0_i32_11 : i32
    %15 = arith.extui %14 : i1 to i32
    %c0_i32_12 = arith.constant 0 : i32
    %16 = arith.cmpi ne, %15, %c0_i32_12 : i32
    scf.if %16 {
      %c0_16 = arith.constant 0 : index
      %c0_17 = arith.constant 0 : index
      %22 = vector.load %arg12[%c0_16, %c0_17] : memref<16x4xf32, #tpu.memory_space<vmem>>, vector<16x4xf32>
      %c0_18 = arith.constant 0 : index
      %c0_19 = arith.constant 0 : index
      %23 = vector.load %arg13[%c0_18, %c0_19] : memref<16x8xf32, #tpu.memory_space<vmem>>, vector<16x4xf32>
      tpu.vector_store %arg13[%c0_18, %c0_19], %22 {strides = array<i32>} : memref<16x8xf32, #tpu.memory_space<vmem>>, vector<16x4xf32>,
      %c0_20 = arith.constant 0 : index
      %c0_21 = arith.constant 0 : index
      %24 = vector.load %arg4[%c0_20, %c0_21] : memref<16x4xbf16, #tpu.memory_space<vmem>>, vector<16x4xbf16>
      %25 = arith.extf %24 : vector<16x4xbf16> to vector<16x4xf32>
      %c0_22 = arith.constant 0 : index
      %c4 = arith.constant 4 : index
      %26 = vector.load %arg13[%c0_22, %c4] : memref<16x8xf32, #tpu.memory_space<vmem>>, vector<16x4xf32>
      tpu.vector_store %arg13[%c0_22, %c4], %25 {strides = array<i32>} : memref<16x8xf32, #tpu.memory_space<vmem>>, vector<16x4xf32>,
      %c0_23 = arith.constant 0 : index
      %c0_24 = arith.constant 0 : index
      %27 = vector.load %arg13[%c0_23, %c0_24] : memref<16x8xf32, #tpu.memory_space<vmem>>, vector<16x8xf32>
      %28 = arith.truncf %27 : vector<16x8xf32> to vector<16x8xbf16>
      %c0_25 = arith.constant 0 : index
      %c0_26 = arith.constant 0 : index
      %29 = vector.load %arg5[%c0_25, %c0_26] : memref<8x256xbf16, #tpu.memory_space<vmem>>, vector<8x256xbf16>
      %cst_27 = arith.constant dense<0.000000e+00> : vector<16x256xf32>
      %30 = tpu.matmul %28, %29, %cst_27 {dimension_numbers = #tpu.dot_dimension_numbers<[1], [0], [0], [1], [0, 0, 1, 1], [], []>} : vector<16x8xbf16>, vector<8x256xbf16>, vector<16x256xf32> -> vector<16x256xf32>
      %c0_28 = arith.constant 0 : index
      %c0_29 = arith.constant 0 : index
      %31 = vector.load %arg6[%c0_28, %c0_29] : memref<1x256xf32, #tpu.memory_space<vmem>>, vector<1x256xf32>
      %32 = vector.broadcast %31 : vector<1x256xf32> to vector<16x256xf32>
      %33 = arith.addf %30, %32 : vector<16x256xf32>
      %cst_30 = arith.constant 0.000000e+00 : f32
      %34 = vector.broadcast %cst_30 : f32 to vector<16x256xf32>
      %35 = arith.maximumf %33, %34 : vector<16x256xf32>
      %36 = arith.truncf %35 : vector<16x256xf32> to vector<16x256xbf16>
      %c0_31 = arith.constant 0 : index
      %c0_32 = arith.constant 0 : index
      %37 = vector.load %arg10[%c0_31, %c0_32] : memref<16x256xbf16, #tpu.memory_space<vmem>>, vector<16x256xbf16>
      tpu.vector_store %arg10[%c0_31, %c0_32], %36 {strides = array<i32>} : memref<16x256xbf16, #tpu.memory_space<vmem>>, vector<16x256xbf16>,
      %cst_33 = arith.constant 0.000000e+00 : f32
      %38 = vector.broadcast %cst_33 : f32 to vector<16x256xf32>
      %39 = arith.cmpf olt, %35, %38 : vector<16x256xf32>
      %40 = math.ceil %35 : vector<16x256xf32>
      %41 = math.floor %35 : vector<16x256xf32>
      %42 = arith.select %39, %40, %41 : vector<16x256xi1>, vector<16x256xf32>
      %c0_34 = arith.constant 0 : index
      %c0_35 = arith.constant 0 : index
      %43 = vector.load %arg14[%c0_34, %c0_35] : memref<2x256xf32, #tpu.memory_space<vmem>>, vector<2x256xf32>
      %c0_36 = arith.constant 0 : index
      %c0_37 = arith.constant 0 : index
      %44 = vector.load %arg7[%c0_36, %c0_37] : memref<2x16xf32, #tpu.memory_space<vmem>>, vector<2x16xf32>
      %cst_38 = arith.constant dense<0.000000e+00> : vector<2x256xf32>
      %45 = tpu.matmul %44, %42, %cst_38 {dimension_numbers = #tpu.dot_dimension_numbers<[1], [0], [0], [1], [0, 0, 1, 1], [], []>} : vector<2x16xf32>, vector<16x256xf32>, vector<2x256xf32> -> vector<2x256xf32>
      %46 = arith.addf %43, %45 : vector<2x256xf32>
      %c0_39 = arith.constant 0 : index
      %c0_40 = arith.constant 0 : index
      %47 = vector.load %arg14[%c0_39, %c0_40] : memref<2x256xf32, #tpu.memory_space<vmem>>, vector<2x256xf32>
      tpu.vector_store %arg14[%c0_39, %c0_40], %46 {strides = array<i32>} : memref<2x256xf32, #tpu.memory_space<vmem>>, vector<2x256xf32>,
      %c0_41 = arith.constant 0 : index
      %c0_42 = arith.constant 0 : index
      %48 = vector.load %arg8[%c0_41, %c0_42] : memref<16x2xf32, #tpu.memory_space<vmem>>, vector<16x2xf32>
      %49 = vector.extract_strided_slice %48 {offsets = [0, 0], sizes = [16, 1], strides = [1, 1]} : vector<16x2xf32> to vector<16x1xf32>
      %cst_43 = arith.constant 0.000000e+00 : f32
      %50 = vector.broadcast %cst_43 : f32 to vector<16x1xf32>
      %51 = arith.cmpf ogt, %49, %50 : vector<16x1xf32>
      %cst_44 = arith.constant -1.000000e+30 : f32
      %52 = vector.shape_cast %51 : vector<16x1xi1> to vector<16x1xi1>
      %53 = vector.broadcast %52 : vector<16x1xi1> to vector<16x256xi1>
      %54 = vector.broadcast %cst_44 : f32 to vector<16x256xf32>
      %55 = arith.select %53, %42, %54 : vector<16x256xi1>, vector<16x256xf32>
      %cst_45 = arith.constant dense<0xFF800000> : vector<256xf32>
      %56 = vector.multi_reduction <maximumf>, %55, %cst_45 [0] : vector<16x256xf32> to vector<256xf32>
      %57 = vector.shape_cast %56 : vector<256xf32> to vector<1x256xf32>
      %c0_46 = arith.constant 0 : index
      %c0_47 = arith.constant 0 : index
      %58 = vector.load %arg15[%c0_46, %c0_47] : memref<2x256xf32, #tpu.memory_space<vmem>>, vector<1x256xf32>
      %59 = arith.maximumf %58, %57 : vector<1x256xf32>
      %c0_48 = arith.constant 0 : index
      %c0_49 = arith.constant 0 : index
      %60 = vector.load %arg15[%c0_48, %c0_49] : memref<2x256xf32, #tpu.memory_space<vmem>>, vector<1x256xf32>
      tpu.vector_store %arg15[%c0_48, %c0_49], %59 {strides = array<i32>} : memref<2x256xf32, #tpu.memory_space<vmem>>, vector<1x256xf32>,
      %61 = vector.extract_strided_slice %48 {offsets = [0, 1], sizes = [16, 1], strides = [1, 1]} : vector<16x2xf32> to vector<16x1xf32>
      %cst_50 = arith.constant 0.000000e+00 : f32
      %62 = vector.broadcast %cst_50 : f32 to vector<16x1xf32>
      %63 = arith.cmpf ogt, %61, %62 : vector<16x1xf32>
      %cst_51 = arith.constant -1.000000e+30 : f32
      %64 = vector.shape_cast %63 : vector<16x1xi1> to vector<16x1xi1>
      %65 = vector.broadcast %64 : vector<16x1xi1> to vector<16x256xi1>
      %66 = vector.broadcast %cst_51 : f32 to vector<16x256xf32>
      %67 = arith.select %65, %42, %66 : vector<16x256xi1>, vector<16x256xf32>
      %cst_52 = arith.constant dense<0xFF800000> : vector<256xf32>
      %68 = vector.multi_reduction <maximumf>, %67, %cst_52 [0] : vector<16x256xf32> to vector<256xf32>
      %69 = vector.shape_cast %68 : vector<256xf32> to vector<1x256xf32>
      %c1 = arith.constant 1 : index
      %c0_53 = arith.constant 0 : index
      %70 = vector.load %arg15[%c1, %c0_53] : memref<2x256xf32, #tpu.memory_space<vmem>>, vector<1x256xf32>
      %71 = arith.maximumf %70, %69 : vector<1x256xf32>
      %c1_54 = arith.constant 1 : index
      %c0_55 = arith.constant 0 : index
      %72 = vector.load %arg15[%c1_54, %c0_55] : memref<2x256xf32, #tpu.memory_space<vmem>>, vector<1x256xf32>
      tpu.vector_store %arg15[%c1_54, %c0_55], %71 {strides = array<i32>} : memref<2x256xf32, #tpu.memory_space<vmem>>, vector<1x256xf32>,
    } else {
    }
    %c0_i32_13 = arith.constant 0 : i32
    %17 = arith.cmpi eq, %arg0, %c0_i32_13 : i32
    %c0_i32_14 = arith.constant 0 : i32
    %18 = arith.cmpi eq, %arg1, %c0_i32_14 : i32
    %19 = arith.andi %17, %18 : i1
    %20 = arith.extui %19 : i1 to i32
    %c0_i32_15 = arith.constant 0 : i32
    %21 = arith.cmpi ne, %20, %c0_i32_15 : i32
    scf.if %21 {
      %c0_16 = arith.constant 0 : index
      %c0_17 = arith.constant 0 : index
      %22 = vector.load %arg15[%c0_16, %c0_17] : memref<2x256xf32, #tpu.memory_space<vmem>>, vector<2x256xf32>
      %c0_18 = arith.constant 0 : index
      %c0_19 = arith.constant 0 : index
      %23 = vector.load %arg11[%c0_18, %c0_19] : memref<2x512xf32, #tpu.memory_space<vmem>>, vector<2x256xf32>
      tpu.vector_store %arg11[%c0_18, %c0_19], %22 {strides = array<i32>} : memref<2x512xf32, #tpu.memory_space<vmem>>, vector<2x256xf32>,
      %c0_20 = arith.constant 0 : index
      %c0_21 = arith.constant 0 : index
      %24 = vector.load %arg14[%c0_20, %c0_21] : memref<2x256xf32, #tpu.memory_space<vmem>>, vector<2x256xf32>
      %c0_22 = arith.constant 0 : index
      %c0_23 = arith.constant 0 : index
      %25 = vector.load %arg9[%c0_22, %c0_23] : memref<2x1xf32, #tpu.memory_space<vmem>>, vector<2x1xf32>
      %26 = vector.broadcast %25 : vector<2x1xf32> to vector<2x256xf32>
      %27 = arith.divf %24, %26 : vector<2x256xf32>
      %cst_24 = arith.constant 0.000000e+00 : f32
      %28 = vector.broadcast %cst_24 : f32 to vector<2x256xf32>
      %29 = arith.cmpf olt, %27, %28 : vector<2x256xf32>
      %30 = math.ceil %27 : vector<2x256xf32>
      %31 = math.floor %27 : vector<2x256xf32>
      %32 = arith.select %29, %30, %31 : vector<2x256xi1>, vector<2x256xf32>
      %c0_25 = arith.constant 0 : index
      %c256 = arith.constant 256 : index
      %33 = vector.load %arg11[%c0_25, %c256] : memref<2x512xf32, #tpu.memory_space<vmem>>, vector<2x256xf32>
      tpu.vector_store %arg11[%c0_25, %c256], %32 {strides = array<i32>} : memref<2x512xf32, #tpu.memory_space<vmem>>, vector<2x256xf32>,
    } else {
    }
    return
  }
  func.func @transform_0(%arg0: i32, %arg1: i32) -> (i32, i32) {
    %c0_i32 = arith.constant 0 : i32
    return %arg0, %arg1 : i32, i32
  }
  func.func @transform_1(%arg0: i32, %arg1: i32) -> (i32, i32) {
    %c0_i32 = arith.constant 0 : i32
    %c0_i32_0 = arith.constant 0 : i32
    return %arg1, %c0_i32 : i32, i32
  }
  func.func @transform_2(%arg0: i32, %arg1: i32) -> (i32, i32) {
    %c0_i32 = arith.constant 0 : i32
    %c0_i32_0 = arith.constant 0 : i32
    return %arg0, %c0_i32 : i32, i32
  }
  func.func @transform_3(%arg0: i32, %arg1: i32) -> (i32, i32) {
    %c0_i32 = arith.constant 0 : i32
    %c0_i32_0 = arith.constant 0 : i32
    %c0_i32_1 = arith.constant 0 : i32
    return %c0_i32, %c0_i32_0 : i32, i32
  }
  func.func @transform_4(%arg0: i32, %arg1: i32) -> (i32, i32) {
    %c0_i32 = arith.constant 0 : i32
    %c0_i32_0 = arith.constant 0 : i32
    %c0_i32_1 = arith.constant 0 : i32
    return %c0_i32, %c0_i32_0 : i32, i32
  }
  func.func @transform_5(%arg0: i32, %arg1: i32) -> (i32, i32) {
    %c0_i32 = arith.constant 0 : i32
    %c0_i32_0 = arith.constant 0 : i32
    return %c0_i32, %arg0 : i32, i32
  }
  func.func @transform_6(%arg0: i32, %arg1: i32) -> (i32, i32) {
    %c0_i32 = arith.constant 0 : i32
    %c0_i32_0 = arith.constant 0 : i32
    return %arg0, %c0_i32 : i32, i32
  }
  func.func @transform_7(%arg0: i32, %arg1: i32) -> (i32, i32) {
    %c0_i32 = arith.constant 0 : i32
    %c0_i32_0 = arith.constant 0 : i32
    %c0_i32_1 = arith.constant 0 : i32
    return %c0_i32, %c0_i32_0 : i32, i32
  }
  func.func @transform_8(%arg0: i32, %arg1: i32) -> (i32, i32) {
    %c0_i32 = arith.constant 0 : i32
    %c0_i32_0 = arith.constant 0 : i32
    return %arg0, %c0_i32 : i32, i32
  }
  func.func @transform_9(%arg0: i32, %arg1: i32) -> (i32, i32) {
    %c0_i32 = arith.constant 0 : i32
    %c0_i32_0 = arith.constant 0 : i32
    %c0_i32_1 = arith.constant 0 : i32
    return %c0_i32, %c0_i32_0 : i32, i32
  }
}

module attributes {stable_mosaic.version = 11 : i64} {
  func.func @conv_relu_readout_kernel(%arg0: i32, %arg1: i32, %arg2: memref<16x16xbf16, #tpu.memory_space<vmem>>, %arg3: memref<16x256xbf16, #tpu.memory_space<vmem>>, %arg4: memref<16x256xbf16, #tpu.memory_space<vmem>>, %arg5: memref<512x256xbf16, #tpu.memory_space<vmem>>, %arg6: memref<1x256xf32, #tpu.memory_space<vmem>>, %arg7: memref<2x16xf32, #tpu.memory_space<vmem>>, %arg8: memref<16x2xf32, #tpu.memory_space<vmem>>, %arg9: memref<2x1xf32, #tpu.memory_space<vmem>>, %arg10: memref<16x256xbf16, #tpu.memory_space<vmem>>, %arg11: memref<2x512xf32, #tpu.memory_space<vmem>>, %arg12: memref<16x256xf32, #tpu.memory_space<vmem>>, %arg13: memref<16x512xf32, #tpu.memory_space<vmem>>, %arg14: memref<2x256xf32, #tpu.memory_space<vmem>>, %arg15: memref<2x256xf32, #tpu.memory_space<vmem>>) attributes {dimension_semantics = [#tpu.dimension_semantics<arbitrary>, #tpu.dimension_semantics<arbitrary>], iteration_bounds = array<i64: 1, 1>, scalar_prefetch = 0 : i64, scratch_operands = 4 : i64, tpu.core_type = #tpu.core_type<tc>, window_params = [{transform_indices = @transform_0, window_bounds = array<i64: 16, 16>}, {transform_indices = @transform_1, window_bounds = array<i64: 16, 256>}, {transform_indices = @transform_2, window_bounds = array<i64: 16, 256>}, {pipeline_mode = #tpu.pipeline_mode<synchronous>, transform_indices = @transform_3, window_bounds = array<i64: 512, 256>}, {pipeline_mode = #tpu.pipeline_mode<synchronous>, transform_indices = @transform_4, window_bounds = array<i64: 1, 256>}, {transform_indices = @transform_5, window_bounds = array<i64: 2, 16>}, {transform_indices = @transform_6, window_bounds = array<i64: 16, 2>}, {pipeline_mode = #tpu.pipeline_mode<synchronous>, transform_indices = @transform_7, window_bounds = array<i64: 2, 1>}, {transform_indices = @transform_8, window_bounds = array<i64: 16, 256>}, {pipeline_mode = #tpu.pipeline_mode<synchronous>, transform_indices = @transform_9, window_bounds = array<i64: 2, 512>}]} {
    %c0_i32 = arith.constant 0 : i32
    %0 = arith.cmpi eq, %arg0, %c0_i32 : i32
    %c0_i32_0 = arith.constant 0 : i32
    %1 = arith.cmpi eq, %arg1, %c0_i32_0 : i32
    %2 = arith.andi %0, %1 : i1
    %3 = arith.extui %2 : i1 to i32
    %c0_i32_1 = arith.constant 0 : i32
    %4 = arith.cmpi ne, %3, %c0_i32_1 : i32
    scf.if %4 {
      %cst_16 = arith.constant 0.000000e+00 : f32
      %22 = vector.broadcast %cst_16 : f32 to vector<2x256xf32>
      %c0_17 = arith.constant 0 : index
      %c0_18 = arith.constant 0 : index
      %23 = vector.load %arg14[%c0_17, %c0_18] : memref<2x256xf32, #tpu.memory_space<vmem>>, vector<2x256xf32>
      tpu.vector_store %arg14[%c0_17, %c0_18], %22 {strides = array<i32>} : memref<2x256xf32, #tpu.memory_space<vmem>>, vector<2x256xf32>,
      %cst_19 = arith.constant -1.000000e+30 : f32
      %24 = vector.broadcast %cst_19 : f32 to vector<2x256xf32>
      %c0_20 = arith.constant 0 : index
      %c0_21 = arith.constant 0 : index
      %25 = vector.load %arg15[%c0_20, %c0_21] : memref<2x256xf32, #tpu.memory_space<vmem>>, vector<2x256xf32>
      tpu.vector_store %arg15[%c0_20, %c0_21], %24 {strides = array<i32>} : memref<2x256xf32, #tpu.memory_space<vmem>>, vector<2x256xf32>,
    } else {
    }
    %c0_i32_2 = arith.constant 0 : i32
    %5 = arith.cmpi eq, %arg1, %c0_i32_2 : i32
    %6 = arith.extui %5 : i1 to i32
    %c0_i32_3 = arith.constant 0 : i32
    %7 = arith.cmpi ne, %6, %c0_i32_3 : i32
    scf.if %7 {
      %cst_16 = arith.constant 0.000000e+00 : f32
      %22 = vector.broadcast %cst_16 : f32 to vector<16x256xf32>
      %c0_17 = arith.constant 0 : index
      %c0_18 = arith.constant 0 : index
      %23 = vector.load %arg12[%c0_17, %c0_18] : memref<16x256xf32, #tpu.memory_space<vmem>>, vector<16x256xf32>
      tpu.vector_store %arg12[%c0_17, %c0_18], %22 {strides = array<i32>} : memref<16x256xf32, #tpu.memory_space<vmem>>, vector<16x256xf32>,
    } else {
    }
    %c0 = arith.constant 0 : index
    %c0_4 = arith.constant 0 : index
    %8 = vector.load %arg12[%c0, %c0_4] : memref<16x256xf32, #tpu.memory_space<vmem>>, vector<16x256xf32>
    %c0_5 = arith.constant 0 : index
    %c0_6 = arith.constant 0 : index
    %9 = vector.load %arg2[%c0_5, %c0_6] : memref<16x16xbf16, #tpu.memory_space<vmem>>, vector<16x16xbf16>
    %c0_7 = arith.constant 0 : index
    %c0_8 = arith.constant 0 : index
    %10 = vector.load %arg3[%c0_7, %c0_8] : memref<16x256xbf16, #tpu.memory_space<vmem>>, vector<16x256xbf16>
    %cst = arith.constant dense<0.000000e+00> : vector<16x256xf32>
    %11 = tpu.matmul %9, %10, %cst {dimension_numbers = #tpu.dot_dimension_numbers<[1], [0], [0], [1], [0, 0, 1, 1], [], []>} : vector<16x16xbf16>, vector<16x256xbf16>, vector<16x256xf32> -> vector<16x256xf32>
    %12 = arith.addf %8, %11 : vector<16x256xf32>
    %c0_9 = arith.constant 0 : index
    %c0_10 = arith.constant 0 : index
    %13 = vector.load %arg12[%c0_9, %c0_10] : memref<16x256xf32, #tpu.memory_space<vmem>>, vector<16x256xf32>
    tpu.vector_store %arg12[%c0_9, %c0_10], %12 {strides = array<i32>} : memref<16x256xf32, #tpu.memory_space<vmem>>, vector<16x256xf32>,
    %c0_i32_11 = arith.constant 0 : i32
    %14 = arith.cmpi eq, %arg1, %c0_i32_11 : i32
    %15 = arith.extui %14 : i1 to i32
    %c0_i32_12 = arith.constant 0 : i32
    %16 = arith.cmpi ne, %15, %c0_i32_12 : i32
    scf.if %16 {
      %c0_16 = arith.constant 0 : index
      %c0_17 = arith.constant 0 : index
      %22 = vector.load %arg12[%c0_16, %c0_17] : memref<16x256xf32, #tpu.memory_space<vmem>>, vector<16x256xf32>
      %c0_18 = arith.constant 0 : index
      %c0_19 = arith.constant 0 : index
      %23 = vector.load %arg13[%c0_18, %c0_19] : memref<16x512xf32, #tpu.memory_space<vmem>>, vector<16x256xf32>
      tpu.vector_store %arg13[%c0_18, %c0_19], %22 {strides = array<i32>} : memref<16x512xf32, #tpu.memory_space<vmem>>, vector<16x256xf32>,
      %c0_20 = arith.constant 0 : index
      %c0_21 = arith.constant 0 : index
      %24 = vector.load %arg4[%c0_20, %c0_21] : memref<16x256xbf16, #tpu.memory_space<vmem>>, vector<16x256xbf16>
      %25 = arith.extf %24 : vector<16x256xbf16> to vector<16x256xf32>
      %c0_22 = arith.constant 0 : index
      %c256 = arith.constant 256 : index
      %26 = vector.load %arg13[%c0_22, %c256] : memref<16x512xf32, #tpu.memory_space<vmem>>, vector<16x256xf32>
      tpu.vector_store %arg13[%c0_22, %c256], %25 {strides = array<i32>} : memref<16x512xf32, #tpu.memory_space<vmem>>, vector<16x256xf32>,
      %c0_23 = arith.constant 0 : index
      %c0_24 = arith.constant 0 : index
      %27 = vector.load %arg13[%c0_23, %c0_24] : memref<16x512xf32, #tpu.memory_space<vmem>>, vector<16x512xf32>
      %28 = arith.truncf %27 : vector<16x512xf32> to vector<16x512xbf16>
      %c0_25 = arith.constant 0 : index
      %c0_26 = arith.constant 0 : index
      %29 = vector.load %arg5[%c0_25, %c0_26] : memref<512x256xbf16, #tpu.memory_space<vmem>>, vector<512x256xbf16>
      %cst_27 = arith.constant dense<0.000000e+00> : vector<16x256xf32>
      %30 = tpu.matmul %28, %29, %cst_27 {dimension_numbers = #tpu.dot_dimension_numbers<[1], [0], [0], [1], [0, 0, 1, 1], [], []>} : vector<16x512xbf16>, vector<512x256xbf16>, vector<16x256xf32> -> vector<16x256xf32>
      %c0_28 = arith.constant 0 : index
      %c0_29 = arith.constant 0 : index
      %31 = vector.load %arg6[%c0_28, %c0_29] : memref<1x256xf32, #tpu.memory_space<vmem>>, vector<1x256xf32>
      %32 = vector.broadcast %31 : vector<1x256xf32> to vector<16x256xf32>
      %33 = arith.addf %30, %32 : vector<16x256xf32>
      %cst_30 = arith.constant 0.000000e+00 : f32
      %34 = vector.broadcast %cst_30 : f32 to vector<16x256xf32>
      %35 = arith.maximumf %33, %34 : vector<16x256xf32>
      %36 = arith.truncf %35 : vector<16x256xf32> to vector<16x256xbf16>
      %c0_31 = arith.constant 0 : index
      %c0_32 = arith.constant 0 : index
      %37 = vector.load %arg10[%c0_31, %c0_32] : memref<16x256xbf16, #tpu.memory_space<vmem>>, vector<16x256xbf16>
      tpu.vector_store %arg10[%c0_31, %c0_32], %36 {strides = array<i32>} : memref<16x256xbf16, #tpu.memory_space<vmem>>, vector<16x256xbf16>,
      %cst_33 = arith.constant 0.000000e+00 : f32
      %38 = vector.broadcast %cst_33 : f32 to vector<16x256xf32>
      %39 = arith.cmpf olt, %35, %38 : vector<16x256xf32>
      %40 = math.ceil %35 : vector<16x256xf32>
      %41 = math.floor %35 : vector<16x256xf32>
      %42 = arith.select %39, %40, %41 : vector<16x256xi1>, vector<16x256xf32>
      %c0_34 = arith.constant 0 : index
      %c0_35 = arith.constant 0 : index
      %43 = vector.load %arg14[%c0_34, %c0_35] : memref<2x256xf32, #tpu.memory_space<vmem>>, vector<2x256xf32>
      %c0_36 = arith.constant 0 : index
      %c0_37 = arith.constant 0 : index
      %44 = vector.load %arg7[%c0_36, %c0_37] : memref<2x16xf32, #tpu.memory_space<vmem>>, vector<2x16xf32>
      %cst_38 = arith.constant dense<0.000000e+00> : vector<2x256xf32>
      %45 = tpu.matmul %44, %42, %cst_38 {dimension_numbers = #tpu.dot_dimension_numbers<[1], [0], [0], [1], [0, 0, 1, 1], [], []>} : vector<2x16xf32>, vector<16x256xf32>, vector<2x256xf32> -> vector<2x256xf32>
      %46 = arith.addf %43, %45 : vector<2x256xf32>
      %c0_39 = arith.constant 0 : index
      %c0_40 = arith.constant 0 : index
      %47 = vector.load %arg14[%c0_39, %c0_40] : memref<2x256xf32, #tpu.memory_space<vmem>>, vector<2x256xf32>
      tpu.vector_store %arg14[%c0_39, %c0_40], %46 {strides = array<i32>} : memref<2x256xf32, #tpu.memory_space<vmem>>, vector<2x256xf32>,
      %c0_41 = arith.constant 0 : index
      %c0_42 = arith.constant 0 : index
      %48 = vector.load %arg8[%c0_41, %c0_42] : memref<16x2xf32, #tpu.memory_space<vmem>>, vector<16x2xf32>
      %49 = vector.extract_strided_slice %48 {offsets = [0, 0], sizes = [16, 1], strides = [1, 1]} : vector<16x2xf32> to vector<16x1xf32>
      %cst_43 = arith.constant 0.000000e+00 : f32
      %50 = vector.broadcast %cst_43 : f32 to vector<16x1xf32>
      %51 = arith.cmpf ogt, %49, %50 : vector<16x1xf32>
      %cst_44 = arith.constant -1.000000e+30 : f32
      %52 = vector.shape_cast %51 : vector<16x1xi1> to vector<16x1xi1>
      %53 = vector.broadcast %52 : vector<16x1xi1> to vector<16x256xi1>
      %54 = vector.broadcast %cst_44 : f32 to vector<16x256xf32>
      %55 = arith.select %53, %42, %54 : vector<16x256xi1>, vector<16x256xf32>
      %cst_45 = arith.constant dense<0xFF800000> : vector<256xf32>
      %56 = vector.multi_reduction <maximumf>, %55, %cst_45 [0] : vector<16x256xf32> to vector<256xf32>
      %57 = vector.shape_cast %56 : vector<256xf32> to vector<1x256xf32>
      %c0_46 = arith.constant 0 : index
      %c0_47 = arith.constant 0 : index
      %58 = vector.load %arg15[%c0_46, %c0_47] : memref<2x256xf32, #tpu.memory_space<vmem>>, vector<1x256xf32>
      %59 = arith.maximumf %58, %57 : vector<1x256xf32>
      %c0_48 = arith.constant 0 : index
      %c0_49 = arith.constant 0 : index
      %60 = vector.load %arg15[%c0_48, %c0_49] : memref<2x256xf32, #tpu.memory_space<vmem>>, vector<1x256xf32>
      tpu.vector_store %arg15[%c0_48, %c0_49], %59 {strides = array<i32>} : memref<2x256xf32, #tpu.memory_space<vmem>>, vector<1x256xf32>,
      %61 = vector.extract_strided_slice %48 {offsets = [0, 1], sizes = [16, 1], strides = [1, 1]} : vector<16x2xf32> to vector<16x1xf32>
      %cst_50 = arith.constant 0.000000e+00 : f32
      %62 = vector.broadcast %cst_50 : f32 to vector<16x1xf32>
      %63 = arith.cmpf ogt, %61, %62 : vector<16x1xf32>
      %cst_51 = arith.constant -1.000000e+30 : f32
      %64 = vector.shape_cast %63 : vector<16x1xi1> to vector<16x1xi1>
      %65 = vector.broadcast %64 : vector<16x1xi1> to vector<16x256xi1>
      %66 = vector.broadcast %cst_51 : f32 to vector<16x256xf32>
      %67 = arith.select %65, %42, %66 : vector<16x256xi1>, vector<16x256xf32>
      %cst_52 = arith.constant dense<0xFF800000> : vector<256xf32>
      %68 = vector.multi_reduction <maximumf>, %67, %cst_52 [0] : vector<16x256xf32> to vector<256xf32>
      %69 = vector.shape_cast %68 : vector<256xf32> to vector<1x256xf32>
      %c1 = arith.constant 1 : index
      %c0_53 = arith.constant 0 : index
      %70 = vector.load %arg15[%c1, %c0_53] : memref<2x256xf32, #tpu.memory_space<vmem>>, vector<1x256xf32>
      %71 = arith.maximumf %70, %69 : vector<1x256xf32>
      %c1_54 = arith.constant 1 : index
      %c0_55 = arith.constant 0 : index
      %72 = vector.load %arg15[%c1_54, %c0_55] : memref<2x256xf32, #tpu.memory_space<vmem>>, vector<1x256xf32>
      tpu.vector_store %arg15[%c1_54, %c0_55], %71 {strides = array<i32>} : memref<2x256xf32, #tpu.memory_space<vmem>>, vector<1x256xf32>,
    } else {
    }
    %c0_i32_13 = arith.constant 0 : i32
    %17 = arith.cmpi eq, %arg0, %c0_i32_13 : i32
    %c0_i32_14 = arith.constant 0 : i32
    %18 = arith.cmpi eq, %arg1, %c0_i32_14 : i32
    %19 = arith.andi %17, %18 : i1
    %20 = arith.extui %19 : i1 to i32
    %c0_i32_15 = arith.constant 0 : i32
    %21 = arith.cmpi ne, %20, %c0_i32_15 : i32
    scf.if %21 {
      %c0_16 = arith.constant 0 : index
      %c0_17 = arith.constant 0 : index
      %22 = vector.load %arg15[%c0_16, %c0_17] : memref<2x256xf32, #tpu.memory_space<vmem>>, vector<2x256xf32>
      %c0_18 = arith.constant 0 : index
      %c0_19 = arith.constant 0 : index
      %23 = vector.load %arg11[%c0_18, %c0_19] : memref<2x512xf32, #tpu.memory_space<vmem>>, vector<2x256xf32>
      tpu.vector_store %arg11[%c0_18, %c0_19], %22 {strides = array<i32>} : memref<2x512xf32, #tpu.memory_space<vmem>>, vector<2x256xf32>,
      %c0_20 = arith.constant 0 : index
      %c0_21 = arith.constant 0 : index
      %24 = vector.load %arg14[%c0_20, %c0_21] : memref<2x256xf32, #tpu.memory_space<vmem>>, vector<2x256xf32>
      %c0_22 = arith.constant 0 : index
      %c0_23 = arith.constant 0 : index
      %25 = vector.load %arg9[%c0_22, %c0_23] : memref<2x1xf32, #tpu.memory_space<vmem>>, vector<2x1xf32>
      %26 = vector.broadcast %25 : vector<2x1xf32> to vector<2x256xf32>
      %27 = arith.divf %24, %26 : vector<2x256xf32>
      %cst_24 = arith.constant 0.000000e+00 : f32
      %28 = vector.broadcast %cst_24 : f32 to vector<2x256xf32>
      %29 = arith.cmpf olt, %27, %28 : vector<2x256xf32>
      %30 = math.ceil %27 : vector<2x256xf32>
      %31 = math.floor %27 : vector<2x256xf32>
      %32 = arith.select %29, %30, %31 : vector<2x256xi1>, vector<2x256xf32>
      %c0_25 = arith.constant 0 : index
      %c256 = arith.constant 256 : index
      %33 = vector.load %arg11[%c0_25, %c256] : memref<2x512xf32, #tpu.memory_space<vmem>>, vector<2x256xf32>
      tpu.vector_store %arg11[%c0_25, %c256], %32 {strides = array<i32>} : memref<2x512xf32, #tpu.memory_space<vmem>>, vector<2x256xf32>,
    } else {
    }
    return
  }
  func.func @transform_0(%arg0: i32, %arg1: i32) -> (i32, i32) {
    %c0_i32 = arith.constant 0 : i32
    return %arg0, %arg1 : i32, i32
  }
  func.func @transform_1(%arg0: i32, %arg1: i32) -> (i32, i32) {
    %c0_i32 = arith.constant 0 : i32
    %c0_i32_0 = arith.constant 0 : i32
    return %arg1, %c0_i32 : i32, i32
  }
  func.func @transform_2(%arg0: i32, %arg1: i32) -> (i32, i32) {
    %c0_i32 = arith.constant 0 : i32
    %c0_i32_0 = arith.constant 0 : i32
    return %arg0, %c0_i32 : i32, i32
  }
  func.func @transform_3(%arg0: i32, %arg1: i32) -> (i32, i32) {
    %c0_i32 = arith.constant 0 : i32
    %c0_i32_0 = arith.constant 0 : i32
    %c0_i32_1 = arith.constant 0 : i32
    return %c0_i32, %c0_i32_0 : i32, i32
  }
  func.func @transform_4(%arg0: i32, %arg1: i32) -> (i32, i32) {
    %c0_i32 = arith.constant 0 : i32
    %c0_i32_0 = arith.constant 0 : i32
    %c0_i32_1 = arith.constant 0 : i32
    return %c0_i32, %c0_i32_0 : i32, i32
  }
  func.func @transform_5(%arg0: i32, %arg1: i32) -> (i32, i32) {
    %c0_i32 = arith.constant 0 : i32
    %c0_i32_0 = arith.constant 0 : i32
    return %c0_i32, %arg0 : i32, i32
  }
  func.func @transform_6(%arg0: i32, %arg1: i32) -> (i32, i32) {
    %c0_i32 = arith.constant 0 : i32
    %c0_i32_0 = arith.constant 0 : i32
    return %arg0, %c0_i32 : i32, i32
  }
  func.func @transform_7(%arg0: i32, %arg1: i32) -> (i32, i32) {
    %c0_i32 = arith.constant 0 : i32
    %c0_i32_0 = arith.constant 0 : i32
    %c0_i32_1 = arith.constant 0 : i32
    return %c0_i32, %c0_i32_0 : i32, i32
  }
  func.func @transform_8(%arg0: i32, %arg1: i32) -> (i32, i32) {
    %c0_i32 = arith.constant 0 : i32
    %c0_i32_0 = arith.constant 0 : i32
    return %arg0, %c0_i32 : i32, i32
  }
  func.func @transform_9(%arg0: i32, %arg1: i32) -> (i32, i32) {
    %c0_i32 = arith.constant 0 : i32
    %c0_i32_0 = arith.constant 0 : i32
    %c0_i32_1 = arith.constant 0 : i32
    return %c0_i32, %c0_i32_0 : i32, i32
  }
}

module attributes {stable_mosaic.version = 11 : i64} {
  func.func @conv_relu_score_kernel(%arg0: i32, %arg1: i32, %arg2: memref<16x16xbf16, #tpu.memory_space<vmem>>, %arg3: memref<16x256xbf16, #tpu.memory_space<vmem>>, %arg4: memref<16x256xbf16, #tpu.memory_space<vmem>>, %arg5: memref<512x256xbf16, #tpu.memory_space<vmem>>, %arg6: memref<1x256xf32, #tpu.memory_space<vmem>>, %arg7: memref<256x128xf32, #tpu.memory_space<vmem>>, %arg8: memref<16x256xf32, #tpu.memory_space<vmem>>, %arg9: memref<16x128xf32, #tpu.memory_space<vmem>>, %arg10: memref<16x256xf32, #tpu.memory_space<vmem>>, %arg11: memref<16x512xf32, #tpu.memory_space<vmem>>) attributes {dimension_semantics = [#tpu.dimension_semantics<parallel>, #tpu.dimension_semantics<arbitrary>], iteration_bounds = array<i64: 1, 1>, scalar_prefetch = 0 : i64, scratch_operands = 2 : i64, tpu.core_type = #tpu.core_type<tc>, window_params = [{transform_indices = @transform_0, window_bounds = array<i64: 16, 16>}, {transform_indices = @transform_1, window_bounds = array<i64: 16, 256>}, {transform_indices = @transform_2, window_bounds = array<i64: 16, 256>}, {pipeline_mode = #tpu.pipeline_mode<synchronous>, transform_indices = @transform_3, window_bounds = array<i64: 512, 256>}, {pipeline_mode = #tpu.pipeline_mode<synchronous>, transform_indices = @transform_4, window_bounds = array<i64: 1, 256>}, {pipeline_mode = #tpu.pipeline_mode<synchronous>, transform_indices = @transform_5, window_bounds = array<i64: 256, 128>}, {transform_indices = @transform_6, window_bounds = array<i64: 16, 256>}, {transform_indices = @transform_7, window_bounds = array<i64: 16, 128>}]} {
    %c0_i32 = arith.constant 0 : i32
    %0 = arith.cmpi eq, %arg1, %c0_i32 : i32
    %1 = arith.extui %0 : i1 to i32
    %c0_i32_0 = arith.constant 0 : i32
    %2 = arith.cmpi ne, %1, %c0_i32_0 : i32
    scf.if %2 {
      %cst_10 = arith.constant 0.000000e+00 : f32
      %12 = vector.broadcast %cst_10 : f32 to vector<16x256xf32>
      %c0_11 = arith.constant 0 : index
      %c0_12 = arith.constant 0 : index
      %13 = vector.load %arg10[%c0_11, %c0_12] : memref<16x256xf32, #tpu.memory_space<vmem>>, vector<16x256xf32>
      tpu.vector_store %arg10[%c0_11, %c0_12], %12 {strides = array<i32>} : memref<16x256xf32, #tpu.memory_space<vmem>>, vector<16x256xf32>,
    } else {
    }
    %c0 = arith.constant 0 : index
    %c0_1 = arith.constant 0 : index
    %3 = vector.load %arg10[%c0, %c0_1] : memref<16x256xf32, #tpu.memory_space<vmem>>, vector<16x256xf32>
    %c0_2 = arith.constant 0 : index
    %c0_3 = arith.constant 0 : index
    %4 = vector.load %arg2[%c0_2, %c0_3] : memref<16x16xbf16, #tpu.memory_space<vmem>>, vector<16x16xbf16>
    %c0_4 = arith.constant 0 : index
    %c0_5 = arith.constant 0 : index
    %5 = vector.load %arg3[%c0_4, %c0_5] : memref<16x256xbf16, #tpu.memory_space<vmem>>, vector<16x256xbf16>
    %cst = arith.constant dense<0.000000e+00> : vector<16x256xf32>
    %6 = tpu.matmul %4, %5, %cst {dimension_numbers = #tpu.dot_dimension_numbers<[1], [0], [0], [1], [0, 0, 1, 1], [], []>} : vector<16x16xbf16>, vector<16x256xbf16>, vector<16x256xf32> -> vector<16x256xf32>
    %7 = arith.addf %3, %6 : vector<16x256xf32>
    %c0_6 = arith.constant 0 : index
    %c0_7 = arith.constant 0 : index
    %8 = vector.load %arg10[%c0_6, %c0_7] : memref<16x256xf32, #tpu.memory_space<vmem>>, vector<16x256xf32>
    tpu.vector_store %arg10[%c0_6, %c0_7], %7 {strides = array<i32>} : memref<16x256xf32, #tpu.memory_space<vmem>>, vector<16x256xf32>,
    %c0_i32_8 = arith.constant 0 : i32
    %9 = arith.cmpi eq, %arg1, %c0_i32_8 : i32
    %10 = arith.extui %9 : i1 to i32
    %c0_i32_9 = arith.constant 0 : i32
    %11 = arith.cmpi ne, %10, %c0_i32_9 : i32
    scf.if %11 {
      %c0_10 = arith.constant 0 : index
      %c0_11 = arith.constant 0 : index
      %12 = vector.load %arg10[%c0_10, %c0_11] : memref<16x256xf32, #tpu.memory_space<vmem>>, vector<16x256xf32>
      %c0_12 = arith.constant 0 : index
      %c0_13 = arith.constant 0 : index
      %13 = vector.load %arg11[%c0_12, %c0_13] : memref<16x512xf32, #tpu.memory_space<vmem>>, vector<16x256xf32>
      tpu.vector_store %arg11[%c0_12, %c0_13], %12 {strides = array<i32>} : memref<16x512xf32, #tpu.memory_space<vmem>>, vector<16x256xf32>,
      %c0_14 = arith.constant 0 : index
      %c0_15 = arith.constant 0 : index
      %14 = vector.load %arg4[%c0_14, %c0_15] : memref<16x256xbf16, #tpu.memory_space<vmem>>, vector<16x256xbf16>
      %15 = arith.extf %14 : vector<16x256xbf16> to vector<16x256xf32>
      %c0_16 = arith.constant 0 : index
      %c256 = arith.constant 256 : index
      %16 = vector.load %arg11[%c0_16, %c256] : memref<16x512xf32, #tpu.memory_space<vmem>>, vector<16x256xf32>
      tpu.vector_store %arg11[%c0_16, %c256], %15 {strides = array<i32>} : memref<16x512xf32, #tpu.memory_space<vmem>>, vector<16x256xf32>,
      %c0_17 = arith.constant 0 : index
      %c0_18 = arith.constant 0 : index
      %17 = vector.load %arg11[%c0_17, %c0_18] : memref<16x512xf32, #tpu.memory_space<vmem>>, vector<16x512xf32>
      %18 = arith.truncf %17 : vector<16x512xf32> to vector<16x512xbf16>
      %c0_19 = arith.constant 0 : index
      %c0_20 = arith.constant 0 : index
      %19 = vector.load %arg5[%c0_19, %c0_20] : memref<512x256xbf16, #tpu.memory_space<vmem>>, vector<512x256xbf16>
      %cst_21 = arith.constant dense<0.000000e+00> : vector<16x256xf32>
      %20 = tpu.matmul %18, %19, %cst_21 {dimension_numbers = #tpu.dot_dimension_numbers<[1], [0], [0], [1], [0, 0, 1, 1], [], []>} : vector<16x512xbf16>, vector<512x256xbf16>, vector<16x256xf32> -> vector<16x256xf32>
      %c0_22 = arith.constant 0 : index
      %c0_23 = arith.constant 0 : index
      %21 = vector.load %arg6[%c0_22, %c0_23] : memref<1x256xf32, #tpu.memory_space<vmem>>, vector<1x256xf32>
      %22 = vector.broadcast %21 : vector<1x256xf32> to vector<16x256xf32>
      %23 = arith.addf %20, %22 : vector<16x256xf32>
      %cst_24 = arith.constant 0.000000e+00 : f32
      %24 = vector.broadcast %cst_24 : f32 to vector<16x256xf32>
      %25 = arith.maximumf %23, %24 : vector<16x256xf32>
      %c0_25 = arith.constant 0 : index
      %c0_26 = arith.constant 0 : index
      %26 = vector.load %arg8[%c0_25, %c0_26] : memref<16x256xf32, #tpu.memory_space<vmem>>, vector<16x256xf32>
      tpu.vector_store %arg8[%c0_25, %c0_26], %25 {strides = array<i32>} : memref<16x256xf32, #tpu.memory_space<vmem>>, vector<16x256xf32>,
      %cst_27 = arith.constant 0.000000e+00 : f32
      %27 = vector.broadcast %cst_27 : f32 to vector<16x256xf32>
      %28 = arith.cmpf olt, %25, %27 : vector<16x256xf32>
      %29 = math.ceil %25 : vector<16x256xf32>
      %30 = math.floor %25 : vector<16x256xf32>
      %31 = arith.select %28, %29, %30 : vector<16x256xi1>, vector<16x256xf32>
      %c0_28 = arith.constant 0 : index
      %c0_29 = arith.constant 0 : index
      %32 = vector.load %arg7[%c0_28, %c0_29] : memref<256x128xf32, #tpu.memory_space<vmem>>, vector<256x128xf32>
      %cst_30 = arith.constant dense<0.000000e+00> : vector<16x128xf32>
      %33 = tpu.matmul %31, %32, %cst_30 {dimension_numbers = #tpu.dot_dimension_numbers<[1], [0], [0], [1], [0, 0, 1, 1], [], []>} : vector<16x256xf32>, vector<256x128xf32>, vector<16x128xf32> -> vector<16x128xf32>
      %34 = math.tanh %33 : vector<16x128xf32>
      %c0_31 = arith.constant 0 : index
      %c0_32 = arith.constant 0 : index
      %35 = vector.load %arg9[%c0_31, %c0_32] : memref<16x128xf32, #tpu.memory_space<vmem>>, vector<16x128xf32>
      tpu.vector_store %arg9[%c0_31, %c0_32], %34 {strides = array<i32>} : memref<16x128xf32, #tpu.memory_space<vmem>>, vector<16x128xf32>,
    } else {
    }
    return
  }
  func.func @transform_0(%arg0: i32, %arg1: i32) -> (i32, i32) {
    %c0_i32 = arith.constant 0 : i32
    return %arg0, %arg1 : i32, i32
  }
  func.func @transform_1(%arg0: i32, %arg1: i32) -> (i32, i32) {
    %c0_i32 = arith.constant 0 : i32
    %c0_i32_0 = arith.constant 0 : i32
    return %arg1, %c0_i32 : i32, i32
  }
  func.func @transform_2(%arg0: i32, %arg1: i32) -> (i32, i32) {
    %c0_i32 = arith.constant 0 : i32
    %c0_i32_0 = arith.constant 0 : i32
    return %arg0, %c0_i32 : i32, i32
  }
  func.func @transform_3(%arg0: i32, %arg1: i32) -> (i32, i32) {
    %c0_i32 = arith.constant 0 : i32
    %c0_i32_0 = arith.constant 0 : i32
    %c0_i32_1 = arith.constant 0 : i32
    return %c0_i32, %c0_i32_0 : i32, i32
  }
  func.func @transform_4(%arg0: i32, %arg1: i32) -> (i32, i32) {
    %c0_i32 = arith.constant 0 : i32
    %c0_i32_0 = arith.constant 0 : i32
    %c0_i32_1 = arith.constant 0 : i32
    return %c0_i32, %c0_i32_0 : i32, i32
  }
  func.func @transform_5(%arg0: i32, %arg1: i32) -> (i32, i32) {
    %c0_i32 = arith.constant 0 : i32
    %c0_i32_0 = arith.constant 0 : i32
    %c0_i32_1 = arith.constant 0 : i32
    return %c0_i32, %c0_i32_0 : i32, i32
  }
  func.func @transform_6(%arg0: i32, %arg1: i32) -> (i32, i32) {
    %c0_i32 = arith.constant 0 : i32
    %c0_i32_0 = arith.constant 0 : i32
    return %arg0, %c0_i32 : i32, i32
  }
  func.func @transform_7(%arg0: i32, %arg1: i32) -> (i32, i32) {
    %c0_i32 = arith.constant 0 : i32
    %c0_i32_0 = arith.constant 0 : i32
    return %arg0, %c0_i32 : i32, i32
  }
}

module attributes {stable_mosaic.version = 11 : i64} {
  func.func @pooled_readout_head_kernel(%arg0: i32, %arg1: memref<16x256xf32, #tpu.memory_space<vmem>>, %arg2: memref<16x1xf32, #tpu.memory_space<vmem>>, %arg3: memref<2x16xf32, #tpu.memory_space<vmem>>, %arg4: memref<16x2xf32, #tpu.memory_space<vmem>>, %arg5: memref<2x1xf32, #tpu.memory_space<vmem>>, %arg6: memref<2x512xf32, #tpu.memory_space<vmem>>, %arg7: memref<2x512xf32, #tpu.memory_space<vmem>>, %arg8: memref<512x256xf32, #tpu.memory_space<vmem>>, %arg9: memref<1x256xf32, #tpu.memory_space<vmem>>, %arg10: memref<256x128xf32, #tpu.memory_space<vmem>>, %arg11: memref<1x128xf32, #tpu.memory_space<vmem>>, %arg12: memref<128x1xf32, #tpu.memory_space<vmem>>, %arg13: memref<1x1xf32, #tpu.memory_space<vmem>>, %arg14: memref<2x1xf32, #tpu.memory_space<vmem>>, %arg15: memref<2x256xf32, #tpu.memory_space<vmem>>, %arg16: memref<2x256xf32, #tpu.memory_space<vmem>>, %arg17: memref<2x512xf32, #tpu.memory_space<vmem>>) attributes {dimension_semantics = [#tpu.dimension_semantics<arbitrary>], iteration_bounds = array<i64: 1>, scalar_prefetch = 0 : i64, scratch_operands = 3 : i64, tpu.core_type = #tpu.core_type<tc>, window_params = [{transform_indices = @transform_0, window_bounds = array<i64: 16, 256>}, {transform_indices = @transform_1, window_bounds = array<i64: 16, 1>}, {transform_indices = @transform_2, window_bounds = array<i64: 2, 16>}, {transform_indices = @transform_3, window_bounds = array<i64: 16, 2>}, {pipeline_mode = #tpu.pipeline_mode<synchronous>, transform_indices = @transform_4, window_bounds = array<i64: 2, 1>}, {pipeline_mode = #tpu.pipeline_mode<synchronous>, transform_indices = @transform_5, window_bounds = array<i64: 2, 512>}, {pipeline_mode = #tpu.pipeline_mode<synchronous>, transform_indices = @transform_6, window_bounds = array<i64: 2, 512>}, {pipeline_mode = #tpu.pipeline_mode<synchronous>, transform_indices = @transform_7, window_bounds = array<i64: 512, 256>}, {pipeline_mode = #tpu.pipeline_mode<synchronous>, transform_indices = @transform_8, window_bounds = array<i64: 1, 256>}, {pipeline_mode = #tpu.pipeline_mode<synchronous>, transform_indices = @transform_9, window_bounds = array<i64: 256, 128>}, {pipeline_mode = #tpu.pipeline_mode<synchronous>, transform_indices = @transform_10, window_bounds = array<i64: 1, 128>}, {pipeline_mode = #tpu.pipeline_mode<synchronous>, transform_indices = @transform_11, window_bounds = array<i64: 128, 1>}, {pipeline_mode = #tpu.pipeline_mode<synchronous>, transform_indices = @transform_12, window_bounds = array<i64: 1, 1>}, {pipeline_mode = #tpu.pipeline_mode<synchronous>, transform_indices = @transform_13, window_bounds = array<i64: 2, 1>}]} {
    %c0_i32 = arith.constant 0 : i32
    %0 = arith.cmpi eq, %arg0, %c0_i32 : i32
    %1 = arith.extui %0 : i1 to i32
    %c0_i32_0 = arith.constant 0 : i32
    %2 = arith.cmpi ne, %1, %c0_i32_0 : i32
    scf.if %2 {
      %cst_29 = arith.constant 0.000000e+00 : f32
      %50 = vector.broadcast %cst_29 : f32 to vector<2x256xf32>
      %c0_30 = arith.constant 0 : index
      %c0_31 = arith.constant 0 : index
      %51 = vector.load %arg15[%c0_30, %c0_31] : memref<2x256xf32, #tpu.memory_space<vmem>>, vector<2x256xf32>
      tpu.vector_store %arg15[%c0_30, %c0_31], %50 {strides = array<i32>} : memref<2x256xf32, #tpu.memory_space<vmem>>, vector<2x256xf32>,
      %cst_32 = arith.constant -1.000000e+30 : f32
      %52 = vector.broadcast %cst_32 : f32 to vector<2x256xf32>
      %c0_33 = arith.constant 0 : index
      %c0_34 = arith.constant 0 : index
      %53 = vector.load %arg16[%c0_33, %c0_34] : memref<2x256xf32, #tpu.memory_space<vmem>>, vector<2x256xf32>
      tpu.vector_store %arg16[%c0_33, %c0_34], %52 {strides = array<i32>} : memref<2x256xf32, #tpu.memory_space<vmem>>, vector<2x256xf32>,
    } else {
    }
    %c0 = arith.constant 0 : index
    %c0_1 = arith.constant 0 : index
    %3 = vector.load %arg1[%c0, %c0_1] : memref<16x256xf32, #tpu.memory_space<vmem>>, vector<16x256xf32>
    %cst = arith.constant 0.000000e+00 : f32
    %4 = vector.broadcast %cst : f32 to vector<16x256xf32>
    %5 = arith.cmpf olt, %3, %4 : vector<16x256xf32>
    %6 = math.ceil %3 : vector<16x256xf32>
    %7 = math.floor %3 : vector<16x256xf32>
    %8 = arith.select %5, %6, %7 : vector<16x256xi1>, vector<16x256xf32>
    %c0_2 = arith.constant 0 : index
    %c0_3 = arith.constant 0 : index
    %9 = vector.load %arg2[%c0_2, %c0_3] : memref<16x1xf32, #tpu.memory_space<vmem>>, vector<16x1xf32>
    %10 = vector.broadcast %9 : vector<16x1xf32> to vector<16x256xf32>
    %11 = arith.mulf %8, %10 : vector<16x256xf32>
    %cst_4 = arith.constant 0.000000e+00 : f32
    %12 = vector.broadcast %cst_4 : f32 to vector<16x256xf32>
    %13 = arith.cmpf olt, %11, %12 : vector<16x256xf32>
    %14 = math.ceil %11 : vector<16x256xf32>
    %15 = math.floor %11 : vector<16x256xf32>
    %16 = arith.select %13, %14, %15 : vector<16x256xi1>, vector<16x256xf32>
    %c0_5 = arith.constant 0 : index
    %c0_6 = arith.constant 0 : index
    %17 = vector.load %arg15[%c0_5, %c0_6] : memref<2x256xf32, #tpu.memory_space<vmem>>, vector<2x256xf32>
    %c0_7 = arith.constant 0 : index
    %c0_8 = arith.constant 0 : index
    %18 = vector.load %arg3[%c0_7, %c0_8] : memref<2x16xf32, #tpu.memory_space<vmem>>, vector<2x16xf32>
    %cst_9 = arith.constant dense<0.000000e+00> : vector<2x256xf32>
    %19 = tpu.matmul %18, %16, %cst_9 {dimension_numbers = #tpu.dot_dimension_numbers<[1], [0], [0], [1], [0, 0, 1, 1], [], []>} : vector<2x16xf32>, vector<16x256xf32>, vector<2x256xf32> -> vector<2x256xf32>
    %20 = arith.addf %17, %19 : vector<2x256xf32>
    %c0_10 = arith.constant 0 : index
    %c0_11 = arith.constant 0 : index
    %21 = vector.load %arg15[%c0_10, %c0_11] : memref<2x256xf32, #tpu.memory_space<vmem>>, vector<2x256xf32>
    tpu.vector_store %arg15[%c0_10, %c0_11], %20 {strides = array<i32>} : memref<2x256xf32, #tpu.memory_space<vmem>>, vector<2x256xf32>,
    %c0_12 = arith.constant 0 : index
    %c0_13 = arith.constant 0 : index
    %22 = vector.load %arg4[%c0_12, %c0_13] : memref<16x2xf32, #tpu.memory_space<vmem>>, vector<16x2xf32>
    %23 = vector.extract_strided_slice %22 {offsets = [0, 0], sizes = [16, 1], strides = [1, 1]} : vector<16x2xf32> to vector<16x1xf32>
    %cst_14 = arith.constant 0.000000e+00 : f32
    %24 = vector.broadcast %cst_14 : f32 to vector<16x1xf32>
    %25 = arith.cmpf ogt, %23, %24 : vector<16x1xf32>
    %cst_15 = arith.constant -1.000000e+30 : f32
    %26 = vector.shape_cast %25 : vector<16x1xi1> to vector<16x1xi1>
    %27 = vector.broadcast %26 : vector<16x1xi1> to vector<16x256xi1>
    %28 = vector.broadcast %cst_15 : f32 to vector<16x256xf32>
    %29 = arith.select %27, %16, %28 : vector<16x256xi1>, vector<16x256xf32>
    %cst_16 = arith.constant dense<0xFF800000> : vector<256xf32>
    %30 = vector.multi_reduction <maximumf>, %29, %cst_16 [0] : vector<16x256xf32> to vector<256xf32>
    %31 = vector.shape_cast %30 : vector<256xf32> to vector<1x256xf32>
    %c0_17 = arith.constant 0 : index
    %c0_18 = arith.constant 0 : index
    %32 = vector.load %arg16[%c0_17, %c0_18] : memref<2x256xf32, #tpu.memory_space<vmem>>, vector<1x256xf32>
    %33 = arith.maximumf %32, %31 : vector<1x256xf32>
    %c0_19 = arith.constant 0 : index
    %c0_20 = arith.constant 0 : index
    %34 = vector.load %arg16[%c0_19, %c0_20] : memref<2x256xf32, #tpu.memory_space<vmem>>, vector<1x256xf32>
    tpu.vector_store %arg16[%c0_19, %c0_20], %33 {strides = array<i32>} : memref<2x256xf32, #tpu.memory_space<vmem>>, vector<1x256xf32>,
    %35 = vector.extract_strided_slice %22 {offsets = [0, 1], sizes = [16, 1], strides = [1, 1]} : vector<16x2xf32> to vector<16x1xf32>
    %cst_21 = arith.constant 0.000000e+00 : f32
    %36 = vector.broadcast %cst_21 : f32 to vector<16x1xf32>
    %37 = arith.cmpf ogt, %35, %36 : vector<16x1xf32>
    %cst_22 = arith.constant -1.000000e+30 : f32
    %38 = vector.shape_cast %37 : vector<16x1xi1> to vector<16x1xi1>
    %39 = vector.broadcast %38 : vector<16x1xi1> to vector<16x256xi1>
    %40 = vector.broadcast %cst_22 : f32 to vector<16x256xf32>
    %41 = arith.select %39, %16, %40 : vector<16x256xi1>, vector<16x256xf32>
    %cst_23 = arith.constant dense<0xFF800000> : vector<256xf32>
    %42 = vector.multi_reduction <maximumf>, %41, %cst_23 [0] : vector<16x256xf32> to vector<256xf32>
    %43 = vector.shape_cast %42 : vector<256xf32> to vector<1x256xf32>
    %c1 = arith.constant 1 : index
    %c0_24 = arith.constant 0 : index
    %44 = vector.load %arg16[%c1, %c0_24] : memref<2x256xf32, #tpu.memory_space<vmem>>, vector<1x256xf32>
    %45 = arith.maximumf %44, %43 : vector<1x256xf32>
    %c1_25 = arith.constant 1 : index
    %c0_26 = arith.constant 0 : index
    %46 = vector.load %arg16[%c1_25, %c0_26] : memref<2x256xf32, #tpu.memory_space<vmem>>, vector<1x256xf32>
    tpu.vector_store %arg16[%c1_25, %c0_26], %45 {strides = array<i32>} : memref<2x256xf32, #tpu.memory_space<vmem>>, vector<1x256xf32>,
    %c0_i32_27 = arith.constant 0 : i32
    %47 = arith.cmpi eq, %arg0, %c0_i32_27 : i32
    %48 = arith.extui %47 : i1 to i32
    %c0_i32_28 = arith.constant 0 : i32
    %49 = arith.cmpi ne, %48, %c0_i32_28 : i32
    scf.if %49 {
      %c0_29 = arith.constant 0 : index
      %c0_30 = arith.constant 0 : index
      %50 = vector.load %arg16[%c0_29, %c0_30] : memref<2x256xf32, #tpu.memory_space<vmem>>, vector<2x256xf32>
      %c0_31 = arith.constant 0 : index
      %c0_32 = arith.constant 0 : index
      %51 = vector.load %arg17[%c0_31, %c0_32] : memref<2x512xf32, #tpu.memory_space<vmem>>, vector<2x256xf32>
      tpu.vector_store %arg17[%c0_31, %c0_32], %50 {strides = array<i32>} : memref<2x512xf32, #tpu.memory_space<vmem>>, vector<2x256xf32>,
      %c0_33 = arith.constant 0 : index
      %c0_34 = arith.constant 0 : index
      %52 = vector.load %arg15[%c0_33, %c0_34] : memref<2x256xf32, #tpu.memory_space<vmem>>, vector<2x256xf32>
      %c0_35 = arith.constant 0 : index
      %c0_36 = arith.constant 0 : index
      %53 = vector.load %arg5[%c0_35, %c0_36] : memref<2x1xf32, #tpu.memory_space<vmem>>, vector<2x1xf32>
      %54 = vector.broadcast %53 : vector<2x1xf32> to vector<2x256xf32>
      %55 = arith.divf %52, %54 : vector<2x256xf32>
      %cst_37 = arith.constant 0.000000e+00 : f32
      %56 = vector.broadcast %cst_37 : f32 to vector<2x256xf32>
      %57 = arith.cmpf olt, %55, %56 : vector<2x256xf32>
      %58 = math.ceil %55 : vector<2x256xf32>
      %59 = math.floor %55 : vector<2x256xf32>
      %60 = arith.select %57, %58, %59 : vector<2x256xi1>, vector<2x256xf32>
      %c0_38 = arith.constant 0 : index
      %c256 = arith.constant 256 : index
      %61 = vector.load %arg17[%c0_38, %c256] : memref<2x512xf32, #tpu.memory_space<vmem>>, vector<2x256xf32>
      tpu.vector_store %arg17[%c0_38, %c256], %60 {strides = array<i32>} : memref<2x512xf32, #tpu.memory_space<vmem>>, vector<2x256xf32>,
      %c0_39 = arith.constant 0 : index
      %c0_40 = arith.constant 0 : index
      %62 = vector.load %arg6[%c0_39, %c0_40] : memref<2x512xf32, #tpu.memory_space<vmem>>, vector<2x512xf32>
      %c0_41 = arith.constant 0 : index
      %c0_42 = arith.constant 0 : index
      %63 = vector.load %arg7[%c0_41, %c0_42] : memref<2x512xf32, #tpu.memory_space<vmem>>, vector<2x512xf32>
      %64 = arith.addf %62, %63 : vector<2x512xf32>
      %c0_43 = arith.constant 0 : index
      %c0_44 = arith.constant 0 : index
      %65 = vector.load %arg17[%c0_43, %c0_44] : memref<2x512xf32, #tpu.memory_space<vmem>>, vector<2x512xf32>
      %66 = arith.addf %64, %65 : vector<2x512xf32>
      %c0_45 = arith.constant 0 : index
      %c0_46 = arith.constant 0 : index
      %67 = vector.load %arg8[%c0_45, %c0_46] : memref<512x256xf32, #tpu.memory_space<vmem>>, vector<512x256xf32>
      %cst_47 = arith.constant dense<0.000000e+00> : vector<2x256xf32>
      %68 = tpu.matmul %66, %67, %cst_47 {dimension_numbers = #tpu.dot_dimension_numbers<[1], [0], [0], [1], [0, 0, 1, 1], [], []>} : vector<2x512xf32>, vector<512x256xf32>, vector<2x256xf32> -> vector<2x256xf32>
      %c0_48 = arith.constant 0 : index
      %c0_49 = arith.constant 0 : index
      %69 = vector.load %arg9[%c0_48, %c0_49] : memref<1x256xf32, #tpu.memory_space<vmem>>, vector<1x256xf32>
      %70 = vector.broadcast %69 : vector<1x256xf32> to vector<2x256xf32>
      %71 = arith.addf %68, %70 : vector<2x256xf32>
      %cst_50 = arith.constant 0.000000e+00 : f32
      %72 = vector.broadcast %cst_50 : f32 to vector<2x256xf32>
      %73 = arith.maximumf %71, %72 : vector<2x256xf32>
      %c0_51 = arith.constant 0 : index
      %c0_52 = arith.constant 0 : index
      %74 = vector.load %arg10[%c0_51, %c0_52] : memref<256x128xf32, #tpu.memory_space<vmem>>, vector<256x128xf32>
      %cst_53 = arith.constant dense<0.000000e+00> : vector<2x128xf32>
      %75 = tpu.matmul %73, %74, %cst_53 {dimension_numbers = #tpu.dot_dimension_numbers<[1], [0], [0], [1], [0, 0, 1, 1], [], []>} : vector<2x256xf32>, vector<256x128xf32>, vector<2x128xf32> -> vector<2x128xf32>
      %c0_54 = arith.constant 0 : index
      %c0_55 = arith.constant 0 : index
      %76 = vector.load %arg11[%c0_54, %c0_55] : memref<1x128xf32, #tpu.memory_space<vmem>>, vector<1x128xf32>
      %77 = vector.broadcast %76 : vector<1x128xf32> to vector<2x128xf32>
      %78 = arith.addf %75, %77 : vector<2x128xf32>
      %cst_56 = arith.constant 0.000000e+00 : f32
      %79 = vector.broadcast %cst_56 : f32 to vector<2x128xf32>
      %80 = arith.maximumf %78, %79 : vector<2x128xf32>
      %c0_57 = arith.constant 0 : index
      %c0_58 = arith.constant 0 : index
      %81 = vector.load %arg12[%c0_57, %c0_58] : memref<128x1xf32, #tpu.memory_space<vmem>>, vector<128x1xf32>
      %cst_59 = arith.constant dense<0.000000e+00> : vector<2x1xf32>
      %82 = tpu.matmul %80, %81, %cst_59 {dimension_numbers = #tpu.dot_dimension_numbers<[1], [0], [0], [1], [0, 0, 1, 1], [], []>} : vector<2x128xf32>, vector<128x1xf32>, vector<2x1xf32> -> vector<2x1xf32>
      %c0_60 = arith.constant 0 : index
      %c0_61 = arith.constant 0 : index
      %83 = vector.load %arg13[%c0_60, %c0_61] : memref<1x1xf32, #tpu.memory_space<vmem>>, vector<1x1xf32>
      %84 = vector.broadcast %83 : vector<1x1xf32> to vector<2x1xf32>
      %85 = arith.addf %82, %84 : vector<2x1xf32>
      %cst_62 = arith.constant 0.000000e+00 : f32
      %86 = vector.broadcast %cst_62 : f32 to vector<2x1xf32>
      %87 = arith.subf %86, %85 : vector<2x1xf32>
      %88 = math.exp %87 : vector<2x1xf32>
      %cst_63 = arith.constant 1.000000e+00 : f32
      %89 = vector.broadcast %cst_63 : f32 to vector<2x1xf32>
      %90 = arith.addf %89, %88 : vector<2x1xf32>
      %cst_64 = arith.constant 1.000000e+00 : f32
      %91 = vector.broadcast %cst_64 : f32 to vector<2x1xf32>
      %92 = arith.divf %91, %90 : vector<2x1xf32>
      %c0_65 = arith.constant 0 : index
      %c0_66 = arith.constant 0 : index
      %93 = vector.load %arg14[%c0_65, %c0_66] : memref<2x1xf32, #tpu.memory_space<vmem>>, vector<2x1xf32>
      tpu.vector_store %arg14[%c0_65, %c0_66], %92 {strides = array<i32>} : memref<2x1xf32, #tpu.memory_space<vmem>>, vector<2x1xf32>,
    } else {
    }
    return
  }
  func.func @transform_0(%arg0: i32) -> (i32, i32) {
    %c0_i32 = arith.constant 0 : i32
    %c0_i32_0 = arith.constant 0 : i32
    return %arg0, %c0_i32 : i32, i32
  }
  func.func @transform_1(%arg0: i32) -> (i32, i32) {
    %c0_i32 = arith.constant 0 : i32
    %c0_i32_0 = arith.constant 0 : i32
    return %arg0, %c0_i32 : i32, i32
  }
  func.func @transform_2(%arg0: i32) -> (i32, i32) {
    %c0_i32 = arith.constant 0 : i32
    %c0_i32_0 = arith.constant 0 : i32
    return %c0_i32, %arg0 : i32, i32
  }
  func.func @transform_3(%arg0: i32) -> (i32, i32) {
    %c0_i32 = arith.constant 0 : i32
    %c0_i32_0 = arith.constant 0 : i32
    return %arg0, %c0_i32 : i32, i32
  }
  func.func @transform_4(%arg0: i32) -> (i32, i32) {
    %c0_i32 = arith.constant 0 : i32
    %c0_i32_0 = arith.constant 0 : i32
    %c0_i32_1 = arith.constant 0 : i32
    return %c0_i32, %c0_i32_0 : i32, i32
  }
  func.func @transform_5(%arg0: i32) -> (i32, i32) {
    %c0_i32 = arith.constant 0 : i32
    %c0_i32_0 = arith.constant 0 : i32
    %c0_i32_1 = arith.constant 0 : i32
    return %c0_i32, %c0_i32_0 : i32, i32
  }
  func.func @transform_6(%arg0: i32) -> (i32, i32) {
    %c0_i32 = arith.constant 0 : i32
    %c0_i32_0 = arith.constant 0 : i32
    %c0_i32_1 = arith.constant 0 : i32
    return %c0_i32, %c0_i32_0 : i32, i32
  }
  func.func @transform_7(%arg0: i32) -> (i32, i32) {
    %c0_i32 = arith.constant 0 : i32
    %c0_i32_0 = arith.constant 0 : i32
    %c0_i32_1 = arith.constant 0 : i32
    return %c0_i32, %c0_i32_0 : i32, i32
  }
  func.func @transform_8(%arg0: i32) -> (i32, i32) {
    %c0_i32 = arith.constant 0 : i32
    %c0_i32_0 = arith.constant 0 : i32
    %c0_i32_1 = arith.constant 0 : i32
    return %c0_i32, %c0_i32_0 : i32, i32
  }
  func.func @transform_9(%arg0: i32) -> (i32, i32) {
    %c0_i32 = arith.constant 0 : i32
    %c0_i32_0 = arith.constant 0 : i32
    %c0_i32_1 = arith.constant 0 : i32
    return %c0_i32, %c0_i32_0 : i32, i32
  }
  func.func @transform_10(%arg0: i32) -> (i32, i32) {
    %c0_i32 = arith.constant 0 : i32
    %c0_i32_0 = arith.constant 0 : i32
    %c0_i32_1 = arith.constant 0 : i32
    return %c0_i32, %c0_i32_0 : i32, i32
  }
  func.func @transform_11(%arg0: i32) -> (i32, i32) {
    %c0_i32 = arith.constant 0 : i32
    %c0_i32_0 = arith.constant 0 : i32
    %c0_i32_1 = arith.constant 0 : i32
    return %c0_i32, %c0_i32_0 : i32, i32
  }
  func.func @transform_12(%arg0: i32) -> (i32, i32) {
    %c0_i32 = arith.constant 0 : i32
    %c0_i32_0 = arith.constant 0 : i32
    %c0_i32_1 = arith.constant 0 : i32
    return %c0_i32, %c0_i32_0 : i32, i32
  }
  func.func @transform_13(%arg0: i32) -> (i32, i32) {
    %c0_i32 = arith.constant 0 : i32
    %c0_i32_0 = arith.constant 0 : i32
    %c0_i32_1 = arith.constant 0 : i32
    return %c0_i32, %c0_i32_0 : i32, i32
  }
}

</mosaic_0001>

<bundles_post_ra>
// kernel: net_forward.4
= control target key start
LH: loop header
LB: loop body
LE: loop exit
PB: predicated region body
PF: predicated region fallthrough
CT: control target
= control target key end

     0   :  { %vm43_vm0 = vcmask 31744   ;;  %v399_v2 = vmov 0.0   ;;  %vm63_vm1 = vcmask 130048   ;;  %vm127_vm2 = vcmask 1043456   ;;  %s516_s1 = inlined_call_operand.vmem [shape: bf16[16,4], index: 1, kind: input, shape index: {}, may-alias: {1,2}]   ;;  %s517_s0 = inlined_call_operand.vmem [shape: bf16[16,16], index: 0, kind: input, shape index: {}]   ;;  %s518_s2 = inlined_call_operand.vmem [shape: bf16[16,4], index: 2, kind: input, shape index: {}, may-alias: {1,2}]   ;;  %s519_s3 = inlined_call_operand.vmem [shape: bf16[8,256], index: 3, kind: input, shape index: {}]   ;;  %s520_s6 = inlined_call_operand.vmem [shape: f32[16,2], index: 6, kind: input, shape index: {}]   ;;  %s521_s4 = inlined_call_operand.vmem [shape: f32[1,256], index: 4, kind: input, shape index: {}]   ;;  %s522_s7 = inlined_call_operand.vmem [shape: f32[2,1], index: 7, kind: input, shape index: {}]   ;;  %s523_s8 = inlined_call_operand.vmem [shape: bf16[16,256], index: 8, kind: output, shape index: {0}]   ;;  %s524_s5 = inlined_call_operand.vmem [shape: f32[2,16], index: 5, kind: input, shape index: {}]   ;;  %s525_s9 = inlined_call_operand.vmem [shape: f32[2,512], index: 9, kind: output, shape index: {1}]  }
   0x1   :  { %v376_v0 = vld [vmem:[%s516_s1] sm:$0xff]  ;;  %44 = vst.msk [vmem:[#allocation2] sm:$0xff] %vm43_vm0, %v399_v2  ;;  %s400_s1 = smov 4   ;;  %v240_v15 = vld [vmem:[%s520_s6 + $0x8] sm:$0xff]  ;;  %v401_v17 = vmov 0   ;;  %v402_v21 = vmov 1  }
   0x2   :  { %v378_v1 = vld [vmem:[%s518_s2] sm:$0xff]   ;;  %38 = vst [vmem:[#allocation4] sm:$0xf] %v399_v2  ;;  %74 = vmatpush.bf16.msra.mxu0 %v376_v0  ;;  %393 = vset.pattern.permute.xlu1 %v401_v17  ;;  %vm242_vm3 = vcmp.gt.f32.partialorder %v240_v15, 0.0  ;;  %vm105_vm5 = vcmask 64544   ;;  %vm123_vm6 = vcmask 64512  }
   0x3   :  { %v375_v3 = vld [vmem:[%s517_s0] sm:$0xff]  ;;  %v379_v4 = vunpack.c.l.bf16 %v378_v1  ;;  %v380_v5 = vunpack.c.h.bf16 %v378_v1  ;;  %45 = vst.msk [vmem:[#allocation2 + $0x8] sm:$0xff] %vm43_vm0, %v399_v2  ;;  %392 = vset.pattern.permute.xlu0 %v401_v17  ;;  %v244_v19 = vsel %vm242_vm3, 1, %v401_v17  ;;  %395 = vset.pattern.permute.xlu2 %v402_v21  ;;  %v403_v36 = vmov -1e+30  }
   0x4   :  { %v111_v7 = vld [vmem:[%s519_s3] sm:$0xff]  ;;  %249 = vperm.xlu1 %393, %v244_v19   ;;  %288 = vperm.xlu2 %395, %v244_v19   ;;  %39 = vst [vmem:[#allocation5] sm:$0xf] %v403_v36  ;;  %vm275_vm15 = vcmask 1040384  }
   0x5   :  { %v387_v6 = vpack.i.bf16 %v380_v5, %v379_v4  ;;  %370 = vmatmul.msk.bf16.vlgmr.msra.gmra.mxu0 %vm63_vm1, %v375_v3  ;;  %v119_v8 = vunpack.c.l.b16 %v111_v7  ;;  %v120_v9 = vunpack.c.h.b16 %v111_v7  ;;  %v239_v16 = vld [vmem:[%s520_s6] sm:$0xff] }
   0x6   :  { %vm241_vm4 = vcmp.gt.f32.partialorder %v239_v16, 0.0  ;;  %v112_v34 = vld [vmem:[%s521_s4] sm:$0x3] }
   0x7   :  { %388 = vrot.lane.b32.xlu0 %v387_v6, %s400_s1  ;;  %v121_v10 = vpack.c.b16 %v119_v8, %v119_v8  ;;  %v122_v11 = vpack.c.b16 %v120_v9, %v120_v9  ;;  %v243_v20 = vsel %vm241_vm4, 1, %v401_v17  ;;  %v114_v35 = vperm.slane %v112_v34, 0  ;;  %v324_v55 = vld [vmem:[%s522_s7] sm:$0x3] }
   0x8   :  { %v46_v14 = vld [vmem:[#allocation2] sm:$0xff]  ;;  %v115_v40 = vperm.slane %v112_v34, 1 }
   0x9   :  { %v129_v12 = vsel %vm127_vm2, %v121_v10, 0  ;;  %v132_v13 = vsel %vm127_vm2, %v122_v11, 0  ;;  %v187_v0 = vld [vmem:[%s524_s5] sm:$0x3] }
   0xa   :  { %141 = vmatpush.bf16.msra.mxu1 %v129_v12  ;;  %155 = vmatpush.bf16.msra.mxu2 %v132_v13  ;;  %v47_v23 = vld [vmem:[#allocation2 + $0x8] sm:$0xff] }
   0xc   :  { %394 = vset.pattern.permute.xlu1 %v402_v21  ;;  %396 = vset.pattern.permute.xlu2 %v401_v17 }
   0xd   :  { %285 = vperm.xlu1 %394, %v243_v20   ;;  %327 = vperm.xlu2 %396, %v324_v55  }
   0xf   :  { %246 = vperm.xlu0 %392, %v243_v20  }
  0x5e   :  { %v289_v51 = vpop.permute.xlu2 %288 }
  0x5f   :  { %vm291_vm12 = vcmp.eq.s32.totalorder %v289_v51, 1 }
  0x67   :  { %v328_v55 = vpop.permute.xlu2 %327 }
  0x76   :  { %v483_v37 = vpop.permute.xlu1 %249 }
  0x77   :  { %vm252_vm8 = vcmp.eq.s32.totalorder %v483_v37, 1 }
  0x79   :  { %v389_v24 = vpop.permute.xlu0 %388 }
  0x7a   :  { %v390_v27 = vunpack.i.l.bf16 %v389_v24  ;;  %v391_v29 = vunpack.i.h.bf16 %v389_v24 }
  0x7f   :  { %v286_v47 = vpop.permute.xlu1 %285 }
  0x80   :  { %vm290_vm9 = vcmp.eq.s32.totalorder %v286_v47, 1 }
  0x81   :  { %v247_v48 = vpop.permute.xlu0 %246 }
  0x82   :  { %v76_v18 = vpop.f32.mrf.mxu0  ;;  %vm251_vm10 = vcmp.eq.s32.totalorder %v247_v48, 1 }
  0x83   :  { %v81_v22 = vadd.f32 %v76_v18, %v46_v14 }
  0x85   :  { %84 = vst.msk [vmem:[#allocation2] sm:$0xff] %vm43_vm0, %v81_v22 }
  0x8a   :  { %v78_v25 = vpop.f32.mrf.mxu0 }
  0x8b   :  { %v82_v26 = vadd.f32 %v78_v25, %v47_v23 }
  0x8c   :  { %v89_v28 = vld [vmem:[#allocation2] sm:$0xff] }
  0x8d   :  { %85 = vst.msk [vmem:[#allocation2 + $0x8] sm:$0xff] %vm43_vm0, %v82_v26 }
  0x8e   :  { %91 = vst.msk [vmem:[#allocation3] sm:$0xff] %vm43_vm0, %v89_v28 }
  0x8f   :  { %106 = vst.msk [vmem:[#allocation3] sm:$0xff] %vm105_vm5, %v390_v27 }
  0x94   :  { %v90_v30 = vld [vmem:[#allocation2 + $0x8] sm:$0xff] }
  0x95   :  { %92 = vst.msk [vmem:[#allocation3 + $0x8] sm:$0xff] %vm43_vm0, %v90_v30 }
  0x96   :  { %107 = vst.msk [vmem:[#allocation3 + $0x8] sm:$0xff] %vm105_vm5, %v391_v29  ;;  %v108_v31 = vld [vmem:[#allocation3] sm:$0xff] }
  0x9d   :  { %v109_v32 = vld [vmem:[#allocation3 + $0x8] sm:$0xff] }
  0x9e   :  { %v110_v33 = vpack.c.bf16 %v109_v32, %v108_v31 }
  0xa0   :  { %371 = vmatmul.msk.bf16.vlgmr.msra.gmra.mxu1 %vm123_vm6, %v110_v33  ;;  %372 = vmatmul.msk.bf16.vlgmr.msra.gmra.mxu2 %vm123_vm6, %v110_v33 }
 0x11d   :  { %v143_v38 = vpop.f32.mrf.mxu1 }
 0x11e   :  { %v144_v39 = vadd.f32 %v143_v38, %v114_v35 }
 0x120   :  { %v162_v41 = vmax.f32 %v144_v39, 0.0  ;;  %v279_v39 = vlaneseq }
 0x122   :  { %v174_v44 = vceil.f32 %v162_v41  ;;  %v178_v45 = vfloor.f32 %v162_v41  ;;  %vm170_vm7 = vcmp.lt.f32.partialorder %v162_v41, 0.0  ;;  %vm281_vm0 = vcmp.lt.s32.totalorder %v279_v39, 256 }
 0x123   :  { %v157_v42 = vpop.f32.mrf.mxu2 }
 0x124   :  { %v158_v43 = vadd.f32 %v157_v42, %v115_v40  ;;  %v182_v54 = vsel %vm170_vm7, %v174_v44, %v178_v45  ;;  %v311_v45 = vld [vmem:[#allocation5 + $0x1] ss:$2 sm:$0x3] }
 0x125   :  { %v145_v46 = vpop.f32.mrf.mxu1  ;;  %v292_v61 = vsel %vm290_vm9, %v182_v54, -1e+30  ;;  %v253_v1 = vsel %vm251_vm10, %v182_v54, -1e+30 }
 0x126   :  { %v163_v49 = vmax.f32 %v158_v43, 0.0  ;;  %v146_v50 = vadd.f32 %v145_v46, %v114_v35 }
 0x128   :  { %v166_v52 = vpack.c.bf16 %v163_v49, %v162_v41  ;;  %v164_v53 = vmax.f32 %v146_v50, 0.0  ;;  %v175_v59 = vceil.f32 %v163_v49  ;;  %v179_v60 = vfloor.f32 %v163_v49  ;;  %v271_v41 = vld [vmem:[#allocation5] ss:$2 sm:$0x3] }
 0x129   :  { %vm171_vm13 = vcmp.lt.f32.partialorder %v163_v49, 0.0 }
 0x12a   :  { %168 = vst [vmem:[%s523_s8] sm:$0xff] %v166_v52  ;;  %vm172_vm11 = vcmp.lt.f32.partialorder %v164_v53, 0.0  ;;  %v176_v56 = vceil.f32 %v164_v53  ;;  %v180_v57 = vfloor.f32 %v164_v53  ;;  %v183_v7 = vsel %vm171_vm13, %v175_v59, %v179_v60 }
 0x12b   :  { %v159_v58 = vpop.f32.mrf.mxu2  ;;  %v254_v16 = vsel %vm251_vm10, %v183_v7, -1e+30  ;;  %v293_v19 = vsel %vm290_vm9, %v183_v7, -1e+30  ;;  %v404_v52 = vmov 269488144  }
 0x12c   :  { %v184_v62 = vsel %vm172_vm11, %v176_v56, %v180_v57  ;;  %v160_v63 = vadd.f32 %v159_v58, %v115_v40 }
 0x12d   :  { %v255_v2 = vsel %vm252_vm8, %v184_v62, -1e+30  ;;  %v294_v3 = vsel %vm291_vm12, %v184_v62, -1e+30  ;;  %205 = vmatpush.msra.mxu3 %v184_v62  ;;  %v186_v62 = vld [vmem:[#allocation4] sm:$0xf] }
 0x12e   :  { %v257_v4 = vmax.f32 %v253_v1, %v255_v2  ;;  %v296_v5 = vmax.f32 %v292_v61, %v294_v3  ;;  %v165_v6 = vmax.f32 %v160_v63, 0.0 }
 0x12f   :  { %206 = vmatpush.msra.mxu3 %v182_v54 }
 0x130   :  { %v258_v8 = vrot.slane %v257_v4, 4  ;;  %v297_v9 = vrot.slane %v296_v5, 4  ;;  %v167_v10 = vpack.c.bf16 %v165_v6, %v164_v53  ;;  %373 = vmatmul.msk.f32.vlgmr.msra.gmra.mxu3 %vm63_vm1, %v187_v0  ;;  %vm173_vm14 = vcmp.lt.f32.partialorder %v165_v6, 0.0 }
 0x131   :  { %v177_v11 = vceil.f32 %v165_v6  ;;  %v181_v12 = vfloor.f32 %v165_v6  ;;  %v330_v53 = vunpack.c.l.s4 %v404_v52 }
 0x132   :  { %169 = vst [vmem:[%s523_s8 + $0x8] sm:$0xff] %v167_v10  ;;  %v259_v13 = vmax.f32 %v257_v4, %v258_v8  ;;  %v298_v14 = vmax.f32 %v296_v5, %v297_v9 }
 0x133   :  { %v185_v15 = vsel %vm173_vm14, %v177_v11, %v181_v12  ;;  %v331_v54 = vunpack.c.0.s8 %v330_v53 }
 0x134   :  { %225 = vmatpush.msrb.mxu3 %v185_v15  ;;  %v256_v17 = vsel %vm252_vm8, %v185_v15, -1e+30  ;;  %v295_v18 = vsel %vm291_vm12, %v185_v15, -1e+30  ;;  %v260_v22 = vrot.slane %v259_v13, 2  ;;  %v299_v23 = vrot.slane %v298_v14, 2 }
 0x135   :  { %v264_v20 = vmax.f32 %v254_v16, %v256_v17  ;;  %v303_v21 = vmax.f32 %v293_v19, %v295_v18  ;;  %v332_v56 = vperm.slane %v328_v55, %v331_v54 }
 0x136   :  { %226 = vmatpush.msrb.mxu3 %v183_v7  ;;  %v261_v28 = vmax.f32 %v259_v13, %v260_v22  ;;  %v300_v29 = vmax.f32 %v298_v14, %v299_v23 }
 0x137   :  { %v265_v24 = vrot.slane %v264_v20, 4  ;;  %v304_v25 = vrot.slane %v303_v21, 4  ;;  %397 = vrcp.f32 %v332_v56  ;;  %vm339_vm2 = vweird.f32 %v332_v56 }
 0x138   :  { %374 = vmatmul.msk.f32.vlgmr.msrb.gmra.mxu3 %vm63_vm1, %v187_v0  ;;  %v262_v34 = vrot.slane %v261_v28, 1  ;;  %v301_v35 = vrot.slane %v300_v29, 1  ;;  %vm234_vm1 = vcmask 1041408   ;;  %v345_v3 = vand.u32 2147483648, %v332_v56 }
 0x139   :  { %v266_v26 = vmax.f32 %v264_v20, %v265_v24  ;;  %v305_v27 = vmax.f32 %v303_v21, %v304_v25  ;;  %v343_v5 = vand.u32 2147483647, %v332_v56 }
 0x13a   :  { %v263_v42 = vmax.f32 %v261_v28, %v262_v34  ;;  %v302_v43 = vmax.f32 %v300_v29, %v301_v35  ;;  %v346_v6 = vor.u32 1.1754944e-38, %v345_v3 }
 0x13b   :  { %v267_v30 = vrot.slane %v266_v26, 2  ;;  %v306_v31 = vrot.slane %v305_v27, 2  ;;  %vm344_vm5 = vcmp.eq.f32.partialorder %v343_v5, 8.507059e+37 }
 0x13d   :  { %v268_v32 = vmax.f32 %v266_v26, %v267_v30  ;;  %v307_v33 = vmax.f32 %v305_v27, %v306_v31  ;;  %v398_v57 = vpop.eup %397 }
 0x13e   :  { %v335_v59 = vmul.f32 %v398_v57, %v332_v56  ;;  %vm340_vm3 = vweird.f32 %v398_v57 }
 0x13f   :  { %v269_v36 = vrot.slane %v268_v32, 1  ;;  %v308_v37 = vrot.slane %v307_v33, 1  ;;  %vm341_vm4 = vmor %vm339_vm2, %vm340_vm3 }
 0x140   :  { %v336_v60 = vsub.f32 1.0, %v335_v59 }
 0x141   :  { %v270_v38 = vmax.f32 %v268_v32, %v269_v36  ;;  %v309_v40 = vmax.f32 %v307_v33, %v308_v37 }
 0x142   :  { %v337_v0 = vmul.f32 %v398_v57, %v336_v60 }
 0x143   :  { %v274_v44 = vrot.slane %v270_v38, 7  ;;  %v314_v46 = vrot.slane %v309_v40, 7 }
 0x144   :  { %v338_v4 = vadd.f32 %v398_v57, %v337_v0 }
 0x145   :  { %v276_v47 = vsel %vm275_vm15, %v263_v42, %v274_v44  ;;  %v315_v48 = vsel %vm275_vm15, %v302_v43, %v314_v46 }
 0x146   :  { %v278_v49 = vmax.f32 %v271_v41, %v276_v47  ;;  %v317_v50 = vmax.f32 %v311_v45, %v315_v48  ;;  %v342_v7 = vsel %vm341_vm4, %v398_v57, %v338_v4 }
 0x147   :  { %v347_v8 = vsel %vm344_vm5, %v346_v6, %v342_v7 }
 0x148   :  { %283 = vst.msk [vmem:[#allocation5] ss:$2 sm:$0x3] %vm281_vm0, %v278_v49 }
 0x149   :  { %318 = vst.msk [vmem:[#allocation5 + $0x1] ss:$2 sm:$0x3] %vm281_vm0, %v317_v50 }
 0x150   :  { %v321_v51 = vld [vmem:[#allocation5] sm:$0xf] }
 0x151   :  { %322 = vst [vmem:[%s525_s9] sm:$0xf] %v321_v51 }
 0x1b3   :  { %v208_v58 = vpop.f32.mrf.mxu3 }
 0x1bb   :  { %v228_v61 = vpop.f32.mrf.mxu3 }
 0x1bc   :  { %v233_v63 = vrot.slane %v228_v61, 6 }
 0x1be   :  { %v235_v1 = vsel %vm234_vm1, %v208_v58, %v233_v63 }
 0x1bf   :  { %v237_v2 = vadd.f32 %v235_v1, %v186_v62 }
 0x1c1   :  { %238 = vst [vmem:[#allocation4] sm:$0xf] %v237_v2 }
 0x1c8   :  { %v323_v9 = vld [vmem:[#allocation4] sm:$0xf] }
 0x1c9   :  { %v348_v10 = vmul.f32 %v347_v8, %v323_v9 }
 0x1cb   :  { %vm349_vm6 = vcmp.lt.f32.partialorder %v348_v10, 0.0  ;;  %v350_v11 = vceil.f32 %v348_v10  ;;  %v351_v12 = vfloor.f32 %v348_v10 }
 0x1cd   :  { %v352_v13 = vsel %vm349_vm6, %v350_v11, %v351_v12 }
 0x1ce   :  { %353 = vst [vmem:[%s525_s9 + $0x4] sm:$0xf] %v352_v13 }

// kernel: net_forward.6
= control target key start
LH: loop header
LB: loop body
LE: loop exit
PB: predicated region body
PF: predicated region fallthrough
CT: control target
= control target key end

     0   :  { %13 = vsyncpa [#allocation5], 0  ;;  %s1175_s27 = smov [#allocation4]   ;;  %s1176_s29 = smov 128   ;;  %s1663_s0 = inlined_call_operand.vmem [shape: bf16[16,16], index: 0, kind: input, shape index: {}]   ;;  %s1664_s1 = inlined_call_operand.vmem [shape: bf16[16,256], index: 1, kind: input, shape index: {}, may-alias: {1,2}]   ;;  %s1665_s2 = inlined_call_operand.vmem [shape: bf16[16,256], index: 2, kind: input, shape index: {}, may-alias: {1,2}]   ;;  %s1666_s3 = inlined_call_operand.vmem [shape: bf16[512,256], index: 3, kind: input, shape index: {}]   ;;  %s1667_s4 = inlined_call_operand.vmem [shape: f32[1,256], index: 4, kind: input, shape index: {}]   ;;  %s1668_s5 = inlined_call_operand.hbm [shape: f32[256,128], index: 5, kind: input, shape index: {}]   ;;  %s1669_s6 = inlined_call_operand.vmem [shape: f32[16,256], index: 6, kind: output, shape index: {0}]   ;;  %s1670_s7 = inlined_call_operand.vmem [shape: f32[16,128], index: 7, kind: output, shape index: {1}]  }
   0x1   :  { %s28_s26 = sshll.u32 %s1668_s5, 4  ;;  %s30_s28 = sshll.u32 %s1175_s27, 4  ;;  %s29_s26 = int_to_ptr.hbm [resolvable:$true] %s28_s26  ;;  %s31_s28 = int_to_ptr.vmem [resolvable:$true] %s30_s28 }
   0x2   :  { %s1177_s30 = smov 8  }
   0x3   :  { %36 = dma.hbm_to_vmem [thread:$0]  %s29_s26, 4096, %s31_s28, [#allocation5], %s1176_s29, %s1176_s29, %s1177_s30  }
   0x4   :  { %1173 = dma.done.wait [#allocation5], 4096  }
   0x5   :  { %1174 = vsyncadd [#allocation5], 4294963200  ;;  %v769_v0 = vld [vmem:[%s1664_s1] sm:$0xf]  ;;  %v1035_v1 = vld [vmem:[%s1664_s1 + $0x4] sm:$0xf0] }
   0x6   :  { %v1034_v2 = vld [vmem:[%s1664_s1 + $0x4] sm:$0xf]  ;;  %v770_v3 = vor.u32 %v1035_v1, %v769_v0  ;;  %v771_v4 = vld [vmem:[%s1664_s1 + $0x8] sm:$0xf0]  ;;  %vm73_vm0 = vcmask 130048  }
   0x7   :  { %v1033_v5 = vld [vmem:[%s1663_s0] sm:$0xff]  ;;  %v835_v6 = vld [vmem:[%s1666_s3 + $0x70] sm:$0xf]  ;;  %v774_v7 = vor.u32 %v1034_v2, %v771_v4  ;;  %v1051_v8 = vld [vmem:[%s1666_s3 + $0x74] sm:$0xf0] }
   0x8   :  { %v899_v9 = vld [vmem:[%s1666_s3 + $0xf0] sm:$0xf]  ;;  %v1067_v10 = vld [vmem:[%s1666_s3 + $0xf4] sm:$0xf0]  ;;  %84 = vmatpush.bf16.msra.mxu0 %v770_v3  ;;  %v836_v11 = vor.u32 %v1051_v8, %v835_v6  ;;  %v827_v15 = vld [vmem:[%s1666_s3 + $0x60] sm:$0xf] }
   0x9   :  { %v900_v12 = vor.u32 %v1067_v10, %v899_v9  ;;  %v963_v13 = vld [vmem:[%s1666_s3 + $0x170] sm:$0xf]  ;;  %v1083_v14 = vld [vmem:[%s1666_s3 + $0x174] sm:$0xf0]  ;;  %98 = vmatpush.bf16.msra.mxu1 %v774_v7  ;;  %v1049_v17 = vld [vmem:[%s1666_s3 + $0x64] sm:$0xf0] }
   0xa   :  { %v964_v16 = vor.u32 %v1083_v14, %v963_v13  ;;  %v891_v18 = vld [vmem:[%s1666_s3 + $0xe0] sm:$0xf]  ;;  %v1065_v19 = vld [vmem:[%s1666_s3 + $0xe4] sm:$0xf0]  ;;  %536 = vmatpush.bf16.msra.mxu2 %v836_v11  ;;  %v828_v20 = vor.u32 %v1049_v17, %v827_v15  ;;  %v1027_v22 = vld [vmem:[%s1666_s3 + $0x1f0] sm:$0xf] }
   0xb   :  { %550 = vmatpush.bf16.msra.mxu3 %v900_v12  ;;  %v892_v21 = vor.u32 %v1065_v19, %v891_v18  ;;  %v1099_v23 = vld [vmem:[%s1666_s3 + $0x1f4] sm:$0xf0]  ;;  %v955_v24 = vld [vmem:[%s1666_s3 + $0x160] sm:$0xf]  ;;  %775 = vmatmul.msk.bf16.vlgmr.msra.gmra.mxu0 %vm73_vm0, %v1033_v5  ;;  %v1081_v26 = vld [vmem:[%s1666_s3 + $0x164] sm:$0xf0] }
   0xc   :  { %v1028_v25 = vor.u32 %v1099_v23, %v1027_v22  ;;  %v819_v27 = vld [vmem:[%s1666_s3 + $0x50] sm:$0xf]  ;;  %v1047_v28 = vld [vmem:[%s1666_s3 + $0x54] sm:$0xf0]  ;;  %776 = vmatmul.msk.bf16.vlgmr.msra.gmra.mxu1 %vm73_vm0, %v1033_v5  ;;  %564 = vmatpush.bf16.msrb.mxu0 %v964_v16  ;;  %v956_v29 = vor.u32 %v1081_v26, %v955_v24  ;;  %v1019_v32 = vld [vmem:[%s1666_s3 + $0x1e0] sm:$0xf] }
   0xd   :  { %v883_v30 = vld [vmem:[%s1666_s3 + $0xd0] sm:$0xf]  ;;  %v1063_v31 = vld [vmem:[%s1666_s3 + $0xd4] sm:$0xf0]  ;;  %v1097_v33 = vld [vmem:[%s1666_s3 + $0x1e4] sm:$0xf0]  ;;  %v820_v36 = vor.u32 %v1047_v28, %v819_v27 }
   0xe   :  { %578 = vmatpush.bf16.msrb.mxu1 %v1028_v25  ;;  %v947_v34 = vld [vmem:[%s1666_s3 + $0x150] sm:$0xf]  ;;  %v1079_v35 = vld [vmem:[%s1666_s3 + $0x154] sm:$0xf0]  ;;  %537 = vmatpush.bf16.msra.mxu2 %v828_v20  ;;  %v884_v37 = vor.u32 %v1063_v31, %v883_v30  ;;  %v1020_v38 = vor.u32 %v1097_v33, %v1019_v32  ;;  %v811_v39 = vld [vmem:[%s1666_s3 + $0x40] sm:$0xf] }
   0xf   :  { %551 = vmatpush.bf16.msra.mxu3 %v892_v21  ;;  %v1045_v40 = vld [vmem:[%s1666_s3 + $0x44] sm:$0xf0]  ;;  %v875_v41 = vld [vmem:[%s1666_s3 + $0xc0] sm:$0xf]  ;;  %v1011_v43 = vld [vmem:[%s1666_s3 + $0x1d0] sm:$0xf]  ;;  %v948_v45 = vor.u32 %v1079_v35, %v947_v34 }
  0x10   :  { %v1061_v42 = vld [vmem:[%s1666_s3 + $0xc4] sm:$0xf0]  ;;  %v1095_v44 = vld [vmem:[%s1666_s3 + $0x1d4] sm:$0xf0]  ;;  %565 = vmatpush.bf16.msrb.mxu0 %v956_v29  ;;  %v939_v47 = vld [vmem:[%s1666_s3 + $0x140] sm:$0xf]  ;;  %v812_v49 = vor.u32 %v1045_v40, %v811_v39 }
  0x11   :  { %v1012_v46 = vor.u32 %v1095_v44, %v1011_v43  ;;  %v1077_v48 = vld [vmem:[%s1666_s3 + $0x144] sm:$0xf0]  ;;  %v876_v50 = vor.u32 %v1061_v42, %v875_v41  ;;  %v803_v51 = vld [vmem:[%s1666_s3 + $0x30] sm:$0xf]  ;;  %v1003_v52 = vld [vmem:[%s1666_s3 + $0x1c0] sm:$0xf] }
  0x12   :  { %579 = vmatpush.bf16.msrb.mxu1 %v1020_v38  ;;  %538 = vmatpush.bf16.msra.mxu2 %v820_v36  ;;  %v1093_v53 = vld [vmem:[%s1666_s3 + $0x1c4] sm:$0xf0]  ;;  %v1043_v54 = vld [vmem:[%s1666_s3 + $0x34] sm:$0xf0]  ;;  %v867_v55 = vld [vmem:[%s1666_s3 + $0xb0] sm:$0xf]  ;;  %v940_v57 = vor.u32 %v1077_v48, %v939_v47 }
  0x13   :  { %552 = vmatpush.bf16.msra.mxu3 %v884_v37  ;;  %v1059_v56 = vld [vmem:[%s1666_s3 + $0xb4] sm:$0xf0]  ;;  %v1004_v58 = vor.u32 %v1093_v53, %v1003_v52  ;;  %v931_v59 = vld [vmem:[%s1666_s3 + $0x130] sm:$0xf]  ;;  %v804_v61 = vor.u32 %v1043_v54, %v803_v51  ;;  %v795_v63 = vld [vmem:[%s1666_s3 + $0x20] sm:$0xf] }
  0x14   :  { %566 = vmatpush.bf16.msrb.mxu0 %v948_v45  ;;  %v1075_v60 = vld [vmem:[%s1666_s3 + $0x134] sm:$0xf0]  ;;  %v868_v62 = vor.u32 %v1059_v56, %v867_v55  ;;  %v995_v0 = vld [vmem:[%s1666_s3 + $0x1b0] sm:$0xf]  ;;  %v1041_v2 = vld [vmem:[%s1666_s3 + $0x24] sm:$0xf0] }
  0x15   :  { %v1091_v1 = vld [vmem:[%s1666_s3 + $0x1b4] sm:$0xf0]  ;;  %v859_v3 = vld [vmem:[%s1666_s3 + $0xa0] sm:$0xf]  ;;  %v1057_v4 = vld [vmem:[%s1666_s3 + $0xa4] sm:$0xf0]  ;;  %v932_v5 = vor.u32 %v1075_v60, %v931_v59  ;;  %v796_v9 = vor.u32 %v1041_v2, %v795_v63 }
  0x16   :  { %580 = vmatpush.bf16.msrb.mxu1 %v1012_v46  ;;  %539 = vmatpush.bf16.msra.mxu2 %v812_v49  ;;  %v996_v6 = vor.u32 %v1091_v1, %v995_v0  ;;  %v923_v7 = vld [vmem:[%s1666_s3 + $0x120] sm:$0xf]  ;;  %v1073_v8 = vld [vmem:[%s1666_s3 + $0x124] sm:$0xf0]  ;;  %v860_v10 = vor.u32 %v1057_v4, %v859_v3  ;;  %v787_v11 = vld [vmem:[%s1666_s3 + $0x10] sm:$0xf] }
  0x17   :  { %553 = vmatpush.bf16.msra.mxu3 %v876_v50  ;;  %v987_v12 = vld [vmem:[%s1666_s3 + $0x1a0] sm:$0xf]  ;;  %v1089_v13 = vld [vmem:[%s1666_s3 + $0x1a4] sm:$0xf0]  ;;  %v1039_v14 = vld [vmem:[%s1666_s3 + $0x14] sm:$0xf0]  ;;  %v924_v17 = vor.u32 %v1073_v8, %v923_v7 }
  0x18   :  { %567 = vmatpush.bf16.msrb.mxu0 %v940_v57  ;;  %v851_v15 = vld [vmem:[%s1666_s3 + $0x90] sm:$0xf]  ;;  %v1055_v16 = vld [vmem:[%s1666_s3 + $0x94] sm:$0xf0]  ;;  %v988_v18 = vor.u32 %v1089_v13, %v987_v12  ;;  %v779_v21 = vld [vmem:[%s1666_s3] sm:$0xf]  ;;  %v788_v22 = vor.u32 %v1039_v14, %v787_v11 }
  0x19   :  { %v915_v19 = vld [vmem:[%s1666_s3 + $0x110] sm:$0xf]  ;;  %v1071_v20 = vld [vmem:[%s1666_s3 + $0x114] sm:$0xf0]  ;;  %v852_v23 = vor.u32 %v1055_v16, %v851_v15  ;;  %v1037_v24 = vld [vmem:[%s1666_s3 + $0x4] sm:$0xf0] }
  0x1a   :  { %581 = vmatpush.bf16.msrb.mxu1 %v1004_v58  ;;  %540 = vmatpush.bf16.msra.mxu2 %v804_v61  ;;  %v979_v25 = vld [vmem:[%s1666_s3 + $0x190] sm:$0xf]  ;;  %v1087_v26 = vld [vmem:[%s1666_s3 + $0x194] sm:$0xf0]  ;;  %v843_v27 = vld [vmem:[%s1666_s3 + $0x80] sm:$0xf]  ;;  %v916_v30 = vor.u32 %v1071_v20, %v915_v19  ;;  %v780_v38 = vor.u32 %v1037_v24, %v779_v21 }
  0x1b   :  { %554 = vmatpush.bf16.msra.mxu3 %v868_v62  ;;  %v1053_v28 = vld [vmem:[%s1666_s3 + $0x84] sm:$0xf0]  ;;  %v1050_v29 = vld [vmem:[%s1666_s3 + $0x74] sm:$0xf]  ;;  %v837_v31 = vld [vmem:[%s1666_s3 + $0x78] sm:$0xf0]  ;;  %v980_v34 = vor.u32 %v1087_v26, %v979_v25 }
  0x1c   :  { %568 = vmatpush.bf16.msrb.mxu0 %v932_v5  ;;  %v1066_v32 = vld [vmem:[%s1666_s3 + $0xf4] sm:$0xf]  ;;  %v901_v33 = vld [vmem:[%s1666_s3 + $0xf8] sm:$0xf0]  ;;  %v907_v35 = vld [vmem:[%s1666_s3 + $0x100] sm:$0xf]  ;;  %v844_v39 = vor.u32 %v1053_v28, %v843_v27  ;;  %v840_v43 = vor.u32 %v1050_v29, %v837_v31 }
  0x1d   :  { %v1069_v36 = vld [vmem:[%s1666_s3 + $0x104] sm:$0xf0]  ;;  %v1082_v37 = vld [vmem:[%s1666_s3 + $0x174] sm:$0xf]  ;;  %v965_v40 = vld [vmem:[%s1666_s3 + $0x178] sm:$0xf0]  ;;  %v904_v44 = vor.u32 %v1066_v32, %v901_v33 }
  0x1e   :  { %582 = vmatpush.bf16.msrb.mxu1 %v996_v6  ;;  %541 = vmatpush.bf16.msra.mxu2 %v796_v9  ;;  %v971_v41 = vld [vmem:[%s1666_s3 + $0x180] sm:$0xf]  ;;  %v1085_v42 = vld [vmem:[%s1666_s3 + $0x184] sm:$0xf0]  ;;  %v908_v45 = vor.u32 %v1069_v36, %v907_v35  ;;  %v968_v46 = vor.u32 %v1082_v37, %v965_v40  ;;  %v1048_v48 = vld [vmem:[%s1666_s3 + $0x64] sm:$0xf] }
  0x1f   :  { %555 = vmatpush.bf16.msra.mxu3 %v860_v10  ;;  %v972_v47 = vor.u32 %v1085_v42, %v971_v41  ;;  %v829_v49 = vld [vmem:[%s1666_s3 + $0x68] sm:$0xf0]  ;;  %v1064_v50 = vld [vmem:[%s1666_s3 + $0xe4] sm:$0xf]  ;;  %v1098_v53 = vld [vmem:[%s1666_s3 + $0x1f4] sm:$0xf] }
  0x20   :  { %569 = vmatpush.bf16.msrb.mxu0 %v924_v17  ;;  %v832_v51 = vor.u32 %v1048_v48, %v829_v49  ;;  %v893_v52 = vld [vmem:[%s1666_s3 + $0xe8] sm:$0xf0]  ;;  %v1029_v54 = vld [vmem:[%s1666_s3 + $0x1f8] sm:$0xf0]  ;;  %v1080_v57 = vld [vmem:[%s1666_s3 + $0x164] sm:$0xf] }
  0x21   :  { %v896_v55 = vor.u32 %v1064_v50, %v893_v52  ;;  %v1032_v56 = vor.u32 %v1098_v53, %v1029_v54  ;;  %v957_v58 = vld [vmem:[%s1666_s3 + $0x168] sm:$0xf0]  ;;  %v1046_v60 = vld [vmem:[%s1666_s3 + $0x54] sm:$0xf]  ;;  %v821_v61 = vld [vmem:[%s1666_s3 + $0x58] sm:$0xf0] }
  0x22   :  { %583 = vmatpush.bf16.msrb.mxu1 %v988_v18  ;;  %542 = vmatpush.bf16.msra.mxu2 %v788_v22  ;;  %v960_v59 = vor.u32 %v1080_v57, %v957_v58  ;;  %v1062_v62 = vld [vmem:[%s1666_s3 + $0xd4] sm:$0xf]  ;;  %v824_v63 = vor.u32 %v1046_v60, %v821_v61  ;;  %v885_v0 = vld [vmem:[%s1666_s3 + $0xd8] sm:$0xf0]  ;;  %v1096_v1 = vld [vmem:[%s1666_s3 + $0x1e4] sm:$0xf] }
  0x23   :  { %556 = vmatpush.bf16.msra.mxu3 %v852_v23  ;;  %v1021_v2 = vld [vmem:[%s1666_s3 + $0x1e8] sm:$0xf0]  ;;  %v888_v3 = vor.u32 %v1062_v62, %v885_v0  ;;  %v1078_v5 = vld [vmem:[%s1666_s3 + $0x154] sm:$0xf]  ;;  %v949_v6 = vld [vmem:[%s1666_s3 + $0x158] sm:$0xf0] }
  0x24   :  { %570 = vmatpush.bf16.msrb.mxu0 %v916_v30  ;;  %v1024_v4 = vor.u32 %v1096_v1, %v1021_v2  ;;  %v952_v7 = vor.u32 %v1078_v5, %v949_v6  ;;  %v1044_v8 = vld [vmem:[%s1666_s3 + $0x44] sm:$0xf]  ;;  %v813_v9 = vld [vmem:[%s1666_s3 + $0x48] sm:$0xf0]  ;;  %v1094_v13 = vld [vmem:[%s1666_s3 + $0x1d4] sm:$0xf] }
  0x25   :  { %v1060_v10 = vld [vmem:[%s1666_s3 + $0xc4] sm:$0xf]  ;;  %v816_v11 = vor.u32 %v1044_v8, %v813_v9  ;;  %v877_v12 = vld [vmem:[%s1666_s3 + $0xc8] sm:$0xf0]  ;;  %v1013_v14 = vld [vmem:[%s1666_s3 + $0x1d8] sm:$0xf0] }
  0x26   :  { %584 = vmatpush.bf16.msrb.mxu1 %v980_v34  ;;  %543 = vmatpush.bf16.msra.mxu2 %v780_v38  ;;  %v880_v15 = vor.u32 %v1060_v10, %v877_v12  ;;  %v1016_v16 = vor.u32 %v1094_v13, %v1013_v14  ;;  %v1076_v17 = vld [vmem:[%s1666_s3 + $0x144] sm:$0xf]  ;;  %v941_v18 = vld [vmem:[%s1666_s3 + $0x148] sm:$0xf0]  ;;  %v1042_v20 = vld [vmem:[%s1666_s3 + $0x34] sm:$0xf] }
  0x27   :  { %557 = vmatpush.bf16.msra.mxu3 %v844_v39  ;;  %v944_v19 = vor.u32 %v1076_v17, %v941_v18  ;;  %v805_v21 = vld [vmem:[%s1666_s3 + $0x38] sm:$0xf0]  ;;  %v1058_v22 = vld [vmem:[%s1666_s3 + $0xb4] sm:$0xf]  ;;  %v1092_v25 = vld [vmem:[%s1666_s3 + $0x1c4] sm:$0xf] }
  0x28   :  { %571 = vmatpush.bf16.msrb.mxu0 %v908_v45  ;;  %v808_v23 = vor.u32 %v1042_v20, %v805_v21  ;;  %v869_v24 = vld [vmem:[%s1666_s3 + $0xb8] sm:$0xf0]  ;;  %v1005_v26 = vld [vmem:[%s1666_s3 + $0x1c8] sm:$0xf0]  ;;  %v1102_v29 = vld [vmem:[%s1665_s2] sm:$0xf] }
  0x29   :  { %v872_v27 = vor.u32 %v1058_v22, %v869_v24  ;;  %v1008_v28 = vor.u32 %v1092_v25, %v1005_v26  ;;  %v1141_v30 = vld [vmem:[%s1665_s2 + $0x4] sm:$0xf0]  ;;  %v1074_v31 = vld [vmem:[%s1666_s3 + $0x134] sm:$0xf]  ;;  %v933_v33 = vld [vmem:[%s1666_s3 + $0x138] sm:$0xf0] }
  0x2a   :  { %592 = vmatpush.bf16.msrb.mxu2 %v840_v43  ;;  %585 = vmatpush.bf16.msrb.mxu1 %v972_v47  ;;  %v1547_v32 = vor.u32 %v1141_v30, %v1102_v29  ;;  %v1140_v34 = vld [vmem:[%s1665_s2 + $0x4] sm:$0xf]  ;;  %v1104_v35 = vld [vmem:[%s1665_s2 + $0x8] sm:$0xf0]  ;;  %v936_v36 = vor.u32 %v1074_v31, %v933_v33  ;;  %v1090_v43 = vld [vmem:[%s1666_s3 + $0x1b4] sm:$0xf] }
  0x2b   :  { %606 = vmatpush.bf16.msrb.mxu3 %v904_v44  ;;  %v1558_v37 = vor.u32 %v1140_v34, %v1104_v35  ;;  %v1040_v38 = vld [vmem:[%s1666_s3 + $0x24] sm:$0xf]  ;;  %v797_v39 = vld [vmem:[%s1666_s3 + $0x28] sm:$0xf0]  ;;  %v997_v44 = vld [vmem:[%s1666_s3 + $0x1b8] sm:$0xf0] }
  0x2c   :  { %620 = vmatpush.bf16.msra.mxu0 %v968_v46  ;;  %v1056_v40 = vld [vmem:[%s1666_s3 + $0xa4] sm:$0xf]  ;;  %v800_v41 = vor.u32 %v1040_v38, %v797_v39  ;;  %v861_v42 = vld [vmem:[%s1666_s3 + $0xa8] sm:$0xf0]  ;;  %v1000_v46 = vor.u32 %v1090_v43, %v997_v44  ;;  %v1038_v49 = vld [vmem:[%s1666_s3 + $0x14] sm:$0xf] }
  0x2d   :  { %572 = vmatmul.bf16.vlgmr.msrb.gmra.mxu0 %v1547_v32  ;;  %586 = vmatmul.bf16.vlgmr.msrb.gmra.mxu1 %v1558_v37  ;;  %v864_v45 = vor.u32 %v1056_v40, %v861_v42  ;;  %v1072_v47 = vld [vmem:[%s1666_s3 + $0x124] sm:$0xf]  ;;  %v925_v48 = vld [vmem:[%s1666_s3 + $0x128] sm:$0xf0]  ;;  %v1054_v52 = vld [vmem:[%s1666_s3 + $0x94] sm:$0xf] }
  0x2e   :  { %593 = vmatpush.bf16.msrb.mxu2 %v832_v51  ;;  %634 = vmatpush.bf16.msra.mxu1 %v1032_v56  ;;  %v928_v50 = vor.u32 %v1072_v47, %v925_v48  ;;  %v789_v51 = vld [vmem:[%s1666_s3 + $0x18] sm:$0xf0]  ;;  %v1088_v56 = vld [vmem:[%s1666_s3 + $0x1a4] sm:$0xf]  ;;  %v989_v57 = vld [vmem:[%s1666_s3 + $0x1a8] sm:$0xf0] }
  0x2f   :  { %607 = vmatpush.bf16.msrb.mxu3 %v896_v55  ;;  %v853_v53 = vld [vmem:[%s1666_s3 + $0x98] sm:$0xf0]  ;;  %v792_v54 = vor.u32 %v1038_v49, %v789_v51  ;;  %v1070_v58 = vld [vmem:[%s1666_s3 + $0x114] sm:$0xf]  ;;  %v1036_v61 = vld [vmem:[%s1666_s3 + $0x4] sm:$0xf] }
  0x30   :  { %621 = vmatpush.bf16.msra.mxu0 %v960_v59  ;;  %v856_v55 = vor.u32 %v1054_v52, %v853_v53  ;;  %v992_v59 = vor.u32 %v1088_v56, %v989_v57  ;;  %v917_v60 = vld [vmem:[%s1666_s3 + $0x118] sm:$0xf0]  ;;  %v781_v62 = vld [vmem:[%s1666_s3 + $0x8] sm:$0xf0]  ;;  %v1052_v0 = vld [vmem:[%s1666_s3 + $0x84] sm:$0xf] }
  0x31   :  { %v845_v1 = vld [vmem:[%s1666_s3 + $0x88] sm:$0xf0]  ;;  %v1086_v2 = vld [vmem:[%s1666_s3 + $0x194] sm:$0xf]  ;;  %v1068_v5 = vld [vmem:[%s1666_s3 + $0x104] sm:$0xf] }
  0x32   :  { %594 = vmatpush.bf16.msrb.mxu2 %v824_v63  ;;  %635 = vmatpush.bf16.msra.mxu1 %v1024_v4  ;;  %v920_v63 = vor.u32 %v1070_v58, %v917_v60  ;;  %v981_v4 = vld [vmem:[%s1666_s3 + $0x198] sm:$0xf0]  ;;  %v909_v6 = vld [vmem:[%s1666_s3 + $0x108] sm:$0xf0]  ;;  %v1084_v10 = vld [vmem:[%s1666_s3 + $0x184] sm:$0xf] }
  0x33   :  { %608 = vmatpush.bf16.msrb.mxu3 %v888_v3  ;;  %v784_v3 = vor.u32 %v1036_v61, %v781_v62  ;;  %v984_v8 = vor.u32 %v1086_v2, %v981_v4  ;;  %v912_v9 = vor.u32 %v1068_v5, %v909_v6  ;;  %v687_v13 = vld [vmem:[#allocation4 + $0x78] sm:$0xff]  ;;  %v686_v14 = vld [vmem:[#allocation4 + $0x70] sm:$0xff]  ;;  %v684_v18 = vld [vmem:[#allocation4 + $0x60] sm:$0xff] }
  0x34   :  { %622 = vmatpush.bf16.msra.mxu0 %v952_v7  ;;  %v848_v7 = vor.u32 %v1052_v0, %v845_v1  ;;  %v682_v20 = vld [vmem:[#allocation4 + $0x50] sm:$0xff]  ;;  %v681_v21 = vld [vmem:[#allocation4 + $0x48] sm:$0xff]  ;;  %v680_v26 = vld [vmem:[#allocation4 + $0x40] sm:$0xff] }
  0x35   :  { %v678_v29 = vld [vmem:[#allocation4 + $0x30] sm:$0xff]  ;;  %v677_v31 = vld [vmem:[#allocation4 + $0x28] sm:$0xff]  ;;  %v676_v33 = vld [vmem:[#allocation4 + $0x20] sm:$0xff] }
  0x36   :  { %595 = vmatpush.bf16.msrb.mxu2 %v816_v11  ;;  %636 = vmatpush.bf16.msra.mxu1 %v1016_v16  ;;  %v973_v11 = vld [vmem:[%s1666_s3 + $0x188] sm:$0xf0]  ;;  %v702_v30 = vld [vmem:[#allocation4 + $0xf0] sm:$0xff]  ;;  %v700_v34 = vld [vmem:[#allocation4 + $0xe0] sm:$0xff] }
  0x37   :  { %609 = vmatpush.bf16.msrb.mxu3 %v880_v15  ;;  %v976_v12 = vor.u32 %v1084_v10, %v973_v11  ;;  %v685_v15 = vld [vmem:[#allocation4 + $0x68] sm:$0xff]  ;;  %v675_v35 = vld [vmem:[#allocation4 + $0x18] sm:$0xff]  ;;  %v698_v38 = vld [vmem:[#allocation4 + $0xd0] sm:$0xff] }
  0x38   :  { %623 = vmatpush.bf16.msra.mxu0 %v944_v19  ;;  %v683_v19 = vld [vmem:[#allocation4 + $0x58] sm:$0xff]  ;;  %v673_v39 = vld [vmem:[#allocation4 + $0x8] sm:$0xff]  ;;  %v696_v42 = vld [vmem:[#allocation4 + $0xc0] sm:$0xff] }
  0x39   :  { %v697_v40 = vld [vmem:[#allocation4 + $0xc8] sm:$0xff]  ;;  %v695_v43 = vld [vmem:[#allocation4 + $0xb8] sm:$0xff]  ;;  %v694_v44 = vld [vmem:[#allocation4 + $0xb0] sm:$0xff] }
  0x3a   :  { %596 = vmatpush.bf16.msrb.mxu2 %v808_v23  ;;  %637 = vmatpush.bf16.msra.mxu1 %v1008_v28  ;;  %v703_v28 = vld [vmem:[#allocation4 + $0xf8] sm:$0xff]  ;;  %v690_v48 = vld [vmem:[#allocation4 + $0x90] sm:$0xff]  ;;  %v210_v49 = vld [vmem:[%s1667_s4] sm:$0x3] }
  0x3b   :  { %610 = vmatpush.bf16.msrb.mxu3 %v872_v27  ;;  %v679_v27 = vld [vmem:[#allocation4 + $0x38] sm:$0xff]  ;;  %v212_v51 = vperm.slane %v210_v49, 0  ;;  %v688_v52 = vld [vmem:[#allocation4 + $0x80] sm:$0xff] }
  0x3c   :  { %624 = vmatpush.bf16.msra.mxu0 %v936_v36  ;;  %v699_v36 = vld [vmem:[#allocation4 + $0xd8] sm:$0xff] }
  0x3d   :  { %v691_v47 = vld [vmem:[#allocation4 + $0x98] sm:$0xff] }
  0x3e   :  { %597 = vmatpush.bf16.msrb.mxu2 %v800_v41  ;;  %638 = vmatpush.bf16.msra.mxu1 %v1000_v46  ;;  %v672_v41 = vld [vmem:[#allocation4] sm:$0xff] }
  0x3f   :  { %611 = vmatpush.bf16.msrb.mxu3 %v864_v45  ;;  %v693_v45 = vld [vmem:[#allocation4 + $0xa8] sm:$0xff]  ;;  %v692_v46 = vld [vmem:[#allocation4 + $0xa0] sm:$0xff] }
  0x40   :  { %625 = vmatpush.bf16.msra.mxu0 %v928_v50  ;;  %v689_v50 = vld [vmem:[#allocation4 + $0x88] sm:$0xff] }
  0x42   :  { %598 = vmatpush.bf16.msrb.mxu2 %v792_v54  ;;  %639 = vmatpush.bf16.msra.mxu1 %v992_v59 }
  0x43   :  { %612 = vmatpush.bf16.msrb.mxu3 %v856_v55 }
  0x44   :  { %626 = vmatpush.bf16.msra.mxu0 %v920_v63 }
  0x46   :  { %599 = vmatpush.bf16.msrb.mxu2 %v784_v3  ;;  %640 = vmatpush.bf16.msra.mxu1 %v984_v8  ;;  %v213_v8 = vperm.slane %v210_v49, 1 }
  0x47   :  { %613 = vmatpush.bf16.msrb.mxu3 %v848_v7 }
  0x48   :  { %627 = vmatpush.bf16.msra.mxu0 %v912_v9 }
  0x4a   :  { %641 = vmatpush.bf16.msra.mxu1 %v976_v12 }
  0x4b   :  { %628 = vmatmul.bf16.vlgmr.msra.gmra.mxu0 %v1547_v32  ;;  %v701_v32 = vld [vmem:[#allocation4 + $0xe8] sm:$0xff] }
  0x4c   :  { %704 = vmatpush.msrb.mxu0 %v687_v13 }
  0x4d   :  { %642 = vmatmul.bf16.vlgmr.msra.gmra.mxu1 %v1558_v37  ;;  %v674_v37 = vld [vmem:[#allocation4 + $0x10] sm:$0xff] }
  0x4e   :  { %705 = vmatpush.msrb.mxu0 %v686_v14  ;;  %727 = vmatpush.msrb.mxu1 %v703_v28 }
  0x50   :  { %706 = vmatpush.msrb.mxu0 %v685_v15  ;;  %728 = vmatpush.msrb.mxu1 %v702_v30 }
  0x52   :  { %707 = vmatpush.msrb.mxu0 %v684_v18  ;;  %729 = vmatpush.msrb.mxu1 %v701_v32 }
  0x54   :  { %708 = vmatpush.msrb.mxu0 %v683_v19  ;;  %730 = vmatpush.msrb.mxu1 %v700_v34 }
  0x56   :  { %709 = vmatpush.msrb.mxu0 %v682_v20  ;;  %731 = vmatpush.msrb.mxu1 %v699_v36 }
  0x58   :  { %710 = vmatpush.msrb.mxu0 %v681_v21  ;;  %732 = vmatpush.msrb.mxu1 %v698_v38 }
  0x5a   :  { %711 = vmatpush.msrb.mxu0 %v680_v26  ;;  %733 = vmatpush.msrb.mxu1 %v697_v40 }
  0x5c   :  { %712 = vmatpush.msrb.mxu0 %v679_v27  ;;  %734 = vmatpush.msrb.mxu1 %v696_v42 }
  0x5e   :  { %713 = vmatpush.msrb.mxu0 %v678_v29  ;;  %735 = vmatpush.msrb.mxu1 %v695_v43 }
  0x60   :  { %714 = vmatpush.msrb.mxu0 %v677_v31  ;;  %736 = vmatpush.msrb.mxu1 %v694_v44 }
  0x62   :  { %715 = vmatpush.msrb.mxu0 %v676_v33  ;;  %737 = vmatpush.msrb.mxu1 %v693_v45 }
  0x64   :  { %716 = vmatpush.msrb.mxu0 %v675_v35  ;;  %738 = vmatpush.msrb.mxu1 %v692_v46 }
  0x66   :  { %717 = vmatpush.msrb.mxu0 %v674_v37  ;;  %739 = vmatpush.msrb.mxu1 %v691_v47 }
  0x68   :  { %718 = vmatpush.msrb.mxu0 %v673_v39  ;;  %740 = vmatpush.msrb.mxu1 %v690_v48 }
  0x6a   :  { %719 = vmatpush.msrb.mxu0 %v672_v41  ;;  %741 = vmatpush.msrb.mxu1 %v689_v50 }
  0x6c   :  { %742 = vmatpush.msrb.mxu1 %v688_v52 }
  0x88   :  { %v86_v16 = vpop.f32.mrf.mxu0 }
  0x89   :  { %v100_v17 = vpop.f32.mrf.mxu1 }
  0x90   :  { %v88_v22 = vpop.f32.mrf.mxu0 }
  0x91   :  { %v142_v23 = vpack.c.bf16 %v88_v22, %v86_v16  ;;  %v102_v24 = vpop.f32.mrf.mxu1 }
  0x92   :  { %v143_v25 = vpack.c.bf16 %v102_v24, %v100_v17 }
  0x93   :  { %544 = vmatmul.bf16.vlgmr.msra.gmra.mxu2 %v142_v23 }
  0x94   :  { %558 = vmatmul.bf16.vlgmr.msra.gmra.mxu3 %v143_v25  ;;  %1108 = vmatpush.msra.mxu2 %v687_v13 }
  0x95   :  { %1124 = vmatpush.msra.mxu3 %v703_v28 }
  0x96   :  { %1109 = vmatpush.msra.mxu2 %v686_v14 }
  0x97   :  { %1125 = vmatpush.msra.mxu3 %v702_v30 }
  0x98   :  { %1110 = vmatpush.msra.mxu2 %v685_v15 }
  0x99   :  { %1126 = vmatpush.msra.mxu3 %v701_v32 }
  0x9a   :  { %1111 = vmatpush.msra.mxu2 %v684_v18 }
  0x9b   :  { %1127 = vmatpush.msra.mxu3 %v700_v34 }
  0x9c   :  { %1112 = vmatpush.msra.mxu2 %v683_v19 }
  0x9d   :  { %1128 = vmatpush.msra.mxu3 %v699_v36 }
  0x9e   :  { %1113 = vmatpush.msra.mxu2 %v682_v20 }
  0x9f   :  { %1129 = vmatpush.msra.mxu3 %v698_v38 }
  0xa0   :  { %1114 = vmatpush.msra.mxu2 %v681_v21 }
  0xa1   :  { %1130 = vmatpush.msra.mxu3 %v697_v40 }
  0xa2   :  { %1115 = vmatpush.msra.mxu2 %v680_v26 }
  0xa3   :  { %600 = vmatmul.bf16.vlgmr.msrb.gmra.mxu2 %v142_v23  ;;  %1131 = vmatpush.msra.mxu3 %v696_v42 }
  0xa4   :  { %614 = vmatmul.bf16.vlgmr.msrb.gmra.mxu3 %v143_v25  ;;  %1116 = vmatpush.msra.mxu2 %v679_v27 }
  0xa5   :  { %1132 = vmatpush.msra.mxu3 %v695_v43 }
  0xa6   :  { %1117 = vmatpush.msra.mxu2 %v678_v29 }
  0xa7   :  { %1133 = vmatpush.msra.mxu3 %v694_v44 }
  0xa8   :  { %1118 = vmatpush.msra.mxu2 %v677_v31 }
  0xa9   :  { %1134 = vmatpush.msra.mxu3 %v693_v45 }
  0xaa   :  { %1119 = vmatpush.msra.mxu2 %v676_v33  ;;  %v573_v53 = vpop.f32.mrf.mxu0  ;;  %v587_v54 = vpop.f32.mrf.mxu1 }
  0xab   :  { %1135 = vmatpush.msra.mxu3 %v692_v46 }
  0xac   :  { %1120 = vmatpush.msra.mxu2 %v675_v35 }
  0xad   :  { %1136 = vmatpush.msra.mxu3 %v691_v47 }
  0xae   :  { %1121 = vmatpush.msra.mxu2 %v674_v37 }
  0xaf   :  { %1137 = vmatpush.msra.mxu3 %v690_v48 }
  0xb0   :  { %1122 = vmatpush.msra.mxu2 %v673_v39 }
  0xb1   :  { %1138 = vmatpush.msra.mxu3 %v689_v50 }
  0xb2   :  { %1123 = vmatpush.msra.mxu2 %v672_v41  ;;  %v575_v61 = vpop.f32.mrf.mxu0  ;;  %v589_v2 = vpop.f32.mrf.mxu1 }
  0xb3   :  { %1139 = vmatpush.msra.mxu3 %v688_v52 }
  0xc8   :  { %v629_v14 = vpop.f32.mrf.mxu0 }
  0xca   :  { %v643_v18 = vpop.f32.mrf.mxu1 }
  0xd0   :  { %v631_v29 = vpop.f32.mrf.mxu0 }
  0xd2   :  { %v645_v32 = vpop.f32.mrf.mxu1 }
 0x116   :  { %v545_v55 = vpop.f32.mrf.mxu2 }
 0x117   :  { %v546_v56 = vadd.f32 %v545_v55, %v212_v51  ;;  %v559_v57 = vpop.f32.mrf.mxu3 }
 0x119   :  { %v560_v58 = vadd.f32 %v559_v57, %v546_v56 }
 0x11b   :  { %v574_v59 = vadd.f32 %v573_v53, %v560_v58 }
 0x11d   :  { %v588_v60 = vadd.f32 %v587_v54, %v574_v59 }
 0x11e   :  { %v547_v62 = vpop.f32.mrf.mxu2 }
 0x11f   :  { %v648_v63 = vmax.f32 %v588_v60, 0.0  ;;  %v548_v0 = vadd.f32 %v547_v62, %v212_v51  ;;  %v561_v1 = vpop.f32.mrf.mxu3 }
 0x121   :  { %652 = vst [vmem:[%s1669_s6] sm:$0xff] %v648_v63  ;;  %v562_v3 = vadd.f32 %v561_v1, %v548_v0  ;;  %vm656_vm1 = vcmp.lt.f32.partialorder %v648_v63, 0.0  ;;  %v660_v4 = vceil.f32 %v648_v63  ;;  %v664_v5 = vfloor.f32 %v648_v63 }
 0x123   :  { %v576_v6 = vadd.f32 %v575_v61, %v562_v3  ;;  %v668_v7 = vsel %vm656_vm1, %v660_v4, %v664_v5 }
 0x124   :  { %720 = vmatmul.f32.vlgmr.msrb.gmra.mxu0 %v668_v7 }
 0x125   :  { %v590_v9 = vadd.f32 %v589_v2, %v576_v6 }
 0x126   :  { %v601_v10 = vpop.f32.mrf.mxu2 }
 0x127   :  { %v650_v11 = vmax.f32 %v590_v9, 0.0  ;;  %v602_v12 = vadd.f32 %v601_v10, %v213_v8  ;;  %v615_v13 = vpop.f32.mrf.mxu3 }
 0x129   :  { %654 = vst [vmem:[%s1669_s6 + $0x10] sm:$0xff] %v650_v11  ;;  %v616_v15 = vadd.f32 %v615_v13, %v602_v12  ;;  %vm658_vm2 = vcmp.lt.f32.partialorder %v650_v11, 0.0  ;;  %v662_v16 = vceil.f32 %v650_v11  ;;  %v666_v17 = vfloor.f32 %v650_v11 }
 0x12b   :  { %v630_v19 = vadd.f32 %v629_v14, %v616_v15  ;;  %v670_v20 = vsel %vm658_vm2, %v662_v16, %v666_v17 }
 0x12c   :  { %723 = vmatmul.f32.vlgmr.msra.gmra.mxu2 %v670_v20 }
 0x12d   :  { %v644_v21 = vadd.f32 %v643_v18, %v630_v19 }
 0x12e   :  { %v603_v22 = vpop.f32.mrf.mxu2 }
 0x12f   :  { %v649_v23 = vmax.f32 %v644_v21, 0.0  ;;  %v604_v24 = vadd.f32 %v603_v22, %v213_v8  ;;  %v617_v25 = vpop.f32.mrf.mxu3 }
 0x131   :  { %653 = vst [vmem:[%s1669_s6 + $0x8] sm:$0xff] %v649_v23  ;;  %v618_v26 = vadd.f32 %v617_v25, %v604_v24  ;;  %vm657_vm3 = vcmp.lt.f32.partialorder %v649_v23, 0.0  ;;  %v661_v27 = vceil.f32 %v649_v23  ;;  %v665_v28 = vfloor.f32 %v649_v23 }
 0x133   :  { %v632_v30 = vadd.f32 %v631_v29, %v618_v26  ;;  %v669_v31 = vsel %vm657_vm3, %v661_v27, %v665_v28 }
 0x134   :  { %743 = vmatmul.f32.vlgmr.msrb.gmra.mxu1 %v669_v31 }
 0x135   :  { %v646_v33 = vadd.f32 %v645_v32, %v632_v30 }
 0x137   :  { %v651_v34 = vmax.f32 %v646_v33, 0.0 }
 0x139   :  { %655 = vst [vmem:[%s1669_s6 + $0x18] sm:$0xff] %v651_v34  ;;  %vm659_vm4 = vcmp.lt.f32.partialorder %v651_v34, 0.0  ;;  %v663_v35 = vceil.f32 %v651_v34  ;;  %v667_v36 = vfloor.f32 %v651_v34 }
 0x13b   :  { %v671_v37 = vsel %vm659_vm4, %v663_v35, %v667_v36 }
 0x13c   :  { %746 = vmatmul.f32.vlgmr.msra.gmra.mxu3 %v671_v37 }
 0x1a1   :  { %v721_v38 = vpop.f32.mrf.mxu0 }
 0x1af   :  { %v724_v42 = vpop.f32.mrf.mxu2 }
 0x1b1   :  { %v744_v39 = vpop.f32.mrf.mxu1 }
 0x1b2   :  { %v745_v40 = vadd.f32 %v744_v39, %v721_v38 }
 0x1b4   :  { %1145 = vtanh.f32 %v745_v40 }
 0x1ba   :  { %v1146_v41 = vpop.eup %1145 }
 0x1bb   :  { %752 = vst [vmem:[%s1670_s7] sm:$0xff] %v1146_v41 }
 0x1bf   :  { %v747_v43 = vpop.f32.mrf.mxu3 }
 0x1c0   :  { %v748_v44 = vadd.f32 %v747_v43, %v724_v42 }
 0x1c2   :  { %1147 = vtanh.f32 %v748_v44 }
 0x1c8   :  { %v1148_v45 = vpop.eup %1147 }
 0x1c9   :  { %753 = vst [vmem:[%s1670_s7 + $0x8] sm:$0xff] %v1148_v45 }
 0x1ca   :  { %762 = vsyncpa [#allocation5], 1 }

// kernel: net_forward.5
= control target key start
LH: loop header
LB: loop body
LE: loop exit
PB: predicated region body
PF: predicated region fallthrough
CT: control target
= control target key end

     0   :  { %vm70_vm0 = vcmask 130048   ;;  %vm758_vm11 = vcmask 1040384   ;;  %vm717_vm13 = vcmask 1041408   ;;  %s1727_s1 = inlined_call_operand.vmem [shape: bf16[16,256], index: 1, kind: input, shape index: {}, may-alias: {1,2}]   ;;  %s1728_s0 = inlined_call_operand.vmem [shape: bf16[16,16], index: 0, kind: input, shape index: {}]   ;;  %s1729_s3 = inlined_call_operand.vmem [shape: bf16[512,256], index: 3, kind: input, shape index: {}]   ;;  %s1730_s2 = inlined_call_operand.vmem [shape: bf16[16,256], index: 2, kind: input, shape index: {}, may-alias: {1,2}]   ;;  %s1731_s6 = inlined_call_operand.vmem [shape: f32[16,2], index: 6, kind: input, shape index: {}]   ;;  %s1732_s4 = inlined_call_operand.vmem [shape: f32[1,256], index: 4, kind: input, shape index: {}]   ;;  %s1733_s5 = inlined_call_operand.vmem [shape: f32[2,16], index: 5, kind: input, shape index: {}]   ;;  %s1734_s7 = inlined_call_operand.vmem [shape: f32[2,1], index: 7, kind: input, shape index: {}]   ;;  %s1735_s8 = inlined_call_operand.vmem [shape: bf16[16,256], index: 8, kind: output, shape index: {0}]   ;;  %s1736_s9 = inlined_call_operand.vmem [shape: f32[2,512], index: 9, kind: output, shape index: {1}]  }
   0x1   :  { %v851_v0 = vld [vmem:[%s1727_s1] sm:$0xf]  ;;  %v1119_v1 = vld [vmem:[%s1727_s1 + $0x4] sm:$0xf0]  ;;  %v1118_v2 = vld [vmem:[%s1727_s1 + $0x4] sm:$0xf] }
   0x2   :  { %v852_v3 = vor.u32 %v1119_v1, %v851_v0  ;;  %v853_v4 = vld [vmem:[%s1727_s1 + $0x8] sm:$0xf0]  ;;  %v1117_v5 = vld [vmem:[%s1728_s0] sm:$0xff]  ;;  %v917_v6 = vld [vmem:[%s1729_s3 + $0x70] sm:$0xf] }
   0x3   :  { %v856_v7 = vor.u32 %v1118_v2, %v853_v4  ;;  %v1135_v8 = vld [vmem:[%s1729_s3 + $0x74] sm:$0xf0]  ;;  %v981_v9 = vld [vmem:[%s1729_s3 + $0xf0] sm:$0xf]  ;;  %v909_v15 = vld [vmem:[%s1729_s3 + $0x60] sm:$0xf] }
   0x4   :  { %v1151_v10 = vld [vmem:[%s1729_s3 + $0xf4] sm:$0xf0]  ;;  %81 = vmatpush.bf16.msra.mxu0 %v852_v3  ;;  %v918_v11 = vor.u32 %v1135_v8, %v917_v6  ;;  %v1045_v13 = vld [vmem:[%s1729_s3 + $0x170] sm:$0xf]  ;;  %v1133_v17 = vld [vmem:[%s1729_s3 + $0x64] sm:$0xf0] }
   0x5   :  { %v982_v12 = vor.u32 %v1151_v10, %v981_v9  ;;  %v1167_v14 = vld [vmem:[%s1729_s3 + $0x174] sm:$0xf0]  ;;  %95 = vmatpush.bf16.msra.mxu1 %v856_v7  ;;  %v973_v18 = vld [vmem:[%s1729_s3 + $0xe0] sm:$0xf]  ;;  %v1149_v19 = vld [vmem:[%s1729_s3 + $0xe4] sm:$0xf0]  ;;  %v910_v20 = vor.u32 %v1133_v17, %v909_v15 }
   0x6   :  { %v1046_v16 = vor.u32 %v1167_v14, %v1045_v13  ;;  %533 = vmatpush.bf16.msra.mxu2 %v918_v11  ;;  %v974_v21 = vor.u32 %v1149_v19, %v973_v18  ;;  %v1109_v22 = vld [vmem:[%s1729_s3 + $0x1f0] sm:$0xf]  ;;  %v1183_v23 = vld [vmem:[%s1729_s3 + $0x1f4] sm:$0xf0]  ;;  %v1037_v24 = vld [vmem:[%s1729_s3 + $0x160] sm:$0xf] }
   0x7   :  { %547 = vmatpush.bf16.msra.mxu3 %v982_v12  ;;  %857 = vmatmul.msk.bf16.vlgmr.msra.gmra.mxu0 %vm70_vm0, %v1117_v5  ;;  %v1110_v25 = vor.u32 %v1183_v23, %v1109_v22  ;;  %v1165_v26 = vld [vmem:[%s1729_s3 + $0x164] sm:$0xf0]  ;;  %v901_v27 = vld [vmem:[%s1729_s3 + $0x50] sm:$0xf]  ;;  %v1131_v28 = vld [vmem:[%s1729_s3 + $0x54] sm:$0xf0] }
   0x8   :  { %858 = vmatmul.msk.bf16.vlgmr.msra.gmra.mxu1 %vm70_vm0, %v1117_v5  ;;  %561 = vmatpush.bf16.msrb.mxu0 %v1046_v16  ;;  %v1038_v29 = vor.u32 %v1165_v26, %v1037_v24  ;;  %v965_v30 = vld [vmem:[%s1729_s3 + $0xd0] sm:$0xf]  ;;  %v1147_v31 = vld [vmem:[%s1729_s3 + $0xd4] sm:$0xf0]  ;;  %v1101_v32 = vld [vmem:[%s1729_s3 + $0x1e0] sm:$0xf]  ;;  %v902_v36 = vor.u32 %v1131_v28, %v901_v27 }
   0x9   :  { %575 = vmatpush.bf16.msrb.mxu1 %v1110_v25  ;;  %v1181_v33 = vld [vmem:[%s1729_s3 + $0x1e4] sm:$0xf0]  ;;  %v1029_v34 = vld [vmem:[%s1729_s3 + $0x150] sm:$0xf]  ;;  %v1163_v35 = vld [vmem:[%s1729_s3 + $0x154] sm:$0xf0]  ;;  %v966_v37 = vor.u32 %v1147_v31, %v965_v30 }
   0xa   :  { %534 = vmatpush.bf16.msra.mxu2 %v910_v20  ;;  %v1102_v38 = vor.u32 %v1181_v33, %v1101_v32  ;;  %v893_v39 = vld [vmem:[%s1729_s3 + $0x40] sm:$0xf]  ;;  %v1129_v40 = vld [vmem:[%s1729_s3 + $0x44] sm:$0xf0]  ;;  %v1093_v43 = vld [vmem:[%s1729_s3 + $0x1d0] sm:$0xf]  ;;  %v1030_v45 = vor.u32 %v1163_v35, %v1029_v34 }
   0xb   :  { %548 = vmatpush.bf16.msra.mxu3 %v974_v21  ;;  %v957_v41 = vld [vmem:[%s1729_s3 + $0xc0] sm:$0xf]  ;;  %v1145_v42 = vld [vmem:[%s1729_s3 + $0xc4] sm:$0xf0]  ;;  %v1179_v44 = vld [vmem:[%s1729_s3 + $0x1d4] sm:$0xf0]  ;;  %v894_v49 = vor.u32 %v1129_v40, %v893_v39 }
   0xc   :  { %562 = vmatpush.bf16.msrb.mxu0 %v1038_v29  ;;  %v1094_v46 = vor.u32 %v1179_v44, %v1093_v43  ;;  %v1021_v47 = vld [vmem:[%s1729_s3 + $0x140] sm:$0xf]  ;;  %v1161_v48 = vld [vmem:[%s1729_s3 + $0x144] sm:$0xf0]  ;;  %v958_v50 = vor.u32 %v1145_v42, %v957_v41  ;;  %v885_v51 = vld [vmem:[%s1729_s3 + $0x30] sm:$0xf] }
   0xd   :  { %576 = vmatpush.bf16.msrb.mxu1 %v1102_v38  ;;  %v1085_v52 = vld [vmem:[%s1729_s3 + $0x1c0] sm:$0xf]  ;;  %v1177_v53 = vld [vmem:[%s1729_s3 + $0x1c4] sm:$0xf0]  ;;  %v1127_v54 = vld [vmem:[%s1729_s3 + $0x34] sm:$0xf0]  ;;  %v1022_v57 = vor.u32 %v1161_v48, %v1021_v47 }
   0xe   :  { %535 = vmatpush.bf16.msra.mxu2 %v902_v36  ;;  %v949_v55 = vld [vmem:[%s1729_s3 + $0xb0] sm:$0xf]  ;;  %v1143_v56 = vld [vmem:[%s1729_s3 + $0xb4] sm:$0xf0]  ;;  %v1086_v58 = vor.u32 %v1177_v53, %v1085_v52  ;;  %v886_v61 = vor.u32 %v1127_v54, %v885_v51  ;;  %v877_v63 = vld [vmem:[%s1729_s3 + $0x20] sm:$0xf] }
   0xf   :  { %549 = vmatpush.bf16.msra.mxu3 %v966_v37  ;;  %v1013_v59 = vld [vmem:[%s1729_s3 + $0x130] sm:$0xf]  ;;  %v1159_v60 = vld [vmem:[%s1729_s3 + $0x134] sm:$0xf0]  ;;  %v950_v62 = vor.u32 %v1143_v56, %v949_v55  ;;  %v1125_v2 = vld [vmem:[%s1729_s3 + $0x24] sm:$0xf0] }
  0x10   :  { %563 = vmatpush.bf16.msrb.mxu0 %v1030_v45  ;;  %v1077_v0 = vld [vmem:[%s1729_s3 + $0x1b0] sm:$0xf]  ;;  %v1175_v1 = vld [vmem:[%s1729_s3 + $0x1b4] sm:$0xf0]  ;;  %v941_v3 = vld [vmem:[%s1729_s3 + $0xa0] sm:$0xf]  ;;  %v1014_v5 = vor.u32 %v1159_v60, %v1013_v59  ;;  %v878_v9 = vor.u32 %v1125_v2, %v877_v63 }
  0x11   :  { %577 = vmatpush.bf16.msrb.mxu1 %v1094_v46  ;;  %v1141_v4 = vld [vmem:[%s1729_s3 + $0xa4] sm:$0xf0]  ;;  %v1078_v6 = vor.u32 %v1175_v1, %v1077_v0  ;;  %v1005_v7 = vld [vmem:[%s1729_s3 + $0x120] sm:$0xf]  ;;  %v869_v11 = vld [vmem:[%s1729_s3 + $0x10] sm:$0xf] }
  0x12   :  { %536 = vmatpush.bf16.msra.mxu2 %v894_v49  ;;  %v1157_v8 = vld [vmem:[%s1729_s3 + $0x124] sm:$0xf0]  ;;  %v942_v10 = vor.u32 %v1141_v4, %v941_v3  ;;  %v1069_v12 = vld [vmem:[%s1729_s3 + $0x1a0] sm:$0xf]  ;;  %v1123_v14 = vld [vmem:[%s1729_s3 + $0x14] sm:$0xf0] }
  0x13   :  { %550 = vmatpush.bf16.msra.mxu3 %v958_v50  ;;  %v1173_v13 = vld [vmem:[%s1729_s3 + $0x1a4] sm:$0xf0]  ;;  %v933_v15 = vld [vmem:[%s1729_s3 + $0x90] sm:$0xf]  ;;  %v1139_v16 = vld [vmem:[%s1729_s3 + $0x94] sm:$0xf0]  ;;  %v1006_v17 = vor.u32 %v1157_v8, %v1005_v7  ;;  %v870_v22 = vor.u32 %v1123_v14, %v869_v11 }
  0x14   :  { %564 = vmatpush.bf16.msrb.mxu0 %v1022_v57  ;;  %v1070_v18 = vor.u32 %v1173_v13, %v1069_v12  ;;  %v997_v19 = vld [vmem:[%s1729_s3 + $0x110] sm:$0xf]  ;;  %v1155_v20 = vld [vmem:[%s1729_s3 + $0x114] sm:$0xf0]  ;;  %v861_v21 = vld [vmem:[%s1729_s3] sm:$0xf]  ;;  %v934_v23 = vor.u32 %v1139_v16, %v933_v15 }
  0x15   :  { %578 = vmatpush.bf16.msrb.mxu1 %v1086_v58  ;;  %v1121_v24 = vld [vmem:[%s1729_s3 + $0x4] sm:$0xf0]  ;;  %v1061_v25 = vld [vmem:[%s1729_s3 + $0x190] sm:$0xf]  ;;  %v1171_v26 = vld [vmem:[%s1729_s3 + $0x194] sm:$0xf0]  ;;  %v998_v30 = vor.u32 %v1155_v20, %v997_v19 }
  0x16   :  { %537 = vmatpush.bf16.msra.mxu2 %v886_v61  ;;  %v925_v27 = vld [vmem:[%s1729_s3 + $0x80] sm:$0xf]  ;;  %v1137_v28 = vld [vmem:[%s1729_s3 + $0x84] sm:$0xf0]  ;;  %v1134_v29 = vld [vmem:[%s1729_s3 + $0x74] sm:$0xf]  ;;  %v1062_v34 = vor.u32 %v1171_v26, %v1061_v25  ;;  %v862_v38 = vor.u32 %v1121_v24, %v861_v21 }
  0x17   :  { %551 = vmatpush.bf16.msra.mxu3 %v950_v62  ;;  %v919_v31 = vld [vmem:[%s1729_s3 + $0x78] sm:$0xf0]  ;;  %v1150_v32 = vld [vmem:[%s1729_s3 + $0xf4] sm:$0xf]  ;;  %v989_v35 = vld [vmem:[%s1729_s3 + $0x100] sm:$0xf]  ;;  %v926_v39 = vor.u32 %v1137_v28, %v925_v27 }
  0x18   :  { %565 = vmatpush.bf16.msrb.mxu0 %v1014_v5  ;;  %v983_v33 = vld [vmem:[%s1729_s3 + $0xf8] sm:$0xf0]  ;;  %v1153_v36 = vld [vmem:[%s1729_s3 + $0x104] sm:$0xf0]  ;;  %v1166_v37 = vld [vmem:[%s1729_s3 + $0x174] sm:$0xf]  ;;  %v922_v43 = vor.u32 %v1134_v29, %v919_v31 }
  0x19   :  { %579 = vmatpush.bf16.msrb.mxu1 %v1078_v6  ;;  %v1047_v40 = vld [vmem:[%s1729_s3 + $0x178] sm:$0xf0]  ;;  %v1053_v41 = vld [vmem:[%s1729_s3 + $0x180] sm:$0xf]  ;;  %v1169_v42 = vld [vmem:[%s1729_s3 + $0x184] sm:$0xf0]  ;;  %v986_v44 = vor.u32 %v1150_v32, %v983_v33  ;;  %v990_v45 = vor.u32 %v1153_v36, %v989_v35 }
  0x1a   :  { %538 = vmatpush.bf16.msra.mxu2 %v878_v9  ;;  %v1050_v46 = vor.u32 %v1166_v37, %v1047_v40  ;;  %v1054_v47 = vor.u32 %v1169_v42, %v1053_v41  ;;  %v1132_v48 = vld [vmem:[%s1729_s3 + $0x64] sm:$0xf]  ;;  %v911_v49 = vld [vmem:[%s1729_s3 + $0x68] sm:$0xf0]  ;;  %v1182_v53 = vld [vmem:[%s1729_s3 + $0x1f4] sm:$0xf] }
  0x1b   :  { %552 = vmatpush.bf16.msra.mxu3 %v942_v10  ;;  %v1148_v50 = vld [vmem:[%s1729_s3 + $0xe4] sm:$0xf]  ;;  %v914_v51 = vor.u32 %v1132_v48, %v911_v49  ;;  %v975_v52 = vld [vmem:[%s1729_s3 + $0xe8] sm:$0xf0]  ;;  %v1111_v54 = vld [vmem:[%s1729_s3 + $0x1f8] sm:$0xf0] }
  0x1c   :  { %566 = vmatpush.bf16.msrb.mxu0 %v1006_v17  ;;  %v978_v55 = vor.u32 %v1148_v50, %v975_v52  ;;  %v1114_v56 = vor.u32 %v1182_v53, %v1111_v54  ;;  %v1164_v57 = vld [vmem:[%s1729_s3 + $0x164] sm:$0xf]  ;;  %v1039_v58 = vld [vmem:[%s1729_s3 + $0x168] sm:$0xf0]  ;;  %v1130_v60 = vld [vmem:[%s1729_s3 + $0x54] sm:$0xf] }
  0x1d   :  { %580 = vmatpush.bf16.msrb.mxu1 %v1070_v18  ;;  %v1042_v59 = vor.u32 %v1164_v57, %v1039_v58  ;;  %v903_v61 = vld [vmem:[%s1729_s3 + $0x58] sm:$0xf0]  ;;  %v1146_v62 = vld [vmem:[%s1729_s3 + $0xd4] sm:$0xf]  ;;  %v1180_v1 = vld [vmem:[%s1729_s3 + $0x1e4] sm:$0xf] }
  0x1e   :  { %539 = vmatpush.bf16.msra.mxu2 %v870_v22  ;;  %v906_v63 = vor.u32 %v1130_v60, %v903_v61  ;;  %v967_v0 = vld [vmem:[%s1729_s3 + $0xd8] sm:$0xf0]  ;;  %v1103_v2 = vld [vmem:[%s1729_s3 + $0x1e8] sm:$0xf0]  ;;  %v1162_v5 = vld [vmem:[%s1729_s3 + $0x154] sm:$0xf] }
  0x1f   :  { %553 = vmatpush.bf16.msra.mxu3 %v934_v23  ;;  %v970_v3 = vor.u32 %v1146_v62, %v967_v0  ;;  %v1106_v4 = vor.u32 %v1180_v1, %v1103_v2  ;;  %v1031_v6 = vld [vmem:[%s1729_s3 + $0x158] sm:$0xf0]  ;;  %v1128_v8 = vld [vmem:[%s1729_s3 + $0x44] sm:$0xf]  ;;  %v895_v9 = vld [vmem:[%s1729_s3 + $0x48] sm:$0xf0] }
  0x20   :  { %567 = vmatpush.bf16.msrb.mxu0 %v998_v30  ;;  %v1034_v7 = vor.u32 %v1162_v5, %v1031_v6  ;;  %v1144_v10 = vld [vmem:[%s1729_s3 + $0xc4] sm:$0xf]  ;;  %v898_v11 = vor.u32 %v1128_v8, %v895_v9  ;;  %v959_v12 = vld [vmem:[%s1729_s3 + $0xc8] sm:$0xf0]  ;;  %v1178_v13 = vld [vmem:[%s1729_s3 + $0x1d4] sm:$0xf] }
  0x21   :  { %581 = vmatpush.bf16.msrb.mxu1 %v1062_v34  ;;  %v1095_v14 = vld [vmem:[%s1729_s3 + $0x1d8] sm:$0xf0]  ;;  %v962_v15 = vor.u32 %v1144_v10, %v959_v12  ;;  %v1160_v17 = vld [vmem:[%s1729_s3 + $0x144] sm:$0xf]  ;;  %v1023_v18 = vld [vmem:[%s1729_s3 + $0x148] sm:$0xf0] }
  0x22   :  { %540 = vmatpush.bf16.msra.mxu2 %v862_v38  ;;  %v1098_v16 = vor.u32 %v1178_v13, %v1095_v14  ;;  %v1026_v19 = vor.u32 %v1160_v17, %v1023_v18  ;;  %v1126_v20 = vld [vmem:[%s1729_s3 + $0x34] sm:$0xf]  ;;  %v887_v21 = vld [vmem:[%s1729_s3 + $0x38] sm:$0xf0]  ;;  %v1176_v25 = vld [vmem:[%s1729_s3 + $0x1c4] sm:$0xf] }
  0x23   :  { %554 = vmatpush.bf16.msra.mxu3 %v926_v39  ;;  %v1142_v22 = vld [vmem:[%s1729_s3 + $0xb4] sm:$0xf]  ;;  %v890_v23 = vor.u32 %v1126_v20, %v887_v21  ;;  %v951_v24 = vld [vmem:[%s1729_s3 + $0xb8] sm:$0xf0]  ;;  %v1087_v26 = vld [vmem:[%s1729_s3 + $0x1c8] sm:$0xf0] }
  0x24   :  { %568 = vmatpush.bf16.msrb.mxu0 %v990_v45  ;;  %v954_v27 = vor.u32 %v1142_v22, %v951_v24  ;;  %v1090_v28 = vor.u32 %v1176_v25, %v1087_v26  ;;  %v1186_v29 = vld [vmem:[%s1730_s2] sm:$0xf]  ;;  %v1193_v30 = vld [vmem:[%s1730_s2 + $0x4] sm:$0xf0]  ;;  %v1158_v31 = vld [vmem:[%s1729_s3 + $0x134] sm:$0xf] }
  0x25   :  { %582 = vmatpush.bf16.msrb.mxu1 %v1054_v47  ;;  %v1585_v32 = vor.u32 %v1193_v30, %v1186_v29  ;;  %v1015_v33 = vld [vmem:[%s1729_s3 + $0x138] sm:$0xf0]  ;;  %v1192_v34 = vld [vmem:[%s1730_s2 + $0x4] sm:$0xf]  ;;  %v1188_v35 = vld [vmem:[%s1730_s2 + $0x8] sm:$0xf0] }
  0x26   :  { %589 = vmatpush.bf16.msrb.mxu2 %v922_v43  ;;  %v1018_v36 = vor.u32 %v1158_v31, %v1015_v33  ;;  %v1596_v37 = vor.u32 %v1192_v34, %v1188_v35  ;;  %v1124_v38 = vld [vmem:[%s1729_s3 + $0x24] sm:$0xf]  ;;  %v879_v39 = vld [vmem:[%s1729_s3 + $0x28] sm:$0xf0]  ;;  %v1174_v43 = vld [vmem:[%s1729_s3 + $0x1b4] sm:$0xf] }
  0x27   :  { %603 = vmatpush.bf16.msrb.mxu3 %v986_v44  ;;  %v1140_v40 = vld [vmem:[%s1729_s3 + $0xa4] sm:$0xf]  ;;  %569 = vmatmul.bf16.vlgmr.msrb.gmra.mxu0 %v1585_v32  ;;  %v882_v41 = vor.u32 %v1124_v38, %v879_v39  ;;  %v943_v42 = vld [vmem:[%s1729_s3 + $0xa8] sm:$0xf0]  ;;  %v1079_v44 = vld [vmem:[%s1729_s3 + $0x1b8] sm:$0xf0] }
  0x28   :  { %617 = vmatpush.bf16.msra.mxu0 %v1050_v46  ;;  %583 = vmatmul.bf16.vlgmr.msrb.gmra.mxu1 %v1596_v37  ;;  %v946_v45 = vor.u32 %v1140_v40, %v943_v42  ;;  %v1082_v46 = vor.u32 %v1174_v43, %v1079_v44  ;;  %v1156_v47 = vld [vmem:[%s1729_s3 + $0x124] sm:$0xf]  ;;  %v1007_v48 = vld [vmem:[%s1729_s3 + $0x128] sm:$0xf0]  ;;  %v1122_v49 = vld [vmem:[%s1729_s3 + $0x14] sm:$0xf] }
  0x29   :  { %631 = vmatpush.bf16.msra.mxu1 %v1114_v56  ;;  %v1010_v50 = vor.u32 %v1156_v47, %v1007_v48  ;;  %v1138_v52 = vld [vmem:[%s1729_s3 + $0x94] sm:$0xf]  ;;  %v935_v53 = vld [vmem:[%s1729_s3 + $0x98] sm:$0xf0]  ;;  %v1172_v56 = vld [vmem:[%s1729_s3 + $0x1a4] sm:$0xf] }
  0x2a   :  { %590 = vmatpush.bf16.msrb.mxu2 %v914_v51  ;;  %v871_v51 = vld [vmem:[%s1729_s3 + $0x18] sm:$0xf0]  ;;  %v1071_v57 = vld [vmem:[%s1729_s3 + $0x1a8] sm:$0xf0]  ;;  %v1154_v58 = vld [vmem:[%s1729_s3 + $0x114] sm:$0xf] }
  0x2b   :  { %604 = vmatpush.bf16.msrb.mxu3 %v978_v55  ;;  %v874_v54 = vor.u32 %v1122_v49, %v871_v51  ;;  %v938_v55 = vor.u32 %v1138_v52, %v935_v53  ;;  %v999_v60 = vld [vmem:[%s1729_s3 + $0x118] sm:$0xf0]  ;;  %v1120_v61 = vld [vmem:[%s1729_s3 + $0x4] sm:$0xf]  ;;  %v863_v62 = vld [vmem:[%s1729_s3 + $0x8] sm:$0xf0] }
  0x2c   :  { %618 = vmatpush.bf16.msra.mxu0 %v1042_v59  ;;  %v1074_v59 = vor.u32 %v1172_v56, %v1071_v57  ;;  %v1136_v0 = vld [vmem:[%s1729_s3 + $0x84] sm:$0xf]  ;;  %v927_v1 = vld [vmem:[%s1729_s3 + $0x88] sm:$0xf0]  ;;  %v1170_v2 = vld [vmem:[%s1729_s3 + $0x194] sm:$0xf] }
  0x2d   :  { %632 = vmatpush.bf16.msra.mxu1 %v1106_v4  ;;  %v1063_v4 = vld [vmem:[%s1729_s3 + $0x198] sm:$0xf0]  ;;  %v1152_v5 = vld [vmem:[%s1729_s3 + $0x104] sm:$0xf]  ;;  %v991_v6 = vld [vmem:[%s1729_s3 + $0x108] sm:$0xf0] }
  0x2e   :  { %591 = vmatpush.bf16.msrb.mxu2 %v906_v63  ;;  %v1002_v63 = vor.u32 %v1154_v58, %v999_v60  ;;  %v1066_v8 = vor.u32 %v1170_v2, %v1063_v4  ;;  %v994_v9 = vor.u32 %v1152_v5, %v991_v6  ;;  %v1168_v10 = vld [vmem:[%s1729_s3 + $0x184] sm:$0xf]  ;;  %v1204_v14 = vmov 1   ;;  %v723_v17 = vld [vmem:[%s1731_s6 + $0x8] sm:$0xff]  ;;  %v207_v25 = vld [vmem:[%s1732_s4] sm:$0x3] }
  0x2f   :  { %605 = vmatpush.bf16.msrb.mxu3 %v970_v3  ;;  %v866_v3 = vor.u32 %v1120_v61, %v863_v62  ;;  %v722_v13 = vld [vmem:[%s1731_s6] sm:$0xff]  ;;  %1200 = vset.pattern.permute.xlu1 %v1204_v14  ;;  %vm725_vm2 = vcmp.gt.f32.partialorder %v723_v17, 0.0  ;;  %v209_v26 = vperm.slane %v207_v25, 0 }
  0x30   :  { %619 = vmatpush.bf16.msra.mxu0 %v1034_v7  ;;  %v930_v7 = vor.u32 %v1136_v0, %v927_v1  ;;  %vm724_vm1 = vcmp.gt.f32.partialorder %v722_v13, 0.0  ;;  %v670_v2 = vld [vmem:[%s1733_s5] sm:$0x3] }
  0x31   :  { %633 = vmatpush.bf16.msra.mxu1 %v1098_v16 }
  0x32   :  { %592 = vmatpush.bf16.msrb.mxu2 %v898_v11  ;;  %v1055_v11 = vld [vmem:[%s1729_s3 + $0x188] sm:$0xf0] }
  0x33   :  { %606 = vmatpush.bf16.msrb.mxu3 %v962_v15  ;;  %v1058_v12 = vor.u32 %v1168_v10, %v1055_v11  ;;  %v1205_v15 = vmov 0   ;;  %v807_v11 = vld [vmem:[%s1734_s7] sm:$0x3] }
  0x34   :  { %620 = vmatpush.bf16.msra.mxu0 %v1026_v19  ;;  %1199 = vset.pattern.permute.xlu0 %v1205_v15  ;;  %v726_v16 = vsel %vm724_vm1, 1, %v1205_v15  ;;  %v727_v20 = vsel %vm725_vm2, 1, %v1205_v15 }
  0x35   :  { %634 = vmatpush.bf16.msra.mxu1 %v1090_v28  ;;  %1201 = vset.pattern.permute.xlu2 %v1205_v15 }
  0x36   :  { %593 = vmatpush.bf16.msrb.mxu2 %v890_v23  ;;  %768 = vperm.xlu1 %1200, %v726_v16  }
  0x37   :  { %607 = vmatpush.bf16.msrb.mxu3 %v954_v27  ;;  %729 = vperm.xlu0 %1199, %v726_v16  }
  0x38   :  { %621 = vmatpush.bf16.msra.mxu0 %v1018_v36  ;;  %v1206_v36 = vmov -1e+30   ;;  %810 = vperm.xlu2 %1201, %v807_v11  }
  0x39   :  { %635 = vmatpush.bf16.msra.mxu1 %v1082_v46  ;;  %39 = vst [vmem:[#allocation5] sm:$0xf] %v1206_v36 }
  0x3a   :  { %594 = vmatpush.bf16.msrb.mxu2 %v882_v41 }
  0x3b   :  { %608 = vmatpush.bf16.msrb.mxu3 %v946_v45  ;;  %v210_v45 = vperm.slane %v207_v25, 1 }
  0x3c   :  { %622 = vmatpush.bf16.msra.mxu0 %v1010_v50 }
  0x3d   :  { %636 = vmatpush.bf16.msra.mxu1 %v1074_v59 }
  0x3e   :  { %595 = vmatpush.bf16.msrb.mxu2 %v874_v54  ;;  %771 = vperm.xlu1 %1200, %v727_v20  }
  0x3f   :  { %609 = vmatpush.bf16.msrb.mxu3 %v938_v55  ;;  %732 = vperm.xlu0 %1199, %v727_v20  }
  0x40   :  { %623 = vmatpush.bf16.msra.mxu0 %v1002_v63 }
  0x41   :  { %637 = vmatpush.bf16.msra.mxu1 %v1066_v8 }
  0x42   :  { %596 = vmatpush.bf16.msrb.mxu2 %v866_v3 }
  0x43   :  { %610 = vmatpush.bf16.msrb.mxu3 %v930_v7 }
  0x44   :  { %624 = vmatpush.bf16.msra.mxu0 %v994_v9 }
  0x45   :  { %638 = vmatpush.bf16.msra.mxu1 %v1058_v12 }
  0x47   :  { %625 = vmatmul.bf16.vlgmr.msra.gmra.mxu0 %v1585_v32 }
  0x48   :  { %639 = vmatmul.bf16.vlgmr.msra.gmra.mxu1 %v1596_v37 }
  0x84   :  { %v83_v18 = vpop.f32.mrf.mxu0 }
  0x85   :  { %v97_v19 = vpop.f32.mrf.mxu1 }
  0x8c   :  { %v85_v21 = vpop.f32.mrf.mxu0 }
  0x8d   :  { %v139_v22 = vpack.c.bf16 %v85_v21, %v83_v18  ;;  %v99_v23 = vpop.f32.mrf.mxu1 }
  0x8e   :  { %v140_v24 = vpack.c.bf16 %v99_v23, %v97_v19 }
  0x8f   :  { %541 = vmatmul.bf16.vlgmr.msra.gmra.mxu2 %v139_v22 }
  0x90   :  { %555 = vmatmul.bf16.vlgmr.msra.gmra.mxu3 %v140_v24 }
  0x9f   :  { %597 = vmatmul.bf16.vlgmr.msrb.gmra.mxu2 %v139_v22 }
  0xa0   :  { %611 = vmatmul.bf16.vlgmr.msrb.gmra.mxu3 %v140_v24 }
  0xa4   :  { %v570_v27 = vpop.f32.mrf.mxu0 }
  0xa5   :  { %v584_v28 = vpop.f32.mrf.mxu1 }
  0xa8   :  { %v1689_v42 = vpop.permute.xlu1 %768 }
  0xa9   :  { %v1691_v43 = vpop.permute.xlu0 %729  ;;  %vm773_vm7 = vcmp.eq.s32.totalorder %v1689_v42, 1 }
  0xaa   :  { %vm734_vm8 = vcmp.eq.s32.totalorder %v1691_v43, 1 }
  0xac   :  { %v572_v34 = vpop.f32.mrf.mxu0 }
  0xad   :  { %v586_v40 = vpop.f32.mrf.mxu1 }
  0xb0   :  { %v772_v60 = vpop.permute.xlu1 %771 }
  0xb1   :  { %v733_v62 = vpop.permute.xlu0 %732  ;;  %vm774_vm5 = vcmp.eq.s32.totalorder %v772_v60, 1  ;;  %v794_v60 = vld [vmem:[#allocation5 + $0x1] ss:$2 sm:$0x3] }
  0xb2   :  { %vm735_vm6 = vcmp.eq.s32.totalorder %v733_v62, 1 }
  0xc4   :  { %v626_v54 = vpop.f32.mrf.mxu0 }
  0xc5   :  { %v640_v58 = vpop.f32.mrf.mxu1 }
  0xcc   :  { %v628_v10 = vpop.f32.mrf.mxu0 }
  0xcd   :  { %v642_v17 = vpop.f32.mrf.mxu1 }
 0x112   :  { %v542_v29 = vpop.f32.mrf.mxu2 }
 0x113   :  { %v543_v30 = vadd.f32 %v542_v29, %v209_v26  ;;  %v556_v31 = vpop.f32.mrf.mxu3 }
 0x115   :  { %v557_v32 = vadd.f32 %v556_v31, %v543_v30 }
 0x117   :  { %v571_v33 = vadd.f32 %v570_v27, %v557_v32 }
 0x119   :  { %v585_v39 = vadd.f32 %v584_v28, %v571_v33 }
 0x11a   :  { %v544_v35 = vpop.f32.mrf.mxu2 }
 0x11b   :  { %v545_v37 = vadd.f32 %v544_v35, %v209_v26  ;;  %v558_v38 = vpop.f32.mrf.mxu3  ;;  %v645_v46 = vmax.f32 %v585_v39, 0.0 }
 0x11d   :  { %v559_v41 = vadd.f32 %v558_v38, %v545_v37  ;;  %v657_v52 = vceil.f32 %v645_v46  ;;  %v661_v53 = vfloor.f32 %v645_v46  ;;  %vm653_vm4 = vcmp.lt.f32.partialorder %v645_v46, 0.0 }
 0x11f   :  { %v573_v44 = vadd.f32 %v572_v34, %v559_v41  ;;  %v665_v63 = vsel %vm653_vm4, %v657_v52, %v661_v53 }
 0x120   :  { %v775_v12 = vsel %vm773_vm7, %v665_v63, -1e+30  ;;  %v736_v13 = vsel %vm734_vm8, %v665_v63, -1e+30 }
 0x121   :  { %v587_v47 = vadd.f32 %v586_v40, %v573_v44 }
 0x122   :  { %v598_v48 = vpop.f32.mrf.mxu2 }
 0x123   :  { %v647_v49 = vmax.f32 %v587_v47, 0.0  ;;  %v599_v50 = vadd.f32 %v598_v48, %v210_v45  ;;  %v612_v51 = vpop.f32.mrf.mxu3 }
 0x125   :  { %v613_v55 = vadd.f32 %v612_v51, %v599_v50  ;;  %vm655_vm3 = vcmp.lt.f32.partialorder %v647_v49, 0.0  ;;  %v659_v56 = vceil.f32 %v647_v49  ;;  %v663_v57 = vfloor.f32 %v647_v49 }
 0x127   :  { %v627_v59 = vadd.f32 %v626_v54, %v613_v55  ;;  %v667_v61 = vsel %vm655_vm3, %v659_v56, %v663_v57  ;;  %v762_v54 = vlaneseq  ;;  %v754_v56 = vld [vmem:[#allocation5] ss:$2 sm:$0x3] }
 0x128   :  { %688 = vmatpush.msra.mxu2 %v667_v61  ;;  %v777_v7 = vsel %vm774_vm5, %v667_v61, -1e+30  ;;  %v738_v8 = vsel %vm735_vm6, %v667_v61, -1e+30 }
 0x129   :  { %v641_v0 = vadd.f32 %v640_v58, %v627_v59  ;;  %v779_v15 = vmax.f32 %v775_v12, %v777_v7  ;;  %v740_v16 = vmax.f32 %v736_v13, %v738_v8  ;;  %vm764_vm12 = vcmp.lt.s32.totalorder %v762_v54, 256  ;;  %v811_v7 = vpop.permute.xlu2 %810 }
 0x12a   :  { %v600_v1 = vpop.f32.mrf.mxu2  ;;  %689 = vmatpush.msra.mxu2 %v665_v63 }
 0x12b   :  { %v646_v3 = vmax.f32 %v641_v0, 0.0  ;;  %v601_v4 = vadd.f32 %v600_v1, %v210_v45  ;;  %1115 = vmatmul.msk.f32.vlgmr.msra.gmra.mxu2 %vm70_vm0, %v670_v2  ;;  %v614_v5 = vpop.f32.mrf.mxu3  ;;  %v780_v22 = vrot.slane %v779_v15, 4  ;;  %v741_v23 = vrot.slane %v740_v16, 4 }
 0x12d   :  { %v649_v6 = vpack.c.bf16 %v646_v3, %v645_v46  ;;  %v615_v9 = vadd.f32 %v614_v5, %v601_v4  ;;  %v658_v19 = vceil.f32 %v646_v3  ;;  %v662_v20 = vfloor.f32 %v646_v3 }
 0x12e   :  { %vm654_vm9 = vcmp.lt.f32.partialorder %v646_v3, 0.0  ;;  %v781_v28 = vmax.f32 %v779_v15, %v780_v22  ;;  %v742_v29 = vmax.f32 %v740_v16, %v741_v23  ;;  %v1207_v3 = vmov 0.0  }
 0x12f   :  { %651 = vst [vmem:[%s1735_s8] sm:$0xff] %v649_v6  ;;  %v629_v14 = vadd.f32 %v628_v10, %v615_v9  ;;  %v666_v25 = vsel %vm654_vm9, %v658_v19, %v662_v20  ;;  %v1208_v4 = vmov 269488144  }
 0x130   :  { %v737_v31 = vsel %vm734_vm8, %v666_v25, -1e+30  ;;  %v776_v34 = vsel %vm773_vm7, %v666_v25, -1e+30  ;;  %v782_v37 = vrot.slane %v781_v28, 2  ;;  %v743_v38 = vrot.slane %v742_v29, 2 }
 0x131   :  { %v643_v18 = vadd.f32 %v642_v17, %v629_v14  ;;  %38 = vst [vmem:[#allocation4] sm:$0xf] %v1207_v3  ;;  %v813_v5 = vunpack.c.l.s4 %v1208_v4 }
 0x132   :  { %v783_v44 = vmax.f32 %v781_v28, %v782_v37  ;;  %v744_v45 = vmax.f32 %v742_v29, %v743_v38 }
 0x133   :  { %v648_v21 = vmax.f32 %v643_v18, 0.0  ;;  %v814_v6 = vunpack.c.0.s8 %v813_v5 }
 0x134   :  { %v784_v50 = vrot.slane %v783_v44, 1  ;;  %v745_v42 = vrot.slane %v744_v45, 1 }
 0x135   :  { %v650_v24 = vpack.c.bf16 %v648_v21, %v647_v49  ;;  %vm656_vm10 = vcmp.lt.f32.partialorder %v648_v21, 0.0  ;;  %v660_v26 = vceil.f32 %v648_v21  ;;  %v664_v27 = vfloor.f32 %v648_v21 }
 0x136   :  { %v785_v57 = vmax.f32 %v783_v44, %v784_v50  ;;  %v746_v58 = vmax.f32 %v744_v45, %v745_v42  ;;  %v815_v8 = vperm.slane %v811_v7, %v814_v6 }
 0x137   :  { %652 = vst [vmem:[%s1735_s8 + $0x8] sm:$0xff] %v650_v24  ;;  %v668_v30 = vsel %vm656_vm10, %v660_v26, %v664_v27 }
 0x138   :  { %708 = vmatpush.msra.mxu3 %v668_v30  ;;  %v739_v32 = vsel %vm735_vm6, %v668_v30, -1e+30  ;;  %v778_v33 = vsel %vm774_vm5, %v668_v30, -1e+30  ;;  %1202 = vrcp.f32 %v815_v8  ;;  %v669_v15 = vld [vmem:[#allocation4] sm:$0xf]  ;;  %vm822_vm14 = vweird.f32 %v815_v8 }
 0x139   :  { %v747_v35 = vmax.f32 %v737_v31, %v739_v32  ;;  %v786_v36 = vmax.f32 %v776_v34, %v778_v33  ;;  %v828_v19 = vand.u32 2147483648, %v815_v8  ;;  %v826_v21 = vand.u32 2147483647, %v815_v8 }
 0x13a   :  { %709 = vmatpush.msra.mxu3 %v666_v25 }
 0x13b   :  { %v748_v39 = vrot.slane %v747_v35, 4  ;;  %v787_v40 = vrot.slane %v786_v36, 4  ;;  %1116 = vmatmul.msk.f32.vlgmr.msra.gmra.mxu3 %vm70_vm0, %v670_v2  ;;  %v829_v22 = vor.u32 1.1754944e-38, %v828_v19  ;;  %vm827_vm1 = vcmp.eq.f32.partialorder %v826_v21, 8.507059e+37 }
 0x13d   :  { %v749_v41 = vmax.f32 %v747_v35, %v748_v39  ;;  %v788_v43 = vmax.f32 %v786_v36, %v787_v40 }
 0x13e   :  { %v1203_v9 = vpop.eup %1202 }
 0x13f   :  { %v750_v46 = vrot.slane %v749_v41, 2  ;;  %v789_v47 = vrot.slane %v788_v43, 2  ;;  %v818_v10 = vmul.f32 %v1203_v9, %v815_v8  ;;  %vm823_vm15 = vweird.f32 %v1203_v9 }
 0x140   :  { %vm824_vm0 = vmor %vm822_vm14, %vm823_vm15 }
 0x141   :  { %v751_v48 = vmax.f32 %v749_v41, %v750_v46  ;;  %v790_v49 = vmax.f32 %v788_v43, %v789_v47  ;;  %v819_v11 = vsub.f32 1.0, %v818_v10 }
 0x143   :  { %v752_v51 = vrot.slane %v751_v48, 1  ;;  %v791_v52 = vrot.slane %v790_v49, 1  ;;  %v820_v16 = vmul.f32 %v1203_v9, %v819_v11 }
 0x145   :  { %v753_v53 = vmax.f32 %v751_v48, %v752_v51  ;;  %v792_v55 = vmax.f32 %v790_v49, %v791_v52  ;;  %v821_v20 = vadd.f32 %v1203_v9, %v820_v16 }
 0x147   :  { %v757_v59 = vrot.slane %v753_v53, 7  ;;  %v797_v61 = vrot.slane %v792_v55, 7  ;;  %v825_v23 = vsel %vm824_vm0, %v1203_v9, %v821_v20 }
 0x148   :  { %v830_v24 = vsel %vm827_vm1, %v829_v22, %v825_v23 }
 0x149   :  { %v759_v62 = vsel %vm758_vm11, %v746_v58, %v757_v59  ;;  %v798_v63 = vsel %vm758_vm11, %v785_v57, %v797_v61 }
 0x14a   :  { %v761_v0 = vmax.f32 %v754_v56, %v759_v62  ;;  %v800_v1 = vmax.f32 %v794_v60, %v798_v63 }
 0x14c   :  { %766 = vst.msk [vmem:[#allocation5] ss:$2 sm:$0x3] %vm764_vm12, %v761_v0 }
 0x14d   :  { %801 = vst.msk [vmem:[#allocation5 + $0x1] ss:$2 sm:$0x3] %vm764_vm12, %v800_v1 }
 0x154   :  { %v804_v2 = vld [vmem:[#allocation5] sm:$0xf] }
 0x155   :  { %805 = vst [vmem:[%s1736_s9] sm:$0xf] %v804_v2 }
 0x1ae   :  { %v691_v13 = vpop.f32.mrf.mxu2 }
 0x1be   :  { %v711_v12 = vpop.f32.mrf.mxu3 }
 0x1bf   :  { %v716_v14 = vrot.slane %v711_v12, 6 }
 0x1c1   :  { %v718_v17 = vsel %vm717_vm13, %v691_v13, %v716_v14 }
 0x1c2   :  { %v720_v18 = vadd.f32 %v718_v17, %v669_v15 }
 0x1c4   :  { %721 = vst [vmem:[#allocation4] sm:$0xf] %v720_v18 }
 0x1cb   :  { %v806_v25 = vld [vmem:[#allocation4] sm:$0xf] }
 0x1cc   :  { %v831_v26 = vmul.f32 %v830_v24, %v806_v25 }
 0x1ce   :  { %vm832_vm2 = vcmp.lt.f32.partialorder %v831_v26, 0.0  ;;  %v833_v27 = vceil.f32 %v831_v26  ;;  %v834_v28 = vfloor.f32 %v831_v26 }
 0x1d0   :  { %v835_v29 = vsel %vm832_vm2, %v833_v27, %v834_v28 }
 0x1d1   :  { %836 = vst [vmem:[%s1736_s9 + $0x4] sm:$0xf] %v835_v29 }

// kernel: net_forward.7
= control target key start
LH: loop header
LB: loop body
LE: loop exit
PB: predicated region body
PF: predicated region fallthrough
CT: control target
= control target key end

     0   :  { %s1392_s0 = inlined_call_operand.vmem [shape: f32[16,256], index: 0, kind: input, shape index: {}]   ;;  %s1393_s1 = inlined_call_operand.vmem [shape: f32[16,1], index: 1, kind: input, shape index: {}]   ;;  %s1394_s2 = inlined_call_operand.vmem [shape: f32[2,16], index: 2, kind: input, shape index: {}]   ;;  %s1395_s3 = inlined_call_operand.vmem [shape: f32[16,2], index: 3, kind: input, shape index: {}]   ;;  %s1396_s4 = inlined_call_operand.vmem [shape: f32[2,1], index: 4, kind: input, shape index: {}]   ;;  %s1397_s5 = inlined_call_operand.vmem [shape: f32[2,512], index: 5, kind: input, shape index: {}]   ;;  %s1398_s6 = inlined_call_operand.vmem [shape: f32[2,512], index: 6, kind: input, shape index: {}]   ;;  %s1399_s7 = inlined_call_operand.vmem [shape: f32[512,256], index: 7, kind: input, shape index: {}]   ;;  %s1400_s8 = inlined_call_operand.vmem [shape: f32[1,256], index: 8, kind: input, shape index: {}]   ;;  %s1401_s9 = inlined_call_operand.hbm [shape: f32[256,128], index: 9, kind: input, shape index: {}]   ;;  %s1402_s10 = inlined_call_operand.vmem [shape: f32[1,128], index: 10, kind: input, shape index: {}]   ;;  %s1403_s11 = inlined_call_operand.vmem [shape: f32[128,1], index: 11, kind: input, shape index: {}]   ;;  %s1404_s12 = inlined_call_operand.<no memory space> [shape: f32[1,1], index: 12, kind: input, shape index: {}]   ;;  %s1405_s13 = inlined_call_operand.vmem [shape: f32[2,1], index: 13, kind: output, shape index: {}]  }
   0x1   :  { %v18_v0 = vstv %s1404_s12 }
   0x2   :  { %19 = vst [vmem:[#allocation5] sm:$0x1] %v18_v0 }
   0x3   :  { %20 = vsyncpa [#allocation7], 0  ;;  %s43_s29 = sshll.u32 %s1401_s9, 4  ;;  %s791_s30 = smov [#allocation6]   ;;  %s44_s29 = int_to_ptr.hbm [resolvable:$true] %s43_s29 }
   0x4   :  { %s45_s14 = sshll.u32 %s791_s30, 4  ;;  %s792_s15 = smov 128   ;;  %s46_s14 = int_to_ptr.vmem [resolvable:$true] %s45_s14 }
   0x5   :  { %s793_s16 = smov 8  }
   0x6   :  { %51 = dma.hbm_to_vmem [thread:$0]  %s44_s29, 4096, %s46_s14, [#allocation7], %s792_s15, %s792_s15, %s793_s16  }
   0x7   :  { %789 = dma.done.wait [#allocation7], 4096  }
   0x8   :  { %790 = vsyncadd [#allocation7], 4294963200  ;;  %v794_v1 = vmov 0   ;;  %v795_v2 = vmov 1   ;;  %v89_v3 = vld [vmem:[%s1393_s1 + $0x8] sm:$0xff]  ;;  %v174_v4 = vld [vmem:[%s1395_s3] sm:$0xff] }
   0x9   :  { %754 = vset.pattern.permute.xlu0 %v794_v1  ;;  %755 = vset.pattern.permute.xlu1 %v794_v1  ;;  %vm176_vm0 = vcmp.gt.f32.partialorder %v174_v4, 0.0  ;;  %v175_v6 = vld [vmem:[%s1395_s3 + $0x8] sm:$0xff]  ;;  %v88_v7 = vld [vmem:[%s1393_s1] sm:$0xff]  ;;  %v796_v10 = vmov -1e+30   ;;  %v70_v11 = vld [vmem:[%s1392_s0 + $0x10] sm:$0xff] }
   0xa   :  { %756 = vset.pattern.permute.xlu2 %v795_v2  ;;  %97 = vperm.xlu0 %754, %v89_v3   ;;  %v178_v5 = vsel %vm176_vm0, 1, %v794_v1  ;;  %vm177_vm1 = vcmp.gt.f32.partialorder %v175_v6, 0.0  ;;  %v260_v9 = vld [vmem:[%s1396_s4] sm:$0x3]  ;;  %67 = vst [vmem:[#allocation3] sm:$0xf] %v796_v10  ;;  %v78_v13 = vceil.f32 %v70_v11  ;;  %v82_v14 = vfloor.f32 %v70_v11 }
   0xb   :  { %181 = vperm.xlu1 %755, %v178_v5   ;;  %220 = vperm.xlu2 %756, %v178_v5   ;;  %v179_v8 = vsel %vm177_vm1, 1, %v794_v1  ;;  %v71_v12 = vld [vmem:[%s1392_s0 + $0x18] sm:$0xff]  ;;  %vm74_vm2 = vcmp.lt.f32.partialorder %v70_v11, 0.0  ;;  %v68_v19 = vld [vmem:[%s1392_s0] sm:$0xff]  ;;  %v69_v21 = vld [vmem:[%s1392_s0 + $0x8] sm:$0xff]  ;;  %vm122_vm14 = vcmask 130048  }
   0xc   :  { %v79_v15 = vceil.f32 %v71_v12  ;;  %v83_v16 = vfloor.f32 %v71_v12  ;;  %vm75_vm3 = vcmp.lt.f32.partialorder %v71_v12, 0.0  ;;  %v86_v18 = vsel %vm74_vm2, %v78_v13, %v82_v14  ;;  %v908_v45 = vld [vmem:[%s1394_s2] sm:$0x3]  ;;  %v325_v48 = vld [vmem:[%s1399_s7 + $0xf0] sm:$0xff] }
   0xd   :  { %v76_v24 = vceil.f32 %v68_v19  ;;  %v77_v27 = vceil.f32 %v69_v21  ;;  %v80_v28 = vfloor.f32 %v68_v19  ;;  %v81_v29 = vfloor.f32 %v69_v21  ;;  %v357_v49 = vld [vmem:[%s1399_s7 + $0x1f0] sm:$0xff]  ;;  %439 = vmatpush.msra.mxu2 %v325_v48  ;;  %v323_v53 = vld [vmem:[%s1399_s7 + $0xe0] sm:$0xff] }
   0xe   :  { %v87_v20 = vsel %vm75_vm3, %v79_v15, %v83_v16  ;;  %vm72_vm4 = vcmp.lt.f32.partialorder %v68_v19, 0.0  ;;  %vm73_vm5 = vcmp.lt.f32.partialorder %v69_v21, 0.0  ;;  %v389_v50 = vld [vmem:[%s1399_s7 + $0x2f0] sm:$0xff]  ;;  %459 = vmatpush.msra.mxu3 %v357_v49  ;;  %v355_v58 = vld [vmem:[%s1399_s7 + $0x1e0] sm:$0xff]  ;;  %vm210_vm15 = vcmask 1040384  }
   0xf   :  { %v84_v35 = vsel %vm72_vm4, %v76_v24, %v80_v28  ;;  %v85_v36 = vsel %vm73_vm5, %v77_v27, %v81_v29  ;;  %479 = vmatpush.msra.mxu0 %v389_v50  ;;  %v387_v59 = vld [vmem:[%s1399_s7 + $0x2e0] sm:$0xff]  ;;  %440 = vmatpush.msra.mxu2 %v323_v53  ;;  %v321_v3 = vld [vmem:[%s1399_s7 + $0xd0] sm:$0xff]  ;;  %vm169_vm1 = vcmask 1041408  }
  0x10   :  { %460 = vmatpush.msra.mxu3 %v355_v58  ;;  %v353_v4 = vld [vmem:[%s1399_s7 + $0x1d0] sm:$0xff]  ;;  %v351_v12 = vld [vmem:[%s1399_s7 + $0x1c0] sm:$0xff]  ;;  %v797_v58 = vmov 0.0  }
  0x11   :  { %v385_v5 = vld [vmem:[%s1399_s7 + $0x2d0] sm:$0xff]  ;;  %480 = vmatpush.msra.mxu0 %v387_v59  ;;  %441 = vmatpush.msra.mxu2 %v321_v3  ;;  %v383_v13 = vld [vmem:[%s1399_s7 + $0x2c0] sm:$0xff]  ;;  %66 = vst [vmem:[#allocation2] sm:$0xf] %v797_v58 }
  0x12   :  { %92 = vperm.xlu0 %754, %v88_v7   ;;  %v421_v7 = vld [vmem:[%s1399_s7 + $0x3f0] sm:$0xff]  ;;  %461 = vmatpush.msra.mxu3 %v353_v4  ;;  %v419_v15 = vld [vmem:[%s1399_s7 + $0x3e0] sm:$0xff] }
  0x13   :  { %184 = vperm.xlu1 %755, %v179_v8   ;;  %223 = vperm.xlu2 %756, %v179_v8   ;;  %v319_v8 = vld [vmem:[%s1399_s7 + $0xc0] sm:$0xff]  ;;  %v317_v16 = vld [vmem:[%s1399_s7 + $0xb0] sm:$0xff] }
  0x14   :  { %481 = vmatpush.msra.mxu0 %v385_v5  ;;  %442 = vmatpush.msra.mxu2 %v319_v8  ;;  %v381_v21 = vld [vmem:[%s1399_s7 + $0x2b0] sm:$0xff]  ;;  %v347_v53 = vld [vmem:[%s1399_s7 + $0x1a0] sm:$0xff] }
  0x15   :  { %462 = vmatpush.msra.mxu3 %v351_v12  ;;  %v377_v59 = vld [vmem:[%s1399_s7 + $0x290] sm:$0xff]  ;;  %v307_v5 = vld [vmem:[%s1399_s7 + $0x60] sm:$0xff] }
  0x16   :  { %482 = vmatpush.msra.mxu0 %v383_v13  ;;  %443 = vmatpush.msra.mxu2 %v317_v16  ;;  %v373_v3 = vld [vmem:[%s1399_s7 + $0x270] sm:$0xff]  ;;  %v403_v8 = vld [vmem:[%s1399_s7 + $0x360] sm:$0xff]  ;;  %v798_v13 = vmov 269488144  }
  0x17   :  { %v405_v4 = vld [vmem:[%s1399_s7 + $0x370] sm:$0xff]  ;;  %v335_v16 = vld [vmem:[%s1399_s7 + $0x140] sm:$0xff] }
  0x18   :  { %483 = vmatpush.msra.mxu0 %v381_v21  ;;  %v401_v12 = vld [vmem:[%s1399_s7 + $0x350] sm:$0xff] }
  0x19   :  { %v365_v21 = vld [vmem:[%s1399_s7 + $0x230] sm:$0xff] }
  0x1a   :  { %263 = vperm.xlu0 %754, %v260_v9  }
  0x65   :  { %v896_v17 = vpop.permute.xlu2 %220 }
  0x66   :  { %vm225_vm8 = vcmp.eq.s32.totalorder %v896_v17, 1 }
  0x6d   :  { %v224_v37 = vpop.permute.xlu2 %223 }
  0x6e   :  { %vm226_vm9 = vcmp.eq.s32.totalorder %v224_v37, 1 }
  0x7c   :  { %v98_v22 = vpop.permute.xlu0 %97 }
  0x7d   :  { %v102_v23 = vmul.f32 %v98_v22, %v86_v18  ;;  %v103_v25 = vmul.f32 %v98_v22, %v87_v20  ;;  %v182_v26 = vpop.permute.xlu1 %181  ;;  %v349_v20 = vld [vmem:[%s1399_s7 + $0x1b0] sm:$0xff] }
  0x7e   :  { %vm186_vm12 = vcmp.eq.s32.totalorder %v182_v26, 1  ;;  %v417_v26 = vld [vmem:[%s1399_s7 + $0x3d0] sm:$0xff]  ;;  %463 = vmatpush.msra.mxu3 %v349_v20 }
  0x7f   :  { %v110_v30 = vceil.f32 %v102_v23  ;;  %v114_v31 = vfloor.f32 %v102_v23  ;;  %vm106_vm6 = vcmp.lt.f32.partialorder %v102_v23, 0.0  ;;  %v111_v33 = vceil.f32 %v103_v25  ;;  %v333_v20 = vld [vmem:[%s1399_s7 + $0x130] sm:$0xff] }
  0x80   :  { %v115_v34 = vfloor.f32 %v103_v25  ;;  %vm107_vm7 = vcmp.lt.f32.partialorder %v103_v25, 0.0  ;;  %464 = vmatpush.msra.mxu3 %v347_v53  ;;  %v416_v53 = vld [vmem:[%s1399_s7 + $0x3c8] sm:$0xff] }
  0x81   :  { %v118_v32 = vsel %vm106_vm6, %v110_v30, %v114_v31  ;;  %v415_v31 = vld [vmem:[%s1399_s7 + $0x3c0] sm:$0xff] }
  0x82   :  { %140 = vmatpush.msra.mxu1 %v118_v32  ;;  %v119_v41 = vsel %vm107_vm7, %v111_v33, %v115_v34  ;;  %v229_v51 = vsel %vm226_vm9, %v118_v32, -1e+30 }
  0x83   :  { %v230_v52 = vsel %vm226_vm9, %v119_v41, -1e+30 }
  0x84   :  { %v93_v38 = vpop.permute.xlu0 %92 }
  0x85   :  { %v100_v39 = vmul.f32 %v93_v38, %v84_v35  ;;  %v101_v40 = vmul.f32 %v93_v38, %v85_v36  ;;  %v185_v42 = vpop.permute.xlu1 %184  ;;  %v413_v35 = vld [vmem:[%s1399_s7 + $0x3b0] sm:$0xff]  ;;  %v214_v38 = vlaneseq }
  0x86   :  { %vm187_vm13 = vcmp.eq.s32.totalorder %v185_v42, 1  ;;  %v206_v42 = vld [vmem:[#allocation3] ss:$2 sm:$0x3] }
  0x87   :  { %vm104_vm10 = vcmp.lt.f32.partialorder %v100_v39, 0.0  ;;  %vm105_vm11 = vcmp.lt.f32.partialorder %v101_v40, 0.0  ;;  %v108_v43 = vceil.f32 %v100_v39  ;;  %v109_v44 = vceil.f32 %v101_v40 }
  0x88   :  { %v112_v46 = vfloor.f32 %v100_v39  ;;  %v113_v47 = vfloor.f32 %v101_v40  ;;  %v190_v56 = vsel %vm187_vm13, %v118_v32, -1e+30  ;;  %v191_v57 = vsel %vm187_vm13, %v119_v41, -1e+30 }
  0x89   :  { %vm216_vm0 = vcmp.lt.s32.totalorder %v214_v38, 256  ;;  %v326_v38 = vld [vmem:[%s1399_s7 + $0xf8] sm:$0xff] }
  0x8a   :  { %v116_v54 = vsel %vm104_vm10, %v108_v43, %v112_v46  ;;  %v117_v55 = vsel %vm105_vm11, %v109_v44, %v113_v47  ;;  %vm737_vm10 = vcmask 1024  }
  0x8b   :  { %v188_v60 = vsel %vm186_vm12, %v116_v54, -1e+30  ;;  %v189_v61 = vsel %vm186_vm12, %v117_v55, -1e+30  ;;  %v227_v62 = vsel %vm225_vm8, %v116_v54, -1e+30  ;;  %141 = vmatpush.msra.mxu1 %v116_v54 }
  0x8c   :  { %v192_v63 = vmax.f32 %v188_v60, %v190_v56  ;;  %v199_v0 = vmax.f32 %v189_v61, %v191_v57  ;;  %v228_v1 = vsel %vm225_vm8, %v117_v55, -1e+30  ;;  %v231_v2 = vmax.f32 %v227_v62, %v229_v51  ;;  %744 = vmatmul.msk.f32.vlgmr.msra.gmra.mxu1 %vm122_vm14, %v908_v45  ;;  %v379_v54 = vld [vmem:[%s1399_s7 + $0x2a0] sm:$0xff]  ;;  %v313_v56 = vld [vmem:[%s1399_s7 + $0x90] sm:$0xff] }
  0x8d   :  { %v238_v6 = vmax.f32 %v228_v1, %v230_v52  ;;  %160 = vmatpush.msrb.mxu1 %v119_v41  ;;  %v315_v52 = vld [vmem:[%s1399_s7 + $0xa0] sm:$0xff]  ;;  %v345_v57 = vld [vmem:[%s1399_s7 + $0x190] sm:$0xff]  ;;  %484 = vmatpush.msra.mxu0 %v379_v54  ;;  %v318_v54 = vld [vmem:[%s1399_s7 + $0xb8] sm:$0xff] }
  0x8e   :  { %v193_v9 = vrot.slane %v192_v63, 4  ;;  %v200_v10 = vrot.slane %v199_v0, 4  ;;  %v232_v11 = vrot.slane %v231_v2, 4  ;;  %444 = vmatpush.msra.mxu2 %v315_v52  ;;  %v409_v60 = vld [vmem:[%s1399_s7 + $0x390] sm:$0xff]  ;;  %v311_v61 = vld [vmem:[%s1399_s7 + $0x80] sm:$0xff]  ;;  %465 = vmatpush.msra.mxu3 %v345_v57  ;;  %v384_v52 = vld [vmem:[%s1399_s7 + $0x2c8] sm:$0xff] }
  0x8f   :  { %v239_v14 = vrot.slane %v238_v6, 4  ;;  %161 = vmatpush.msrb.mxu1 %v117_v55  ;;  %v411_v55 = vld [vmem:[%s1399_s7 + $0x3a0] sm:$0xff]  ;;  %485 = vmatpush.msra.mxu0 %v377_v59  ;;  %v309_v1 = vld [vmem:[%s1399_s7 + $0x70] sm:$0xff]  ;;  %v414_v57 = vld [vmem:[%s1399_s7 + $0x3b8] sm:$0xff] }
  0x90   :  { %v194_v17 = vmax.f32 %v192_v63, %v193_v9  ;;  %v201_v18 = vmax.f32 %v199_v0, %v200_v10  ;;  %v233_v19 = vmax.f32 %v231_v2, %v232_v11  ;;  %445 = vmatpush.msra.mxu2 %v313_v56  ;;  %v343_v62 = vld [vmem:[%s1399_s7 + $0x180] sm:$0xff]  ;;  %v341_v2 = vld [vmem:[%s1399_s7 + $0x170] sm:$0xff]  ;;  %v382_v56 = vld [vmem:[%s1399_s7 + $0x2b8] sm:$0xff] }
  0x91   :  { %499 = vmatpush.msra.mxu1 %v421_v7  ;;  %v240_v22 = vmax.f32 %v238_v6, %v239_v14  ;;  %v375_v63 = vld [vmem:[%s1399_s7 + $0x280] sm:$0xff]  ;;  %466 = vmatpush.msra.mxu3 %v343_v62  ;;  %v305_v9 = vld [vmem:[%s1399_s7 + $0x50] sm:$0xff]  ;;  %v266_v14 = vunpack.c.l.s4 %v798_v13  ;;  %v316_v59 = vld [vmem:[%s1399_s7 + $0xa8] sm:$0xff] }
  0x92   :  { %v195_v23 = vrot.slane %v194_v17, 2  ;;  %v202_v24 = vrot.slane %v201_v18, 2  ;;  %v234_v25 = vrot.slane %v233_v19, 2  ;;  %v407_v0 = vld [vmem:[%s1399_s7 + $0x380] sm:$0xff]  ;;  %446 = vmatpush.msra.mxu2 %v311_v61  ;;  %486 = vmatpush.msra.mxu0 %v375_v63  ;;  %v337_v10 = vld [vmem:[%s1399_s7 + $0x150] sm:$0xff]  ;;  %v380_v62 = vld [vmem:[%s1399_s7 + $0x2a8] sm:$0xff] }
  0x93   :  { %500 = vmatpush.msra.mxu1 %v419_v15  ;;  %v241_v27 = vrot.slane %v240_v22, 2  ;;  %467 = vmatpush.msra.mxu3 %v341_v2  ;;  %v339_v6 = vld [vmem:[%s1399_s7 + $0x160] sm:$0xff]  ;;  %v369_v11 = vld [vmem:[%s1399_s7 + $0x250] sm:$0xff]  ;;  %v412_v63 = vld [vmem:[%s1399_s7 + $0x3a8] sm:$0xff] }
  0x94   :  { %v196_v28 = vmax.f32 %v194_v17, %v195_v23  ;;  %v203_v29 = vmax.f32 %v201_v18, %v202_v24  ;;  %v235_v30 = vmax.f32 %v233_v19, %v234_v25  ;;  %745 = vmatmul.msk.f32.vlgmr.msrb.gmra.mxu1 %vm122_vm14, %v908_v45  ;;  %v246_v45 = vld [vmem:[#allocation3 + $0x1] ss:$2 sm:$0x3]  ;;  %447 = vmatpush.msra.mxu2 %v309_v1  ;;  %v371_v7 = vld [vmem:[%s1399_s7 + $0x260] sm:$0xff]  ;;  %v301_v19 = vld [vmem:[%s1399_s7 + $0x30] sm:$0xff]  ;;  %v267_v23 = vunpack.c.0.s8 %v266_v14 }
  0x95   :  { %v242_v32 = vmax.f32 %v240_v22, %v241_v27  ;;  %501 = vmatpush.msra.mxu1 %v417_v26  ;;  %487 = vmatpush.msra.mxu0 %v373_v3  ;;  %v303_v15 = vld [vmem:[%s1399_s7 + $0x40] sm:$0xff]  ;;  %v397_v22 = vld [vmem:[%s1399_s7 + $0x330] sm:$0xff]  ;;  %v264_v27 = vpop.permute.xlu0 %263  ;;  %v346_v1 = vld [vmem:[%s1399_s7 + $0x198] sm:$0xff] }
  0x96   :  { %v197_v33 = vrot.slane %v196_v28, 1  ;;  %v204_v34 = vrot.slane %v203_v29, 1  ;;  %v236_v36 = vrot.slane %v235_v30, 1  ;;  %448 = vmatpush.msra.mxu2 %v307_v5  ;;  %468 = vmatpush.msra.mxu3 %v339_v6  ;;  %v367_v17 = vld [vmem:[%s1399_s7 + $0x240] sm:$0xff]  ;;  %v378_v3 = vld [vmem:[%s1399_s7 + $0x298] sm:$0xff]  ;;  %v312_v5 = vld [vmem:[%s1399_s7 + $0x88] sm:$0xff] }
  0x97   :  { %v243_v37 = vrot.slane %v242_v32, 1  ;;  %502 = vmatpush.msra.mxu1 %v415_v31  ;;  %488 = vmatpush.msra.mxu0 %v371_v7  ;;  %v399_v18 = vld [vmem:[%s1399_s7 + $0x340] sm:$0xff]  ;;  %v361_v31 = vld [vmem:[%s1399_s7 + $0x210] sm:$0xff]  ;;  %v344_v6 = vld [vmem:[%s1399_s7 + $0x188] sm:$0xff] }
  0x98   :  { %v205_v39 = vmax.f32 %v203_v29, %v204_v34  ;;  %v198_v41 = vmax.f32 %v196_v28, %v197_v33  ;;  %v237_v44 = vmax.f32 %v235_v30, %v236_v36  ;;  %449 = vmatpush.msra.mxu2 %v305_v9  ;;  %469 = vmatpush.msra.mxu3 %v337_v10  ;;  %v299_v24 = vld [vmem:[%s1399_s7 + $0x20] sm:$0xff]  ;;  %v297_v29 = vld [vmem:[%s1399_s7 + $0x10] sm:$0xff]  ;;  %v376_v7 = vld [vmem:[%s1399_s7 + $0x288] sm:$0xff] }
  0x99   :  { %v244_v40 = vmax.f32 %v242_v32, %v243_v37  ;;  %503 = vmatpush.msra.mxu1 %v413_v35  ;;  %489 = vmatpush.msra.mxu0 %v369_v11  ;;  %v331_v25 = vld [vmem:[%s1399_s7 + $0x120] sm:$0xff]  ;;  %v329_v30 = vld [vmem:[%s1399_s7 + $0x110] sm:$0xff]  ;;  %v1102_v33 = vperm.slane %v264_v27, %v267_v23  ;;  %v310_v9 = vld [vmem:[%s1399_s7 + $0x78] sm:$0xff] }
  0x9a   :  { %v209_v43 = vrot.slane %v205_v39, 7  ;;  %450 = vmatpush.msra.mxu2 %v303_v15  ;;  %470 = vmatpush.msra.mxu3 %v335_v16  ;;  %v363_v26 = vld [vmem:[%s1399_s7 + $0x220] sm:$0xff]  ;;  %v393_v32 = vld [vmem:[%s1399_s7 + $0x310] sm:$0xff]  ;;  %v358_v39 = vld [vmem:[%s1399_s7 + $0x1f8] sm:$0xff] }
  0x9b   :  { %v249_v46 = vrot.slane %v244_v40, 7  ;;  %504 = vmatpush.msra.mxu1 %v411_v55  ;;  %490 = vmatpush.msra.mxu0 %v367_v17  ;;  %v395_v28 = vld [vmem:[%s1399_s7 + $0x320] sm:$0xff]  ;;  %v390_v40 = vld [vmem:[%s1399_s7 + $0x2f8] sm:$0xff]  ;;  %759 = vrcp.f32 %v1102_v33  ;;  %v308_v14 = vld [vmem:[%s1399_s7 + $0x68] sm:$0xff]  ;;  %vm275_vm3 = vweird.f32 %v1102_v33 }
  0x9c   :  { %v211_v47 = vsel %vm210_vm15, %v198_v41, %v209_v43  ;;  %451 = vmatpush.msra.mxu2 %v301_v19  ;;  %471 = vmatpush.msra.mxu3 %v333_v20  ;;  %v295_v34 = vld [vmem:[%s1399_s7] sm:$0xff]  ;;  %v422_v41 = vld [vmem:[%s1399_s7 + $0x3f8] sm:$0xff]  ;;  %v356_v43 = vld [vmem:[%s1399_s7 + $0x1e8] sm:$0xff] }
  0x9d   :  { %v213_v48 = vmax.f32 %v206_v42, %v211_v47  ;;  %v250_v49 = vsel %vm210_vm15, %v237_v44, %v249_v46  ;;  %505 = vmatpush.msra.mxu1 %v409_v60  ;;  %491 = vmatpush.msra.mxu0 %v365_v21  ;;  %v327_v35 = vld [vmem:[%s1399_s7 + $0x100] sm:$0xff]  ;;  %v324_v42 = vld [vmem:[%s1399_s7 + $0xe8] sm:$0xff]  ;;  %v322_v46 = vld [vmem:[%s1399_s7 + $0xd8] sm:$0xff] }
  0x9e   :  { %v252_v50 = vmax.f32 %v246_v45, %v250_v49  ;;  %452 = vmatpush.msra.mxu2 %v299_v24  ;;  %472 = vmatpush.msra.mxu3 %v331_v25  ;;  %v359_v36 = vld [vmem:[%s1399_s7 + $0x200] sm:$0xff]  ;;  %v388_v44 = vld [vmem:[%s1399_s7 + $0x2e8] sm:$0xff]  ;;  %v354_v47 = vld [vmem:[%s1399_s7 + $0x1d8] sm:$0xff] }
  0x9f   :  { %218 = vst.msk [vmem:[#allocation3] ss:$2 sm:$0x3] %vm216_vm0, %v213_v48  ;;  %506 = vmatpush.msra.mxu1 %v407_v0  ;;  %492 = vmatpush.msra.mxu0 %v363_v26  ;;  %v391_v37 = vld [vmem:[%s1399_s7 + $0x300] sm:$0xff]  ;;  %v420_v45 = vld [vmem:[%s1399_s7 + $0x3e8] sm:$0xff]  ;;  %v386_v48 = vld [vmem:[%s1399_s7 + $0x2d8] sm:$0xff] }
  0xa0   :  { %253 = vst.msk [vmem:[#allocation3 + $0x1] ss:$2 sm:$0x3] %vm216_vm0, %v252_v50  ;;  %453 = vmatpush.msra.mxu2 %v297_v29  ;;  %473 = vmatpush.msra.mxu3 %v329_v30  ;;  %v418_v49 = vld [vmem:[%s1399_s7 + $0x3d8] sm:$0xff]  ;;  %v320_v50 = vld [vmem:[%s1399_s7 + $0xc8] sm:$0xff] }
  0xa1   :  { %507 = vmatpush.msra.mxu1 %v405_v4  ;;  %493 = vmatpush.msra.mxu0 %v361_v31  ;;  %v350_v55 = vld [vmem:[%s1399_s7 + $0x1b8] sm:$0xff]  ;;  %v1177_v58 = vpop.eup %759  ;;  %v348_v60 = vld [vmem:[%s1399_s7 + $0x1a8] sm:$0xff] }
  0xa2   :  { %454 = vmatpush.msra.mxu2 %v295_v34  ;;  %474 = vmatpush.msra.mxu3 %v327_v35  ;;  %v314_v0 = vld [vmem:[%s1399_s7 + $0x98] sm:$0xff]  ;;  %v271_v2 = vmul.f32 %v1177_v58, %v1102_v33  ;;  %v340_v15 = vld [vmem:[%s1399_s7 + $0x168] sm:$0xff]  ;;  %vm276_vm2 = vweird.f32 %v1177_v58 }
  0xa3   :  { %508 = vmatpush.msra.mxu1 %v403_v8  ;;  %494 = vmatpush.msra.mxu0 %v359_v36  ;;  %v410_v4 = vld [vmem:[%s1399_s7 + $0x398] sm:$0xff]  ;;  %v408_v8 = vld [vmem:[%s1399_s7 + $0x388] sm:$0xff]  ;;  %vm1298_vm4 = vmor %vm275_vm3, %vm276_vm2 }
  0xa4   :  { %519 = vmatpush.msrb.mxu2 %v326_v38  ;;  %539 = vmatpush.msrb.mxu3 %v358_v39  ;;  %v342_v10 = vld [vmem:[%s1399_s7 + $0x178] sm:$0xff]  ;;  %v272_v11 = vsub.f32 1.0, %v271_v2  ;;  %v372_v17 = vld [vmem:[%s1399_s7 + $0x268] sm:$0xff] }
  0xa5   :  { %509 = vmatpush.msra.mxu1 %v401_v12  ;;  %559 = vmatpush.msrb.mxu0 %v390_v40  ;;  %v374_v12 = vld [vmem:[%s1399_s7 + $0x278] sm:$0xff]  ;;  %v120_v19 = vld [vmem:[#allocation2] sm:$0xf] }
  0xa6   :  { %520 = vmatpush.msrb.mxu2 %v324_v42  ;;  %540 = vmatpush.msrb.mxu3 %v356_v43  ;;  %v406_v13 = vld [vmem:[%s1399_s7 + $0x378] sm:$0xff]  ;;  %v273_v23 = vmul.f32 %v1177_v58, %v272_v11  ;;  %v304_v27 = vld [vmem:[%s1399_s7 + $0x48] sm:$0xff] }
  0xa7   :  { %v257_v51 = vld [vmem:[#allocation3] sm:$0xf]  ;;  %510 = vmatpush.msra.mxu1 %v399_v18  ;;  %560 = vmatpush.msrb.mxu0 %v388_v44  ;;  %v306_v21 = vld [vmem:[%s1399_s7 + $0x58] sm:$0xff]  ;;  %v688_v44 = vld [vmem:[%s1403_s11 + $0x50] sm:$0xff] }
  0xa8   :  { %258 = vst [vmem:[#allocation4] sm:$0xf] %v257_v51  ;;  %v352_v51 = vld [vmem:[%s1399_s7 + $0x1c8] sm:$0xff]  ;;  %521 = vmatpush.msrb.mxu2 %v322_v46  ;;  %541 = vmatpush.msrb.mxu3 %v354_v47  ;;  %v370_v24 = vld [vmem:[%s1399_s7 + $0x258] sm:$0xff] }
  0xa9   :  { %511 = vmatpush.msra.mxu1 %v397_v22  ;;  %561 = vmatpush.msrb.mxu0 %v386_v48  ;;  %v404_v18 = vld [vmem:[%s1399_s7 + $0x368] sm:$0xff]  ;;  %v338_v22 = vld [vmem:[%s1399_s7 + $0x158] sm:$0xff] }
  0xaa   :  { %522 = vmatpush.msrb.mxu2 %v320_v50  ;;  %542 = vmatpush.msrb.mxu3 %v352_v51  ;;  %v402_v25 = vld [vmem:[%s1399_s7 + $0x358] sm:$0xff]  ;;  %v368_v30 = vld [vmem:[%s1399_s7 + $0x248] sm:$0xff] }
  0xab   :  { %512 = vmatpush.msra.mxu1 %v395_v28  ;;  %562 = vmatpush.msrb.mxu0 %v384_v52  ;;  %v336_v28 = vld [vmem:[%s1399_s7 + $0x148] sm:$0xff]  ;;  %v302_v34 = vld [vmem:[%s1399_s7 + $0x38] sm:$0xff] }
  0xac   :  { %523 = vmatpush.msrb.mxu2 %v318_v54  ;;  %543 = vmatpush.msrb.mxu3 %v350_v55  ;;  %v400_v31 = vld [vmem:[%s1399_s7 + $0x348] sm:$0xff]  ;;  %v334_v35 = vld [vmem:[%s1399_s7 + $0x138] sm:$0xff] }
  0xad   :  { %513 = vmatpush.msra.mxu1 %v393_v32  ;;  %563 = vmatpush.msrb.mxu0 %v382_v56  ;;  %v274_v32 = vadd.f32 %v1177_v58, %v273_v23  ;;  %v366_v36 = vld [vmem:[%s1399_s7 + $0x238] sm:$0xff]  ;;  %v300_v39 = vld [vmem:[%s1399_s7 + $0x28] sm:$0xff] }
  0xae   :  { %524 = vmatpush.msrb.mxu2 %v316_v59  ;;  %544 = vmatpush.msrb.mxu3 %v348_v60  ;;  %v398_v38 = vld [vmem:[%s1399_s7 + $0x338] sm:$0xff]  ;;  %v332_v40 = vld [vmem:[%s1399_s7 + $0x128] sm:$0xff]  ;;  %v290_v60 = vld [vmem:[%s1397_s5] sm:$0xff] }
  0xaf   :  { %514 = vmatpush.msra.mxu1 %v391_v37  ;;  %564 = vmatpush.msrb.mxu0 %v380_v62  ;;  %v281_v37 = vand.u32 2147483648, %v1102_v33  ;;  %v364_v42 = vld [vmem:[%s1399_s7 + $0x228] sm:$0xff]  ;;  %v278_v46 = vsel %vm1298_vm4, %v1177_v58, %v274_v32  ;;  %v362_v47 = vld [vmem:[%s1399_s7 + $0x218] sm:$0xff] }
  0xb0   :  { %525 = vmatpush.msrb.mxu2 %v314_v0  ;;  %545 = vmatpush.msrb.mxu3 %v346_v1  ;;  %v396_v43 = vld [vmem:[%s1399_s7 + $0x328] sm:$0xff]  ;;  %v394_v48 = vld [vmem:[%s1399_s7 + $0x318] sm:$0xff] }
  0xb1   :  { %579 = vmatpush.msrb.mxu1 %v422_v41  ;;  %565 = vmatpush.msrb.mxu0 %v378_v3  ;;  %v279_v41 = vand.u32 2147483647, %v1102_v33  ;;  %v298_v33 = vld [vmem:[%s1399_s7 + $0x18] sm:$0xff]  ;;  %v296_v50 = vld [vmem:[%s1399_s7 + $0x8] sm:$0xff] }
  0xb2   :  { %526 = vmatpush.msrb.mxu2 %v312_v5  ;;  %546 = vmatpush.msrb.mxu3 %v344_v6  ;;  %v328_v51 = vld [vmem:[%s1399_s7 + $0x108] sm:$0xff]  ;;  %v616_v1 = vld [vmem:[#allocation6 + $0x78] sm:$0xff]  ;;  %v613_v11 = vld [vmem:[#allocation6 + $0x60] sm:$0xff] }
  0xb3   :  { %580 = vmatpush.msrb.mxu1 %v420_v45  ;;  %566 = vmatpush.msrb.mxu0 %v376_v7  ;;  %v330_v45 = vld [vmem:[%s1399_s7 + $0x118] sm:$0xff]  ;;  %vm280_vm5 = vcmp.eq.f32.partialorder %v279_v41, 8.507059e+37  ;;  %v360_v52 = vld [vmem:[%s1399_s7 + $0x208] sm:$0xff]  ;;  %v690_v41 = vld [vmem:[%s1403_s11 + $0x60] sm:$0xff] }
  0xb4   :  { %527 = vmatpush.msrb.mxu2 %v310_v9  ;;  %547 = vmatpush.msrb.mxu3 %v342_v10  ;;  %v632_v2 = vld [vmem:[#allocation6 + $0xf8] sm:$0xff]  ;;  %v615_v7 = vld [vmem:[#allocation6 + $0x70] sm:$0xff]  ;;  %v614_v9 = vld [vmem:[#allocation6 + $0x68] sm:$0xff] }
  0xb5   :  { %581 = vmatpush.msrb.mxu1 %v418_v49  ;;  %567 = vmatpush.msrb.mxu0 %v374_v12  ;;  %v282_v49 = vor.u32 1.1754944e-38, %v281_v37  ;;  %v630_v10 = vld [vmem:[#allocation6 + $0xe8] sm:$0xff]  ;;  %v612_v12 = vld [vmem:[#allocation6 + $0x58] sm:$0xff]  ;;  %v605_v23 = vld [vmem:[#allocation6 + $0x20] sm:$0xff] }
  0xb6   :  { %528 = vmatpush.msrb.mxu2 %v308_v14  ;;  %548 = vmatpush.msrb.mxu3 %v340_v15  ;;  %v610_v14 = vld [vmem:[#allocation6 + $0x48] sm:$0xff]  ;;  %v609_v15 = vld [vmem:[#allocation6 + $0x40] sm:$0xff] }
  0xb7   :  { %582 = vmatpush.msrb.mxu1 %v416_v53  ;;  %568 = vmatpush.msrb.mxu0 %v372_v17  ;;  %v392_v53 = vld [vmem:[%s1399_s7 + $0x308] sm:$0xff]  ;;  %v283_v54 = vsel %vm280_vm5, %v282_v49, %v278_v46  ;;  %v608_v17 = vld [vmem:[#allocation6 + $0x38] sm:$0xff]  ;;  %v621_v32 = vld [vmem:[#allocation6 + $0xa0] sm:$0xff] }
  0xb8   :  { %529 = vmatpush.msrb.mxu2 %v306_v21  ;;  %549 = vmatpush.msrb.mxu3 %v338_v22  ;;  %v606_v21 = vld [vmem:[#allocation6 + $0x28] sm:$0xff]  ;;  %v617_v37 = vld [vmem:[#allocation6 + $0x80] sm:$0xff] }
  0xb9   :  { %583 = vmatpush.msrb.mxu1 %v414_v57  ;;  %569 = vmatpush.msrb.mxu0 %v370_v24  ;;  %v626_v22 = vld [vmem:[#allocation6 + $0xc8] sm:$0xff]  ;;  %v625_v24 = vld [vmem:[#allocation6 + $0xc0] sm:$0xff] }
  0xba   :  { %530 = vmatpush.msrb.mxu2 %v304_v27  ;;  %550 = vmatpush.msrb.mxu3 %v336_v28  ;;  %v603_v27 = vld [vmem:[#allocation6 + $0x10] sm:$0xff]  ;;  %v686_v46 = vld [vmem:[%s1403_s11 + $0x40] sm:$0xff] }
  0xbb   :  { %584 = vmatpush.msrb.mxu1 %v412_v63  ;;  %570 = vmatpush.msrb.mxu0 %v368_v30  ;;  %v623_v28 = vld [vmem:[#allocation6 + $0xb0] sm:$0xff]  ;;  %v622_v30 = vld [vmem:[#allocation6 + $0xa8] sm:$0xff] }
  0xbc   :  { %531 = vmatpush.msrb.mxu2 %v302_v34  ;;  %551 = vmatpush.msrb.mxu3 %v334_v35  ;;  %v620_v34 = vld [vmem:[#allocation6 + $0x98] sm:$0xff]  ;;  %v619_v35 = vld [vmem:[#allocation6 + $0x90] sm:$0xff] }
  0xbd   :  { %585 = vmatpush.msrb.mxu1 %v410_v4  ;;  %571 = vmatpush.msrb.mxu0 %v366_v36  ;;  %v618_v36 = vld [vmem:[#allocation6 + $0x88] sm:$0xff] }
  0xbe   :  { %532 = vmatpush.msrb.mxu2 %v300_v39  ;;  %552 = vmatpush.msrb.mxu3 %v332_v40  ;;  %v692_v39 = vld [vmem:[%s1403_s11 + $0x70] sm:$0xff]  ;;  %v691_v40 = vld [vmem:[%s1403_s11 + $0x68] sm:$0xff] }
  0xbf   :  { %586 = vmatpush.msrb.mxu1 %v408_v8  ;;  %572 = vmatpush.msrb.mxu0 %v364_v42  ;;  %v631_v8 = vld [vmem:[#allocation6 + $0xf0] sm:$0xff]  ;;  %v689_v42 = vld [vmem:[%s1403_s11 + $0x58] sm:$0xff] }
  0xc0   :  { %533 = vmatpush.msrb.mxu2 %v298_v33  ;;  %553 = vmatpush.msrb.mxu3 %v330_v45  ;;  %v687_v45 = vld [vmem:[%s1403_s11 + $0x48] sm:$0xff] }
  0xc1   :  { %587 = vmatpush.msrb.mxu1 %v406_v13  ;;  %573 = vmatpush.msrb.mxu0 %v362_v47  ;;  %v611_v13 = vld [vmem:[#allocation6 + $0x50] sm:$0xff] }
  0xc2   :  { %534 = vmatpush.msrb.mxu2 %v296_v50  ;;  %554 = vmatpush.msrb.mxu3 %v328_v51  ;;  %v685_v50 = vld [vmem:[%s1403_s11 + $0x38] sm:$0xff] }
  0xc3   :  { %588 = vmatpush.msrb.mxu1 %v404_v18  ;;  %574 = vmatpush.msrb.mxu0 %v360_v52  ;;  %v628_v18 = vld [vmem:[#allocation6 + $0xd8] sm:$0xff] }
  0xc5   :  { %589 = vmatpush.msrb.mxu1 %v402_v25  ;;  %v604_v25 = vld [vmem:[#allocation6 + $0x18] sm:$0xff] }
  0xc7   :  { %590 = vmatpush.msrb.mxu1 %v400_v31  ;;  %v601_v31 = vld [vmem:[#allocation6] sm:$0xff] }
  0xc9   :  { %591 = vmatpush.msrb.mxu1 %v398_v38  ;;  %v693_v38 = vld [vmem:[%s1403_s11 + $0x78] sm:$0xff] }
  0xcb   :  { %592 = vmatpush.msrb.mxu1 %v396_v43  ;;  %v423_v43 = vld [vmem:[%s1400_s8] sm:$0x3] }
  0xcc   :  { %v425_v33 = vperm.slane %v423_v43, 0 }
  0xcd   :  { %593 = vmatpush.msrb.mxu1 %v394_v48 }
  0xcf   :  { %594 = vmatpush.msrb.mxu1 %v392_v53 }
 0x109   :  { %v143_v61 = vpop.f32.mrf.mxu1 }
 0x111   :  { %v163_v16 = vpop.f32.mrf.mxu1 }
 0x112   :  { %v168_v20 = vrot.slane %v163_v16, 6  ;;  %v629_v16 = vld [vmem:[#allocation6 + $0xe0] sm:$0xff] }
 0x114   :  { %v170_v26 = vsel %vm169_vm1, %v143_v61, %v168_v20  ;;  %v291_v61 = vld [vmem:[%s1398_s6] sm:$0xff]  ;;  %v627_v20 = vld [vmem:[#allocation6 + $0xd0] sm:$0xff] }
 0x115   :  { %v172_v29 = vadd.f32 %v170_v26, %v120_v19  ;;  %v292_v62 = vadd.f32 %v291_v61, %v290_v60  ;;  %v607_v19 = vld [vmem:[#allocation6 + $0x30] sm:$0xff]  ;;  %v624_v26 = vld [vmem:[#allocation6 + $0xb8] sm:$0xff] }
 0x117   :  { %173 = vst [vmem:[#allocation2] sm:$0xf] %v172_v29  ;;  %v602_v29 = vld [vmem:[#allocation6 + $0x8] sm:$0xff] }
 0x11e   :  { %v259_v55 = vld [vmem:[#allocation2] sm:$0xf] }
 0x11f   :  { %v284_v56 = vmul.f32 %v283_v54, %v259_v55  ;;  %v426_v55 = vperm.slane %v423_v43, 1 }
 0x121   :  { %vm285_vm6 = vcmp.lt.f32.partialorder %v284_v56, 0.0  ;;  %v286_v57 = vceil.f32 %v284_v56  ;;  %v287_v58 = vfloor.f32 %v284_v56 }
 0x123   :  { %v288_v59 = vsel %vm285_vm6, %v286_v57, %v287_v58 }
 0x124   :  { %289 = vst [vmem:[#allocation4 + $0x4] sm:$0xf] %v288_v59 }
 0x12b   :  { %v293_v63 = vld [vmem:[#allocation4] sm:$0xff] }
 0x12c   :  { %v294_v0 = vadd.f32 %v293_v63, %v292_v62 }
 0x12e   :  { %430 = vst [vmem:[#allocation1] ss:$4 sm:$0xff] %v294_v0 }
 0x135   :  { %v431_v3 = vld.sshfl [vmem:[#allocation1] sm:$0xff pattern:$0x73625140]  ;;  %v432_v4 = vld.sshfl [vmem:[#allocation1 + $0x8] sm:$0xff pattern:$0x73625140] }
 0x136   :  { %455 = vmatmul.f32.vlgmr.msra.gmra.mxu2 %v431_v3  ;;  %475 = vmatmul.f32.vlgmr.msra.gmra.mxu3 %v432_v4  ;;  %v433_v5 = vld.sshfl [vmem:[#allocation1 + $0x10] sm:$0xff pattern:$0x73625140]  ;;  %v434_v6 = vld.sshfl [vmem:[#allocation1 + $0x18] sm:$0xff pattern:$0x73625140] }
 0x137   :  { %495 = vmatmul.f32.vlgmr.msra.gmra.mxu0 %v433_v5  ;;  %515 = vmatmul.f32.vlgmr.msra.gmra.mxu1 %v434_v6 }
 0x138   :  { %637 = vmatpush.msra.mxu2 %v616_v1  ;;  %657 = vmatpush.msra.mxu3 %v632_v2 }
 0x139   :  { %698 = vmatpush.msra.mxu0 %v693_v38 }
 0x13a   :  { %638 = vmatpush.msra.mxu2 %v615_v7  ;;  %658 = vmatpush.msra.mxu3 %v631_v8  ;;  %v680_v7 = vld [vmem:[%s1403_s11 + $0x10] sm:$0xff]  ;;  %v679_v8 = vld [vmem:[%s1403_s11 + $0x8] sm:$0xff] }
 0x13b   :  { %699 = vmatpush.msra.mxu0 %v692_v39 }
 0x13c   :  { %639 = vmatpush.msra.mxu2 %v614_v9  ;;  %659 = vmatpush.msra.mxu3 %v630_v10  ;;  %v678_v9 = vld [vmem:[%s1403_s11] sm:$0xff] }
 0x13d   :  { %700 = vmatpush.msra.mxu0 %v691_v40  ;;  %v757_v10 = vld [vmem:[%s1402_s10] ss:$0 sm:$0xff] }
 0x13e   :  { %535 = vmatmul.f32.vlgmr.msrb.gmra.mxu2 %v431_v3  ;;  %555 = vmatmul.f32.vlgmr.msrb.gmra.mxu3 %v432_v4  ;;  %v684_v3 = vld [vmem:[%s1403_s11 + $0x30] sm:$0xff]  ;;  %v683_v4 = vld [vmem:[%s1403_s11 + $0x28] sm:$0xff] }
 0x13f   :  { %575 = vmatmul.f32.vlgmr.msrb.gmra.mxu0 %v433_v5  ;;  %595 = vmatmul.f32.vlgmr.msrb.gmra.mxu1 %v434_v6  ;;  %v682_v5 = vld [vmem:[%s1403_s11 + $0x20] sm:$0xff]  ;;  %v681_v6 = vld [vmem:[%s1403_s11 + $0x18] sm:$0xff] }
 0x140   :  { %640 = vmatpush.msra.mxu2 %v613_v11  ;;  %660 = vmatpush.msra.mxu3 %v629_v16  ;;  %v758_v16 = vld [vmem:[#allocation5] ss:$0 sm:$0xff] }
 0x141   :  { %701 = vmatpush.msra.mxu0 %v690_v41 }
 0x142   :  { %641 = vmatpush.msra.mxu2 %v612_v12  ;;  %661 = vmatpush.msra.mxu3 %v628_v18 }
 0x143   :  { %702 = vmatpush.msra.mxu0 %v689_v42 }
 0x144   :  { %642 = vmatpush.msra.mxu2 %v611_v13  ;;  %662 = vmatpush.msra.mxu3 %v627_v20 }
 0x145   :  { %703 = vmatpush.msra.mxu0 %v688_v44 }
 0x146   :  { %643 = vmatpush.msra.mxu2 %v610_v14  ;;  %663 = vmatpush.msra.mxu3 %v626_v22 }
 0x147   :  { %704 = vmatpush.msra.mxu0 %v687_v45 }
 0x148   :  { %644 = vmatpush.msra.mxu2 %v609_v15  ;;  %664 = vmatpush.msra.mxu3 %v625_v24 }
 0x149   :  { %705 = vmatpush.msra.mxu0 %v686_v46 }
 0x14a   :  { %645 = vmatpush.msra.mxu2 %v608_v17  ;;  %665 = vmatpush.msra.mxu3 %v624_v26 }
 0x14b   :  { %706 = vmatpush.msra.mxu0 %v685_v50 }
 0x14c   :  { %646 = vmatpush.msra.mxu2 %v607_v19  ;;  %666 = vmatpush.msra.mxu3 %v623_v28 }
 0x14d   :  { %707 = vmatpush.msra.mxu0 %v684_v3 }
 0x14e   :  { %647 = vmatpush.msra.mxu2 %v606_v21  ;;  %667 = vmatpush.msra.mxu3 %v622_v30 }
 0x14f   :  { %708 = vmatpush.msra.mxu0 %v683_v4 }
 0x150   :  { %648 = vmatpush.msra.mxu2 %v605_v23  ;;  %668 = vmatpush.msra.mxu3 %v621_v32 }
 0x151   :  { %709 = vmatpush.msra.mxu0 %v682_v5 }
 0x152   :  { %649 = vmatpush.msra.mxu2 %v604_v25  ;;  %669 = vmatpush.msra.mxu3 %v620_v34 }
 0x153   :  { %710 = vmatpush.msra.mxu0 %v681_v6 }
 0x154   :  { %650 = vmatpush.msra.mxu2 %v603_v27  ;;  %670 = vmatpush.msra.mxu3 %v619_v35 }
 0x155   :  { %711 = vmatpush.msra.mxu0 %v680_v7 }
 0x156   :  { %651 = vmatpush.msra.mxu2 %v602_v29  ;;  %671 = vmatpush.msra.mxu3 %v618_v36 }
 0x157   :  { %712 = vmatpush.msra.mxu0 %v679_v8 }
 0x158   :  { %652 = vmatpush.msra.mxu2 %v601_v31  ;;  %672 = vmatpush.msra.mxu3 %v617_v37 }
 0x159   :  { %713 = vmatpush.msra.mxu0 %v678_v9 }
 0x1b4   :  { %v496_v51 = vpop.f32.mrf.mxu0  ;;  %v516_v53 = vpop.f32.mrf.mxu1 }
 0x1b9   :  { %v456_v47 = vpop.f32.mrf.mxu2  ;;  %v476_v48 = vpop.f32.mrf.mxu3 }
 0x1ba   :  { %v457_v49 = vadd.f32 %v456_v47, %v425_v33 }
 0x1bc   :  { %v477_v52 = vadd.f32 %v476_v48, %v457_v49  ;;  %v576_v62 = vpop.f32.mrf.mxu0  ;;  %v596_v0 = vpop.f32.mrf.mxu1 }
 0x1be   :  { %v497_v54 = vadd.f32 %v496_v51, %v477_v52 }
 0x1c0   :  { %v517_v56 = vadd.f32 %v516_v53, %v497_v54 }
 0x1c1   :  { %v536_v57 = vpop.f32.mrf.mxu2  ;;  %v556_v60 = vpop.f32.mrf.mxu3 }
 0x1c2   :  { %v599_v58 = vmax.f32 %v517_v56, 0.0  ;;  %v537_v59 = vadd.f32 %v536_v57, %v426_v55 }
 0x1c4   :  { %v557_v61 = vadd.f32 %v556_v60, %v537_v59  ;;  %653 = vmatmul.f32.vlgmr.msra.gmra.mxu2 %v599_v58 }
 0x1c6   :  { %v577_v63 = vadd.f32 %v576_v62, %v557_v61 }
 0x1c8   :  { %v597_v1 = vadd.f32 %v596_v0, %v577_v63 }
 0x1ca   :  { %v600_v2 = vmax.f32 %v597_v1, 0.0 }
 0x1cc   :  { %673 = vmatmul.f32.vlgmr.msra.gmra.mxu3 %v600_v2 }
 0x247   :  { %v654_v11 = vpop.f32.mrf.mxu2 }
 0x248   :  { %v655_v12 = vadd.f32 %v757_v10, %v654_v11 }
 0x24f   :  { %v674_v13 = vpop.f32.mrf.mxu3 }
 0x250   :  { %v675_v14 = vadd.f32 %v674_v13, %v655_v12 }
 0x252   :  { %v677_v15 = vmax.f32 %v675_v14, 0.0 }
 0x254   :  { %714 = vmatmul.f32.vlgmr.msra.gmra.mxu0 %v677_v15 }
 0x2d1   :  { %v715_v17 = vpop.f32.mrf.mxu0 }
 0x2d2   :  { %v716_v18 = vadd.f32 %v758_v16, %v715_v17 }
 0x2d4   :  { %v718_v19 = vsub.f32 0.0, %v716_v18 }
 0x2d6   :  { %v719_v20 = vmul.f32 1.442695, %v718_v19 }
 0x2d8   :  { %761 = vpow2.f32 %v719_v20 }
 0x2de   :  { %v762_v21 = vpop.eup %761 }
 0x2df   :  { %v721_v22 = vadd.f32 1.0, %v762_v21 }
 0x2e1   :  { %763 = vrcp.f32 %v721_v22  ;;  %v733_v26 = vand.u32 2147483648, %v721_v22  ;;  %v731_v28 = vand.u32 2147483647, %v721_v22  ;;  %vm727_vm8 = vweird.f32 %v721_v22 }
 0x2e3   :  { %v734_v30 = vor.u32 1.1754944e-38, %v733_v26  ;;  %vm732_vm11 = vcmp.eq.f32.partialorder %v731_v28, 8.507059e+37 }
 0x2e7   :  { %v764_v23 = vpop.eup %763 }
 0x2e8   :  { %v723_v24 = vmul.f32 %v764_v23, %v721_v22  ;;  %vm728_vm7 = vweird.f32 %v764_v23 }
 0x2e9   :  { %vm729_vm9 = vmor %vm727_vm8, %vm728_vm7 }
 0x2ea   :  { %v724_v25 = vsub.f32 1.0, %v723_v24 }
 0x2ec   :  { %v725_v27 = vmul.f32 %v764_v23, %v724_v25 }
 0x2ee   :  { %v726_v29 = vadd.f32 %v764_v23, %v725_v27 }
 0x2f0   :  { %v730_v31 = vsel %vm729_vm9, %v764_v23, %v726_v29 }
 0x2f1   :  { %v735_v32 = vsel %vm732_vm11, %v734_v30, %v730_v31 }
 0x2f2   :  { %738 = vst.msk [vmem:[%s1405_s13] sm:$0x3] %vm737_vm10, %v735_v32 }
 0x2f3   :  { %743 = vsyncpa [#allocation7], 1 }

</bundles_post_ra>
